<compile_context>
chip_gen: v6e
topology: v6e:2x2x1
jax: 0.10.0
libtpu: 0.0.40
codegen_flags: <defaults>
</compile_context>

<pallas_src>
import numpy as np

import jax
import jax.numpy as jnp
from jax.experimental import pallas as pl
from jax.experimental.pallas import tpu as pltpu

CHANNELS = 1
IMG_SIZE = 32
BN_EPS = 0.8       # nn.BatchNorm2d(C, 0.8) -> eps = 0.8
NEG_SLOPE = 0.2


# ----------------------------------------------------------------------------
# Constant one-hot gather matrices for Conv2d(k=3, s=2, p=1) on an (H, W) grid.
# G[t, ho*Wo + wo, hi*W + wi] = 1  iff  (hi, wi) == (2ho + di - 1, 2wo + dj - 1)
# lies inside the image (t = di*3 + dj).  Out-of-range taps give all-zero rows,
# which is exactly zero padding.  Built with numpy at trace time (constants).
# ----------------------------------------------------------------------------
def _gather_mats(H, W):
    Ho, Wo = H // 2, W // 2
    G = np.zeros((9, Ho * Wo, H * W), np.float32)
    for di in range(3):
        for dj in range(3):
            t = di * 3 + dj
            for ho in range(Ho):
                hi = 2 * ho + di - 1
                if hi < 0 or hi >= H:
                    continue
                for wo in range(Wo):
                    wi = 2 * wo + dj - 1
                    if wi < 0 or wi >= W:
                        continue
                    G[t, ho * Wo + wo, hi * W + wi] = 1.0
    return G


# ----------------------------------------------------------------------------
# The fused Pallas kernel: conv1 -> conv2+BN -> conv3+BN -> conv4+BN -> fc1.
# One grid step = one image; all activations stay in VMEM/vregs.
# ----------------------------------------------------------------------------
def _disc_kernel(pat_ref, w1_ref, g2_ref, w2_ref, g3_ref, w3_ref,
                 g4_ref, w4_ref, wfc_ref, aff_ref, out_ref):
    f32, bf16 = jnp.float32, jnp.bfloat16
    aff = aff_ref[...]                                     # (11, 128) f32

    def leaky(v):
        return jnp.where(v > 0, v, NEG_SLOPE * v)

    # ---- conv1: single (256,9)@(9,16) matmul, bias + LeakyReLU (no BN) -----
    y = jnp.dot(pat_ref[0], w1_ref[...], preferred_element_type=f32)
    h = leaky(y + aff[0:1, 0:16]).astype(bf16)             # (256, 16)

    # ---- conv2..4: 9-tap gather-matmul conv + bias + LeakyReLU + BN affine --
    def conv_bn(h_in, g_ref, w_ref, cin, cout, n_out, row):
        acc = jnp.zeros((n_out, cout), f32)
        for t in range(9):                                  # static unroll
            tap = jnp.dot(g_ref[t], h_in, preferred_element_type=f32)
            acc = acc + jnp.dot(tap.astype(bf16),
                                w_ref[t * cin:(t + 1) * cin, :],
                                preferred_element_type=f32)
        y = leaky(acc + aff[row:row + 1, 0:cout])           # bias + activation
        # folded BatchNorm (running stats, eps = 0.8)
        return y * aff[row + 1:row + 2, 0:cout] + aff[row + 2:row + 3, 0:cout]

    h = conv_bn(h, g2_ref, w2_ref, 16, 32, 64, 1).astype(bf16)   # (64, 32)
    h = conv_bn(h, g3_ref, w3_ref, 32, 64, 16, 4).astype(bf16)   # (16, 64)
    h = conv_bn(h, g4_ref, w4_ref, 64, 128, 4, 7)                # (4, 128) f32

    # ---- fc1: Linear(512, 1) as a VPU reduction (no MXU, no extra launch) ---
    prod = h * wfc_ref[...]                                # (4, 128) f32
    s = jnp.sum(prod, axis=1, keepdims=True)               # (4, 1)
    s = jnp.sum(s, axis=0, keepdims=True)                  # (1, 1)
    out = s + aff[10:11, 0:1]                              # + fc bias
    out_ref[...] = out.reshape(1, 1, 1)


def _run_fused(patches, w1, g2, w2, g3, w3, g4, w4, wfc, aff):
    B = patches.shape[0]

    def full2(shape):
        return pl.BlockSpec(shape, lambda b: (0, 0))

    def full3(shape):
        return pl.BlockSpec(shape, lambda b: (0, 0, 0))

    out = pl.pallas_call(
        _disc_kernel,
        out_shape=jax.ShapeDtypeStruct((B, 1, 1), jnp.float32),
        grid=(B,),
        in_specs=[
            pl.BlockSpec((1, 256, 9), lambda b: (b, 0, 0)),   # conv1 patches
            full2((9, 16)),          # w1
            full3((9, 64, 256)),     # g2 (constant gather)
            full2((144, 32)),        # w2
            full3((9, 16, 64)),      # g3
            full2((288, 64)),        # w3
            full3((9, 4, 16)),       # g4
            full2((576, 128)),       # w4
            full2((4, 128)),         # wfc reordered to [hw, c]
            full2((11, 128)),        # packed bias / BN scale / shift / fc bias
        ],
        out_specs=pl.BlockSpec((1, 1, 1), lambda b: (b, 0, 0)),
        compiler_params=pltpu.CompilerParams(
            dimension_semantics=("parallel",)),
    )(patches, w1, g2, w2, g3, w3, g4, w4, wfc, aff)
    return out.reshape(B, 1)


# ----------------------------------------------------------------------------
# Wrapper-side parameter packing (pure layout plumbing, fused/const-folded).
# ----------------------------------------------------------------------------
def _pack_conv_w(w):
    """torch (Cout, Cin, 3, 3) -> (9*Cin, Cout) bf16, rows ordered (di, dj, ci)."""
    cout, cin = w.shape[0], w.shape[1]
    return jnp.transpose(w, (2, 3, 1, 0)).reshape(9 * cin, cout).astype(jnp.bfloat16)


def _fold_bn(bn):
    inv = jax.lax.rsqrt(bn["running_var"] + bn["eps"])
    scale = bn["gamma"] * inv
    shift = bn["beta"] - bn["running_mean"] * scale
    return scale, shift


def _pack_affine(params):
    def pad128(v):
        v = v.astype(jnp.float32)
        return jnp.pad(v, (0, 128 - v.shape[0]))

    s2, t2 = _fold_bn(params["bn2"])
    s3, t3 = _fold_bn(params["bn3"])
    s4, t4 = _fold_bn(params["bn4"])
    rows = [
        pad128(params["conv1"]["b"]),                               # row 0
        pad128(params["conv2"]["b"]), pad128(s2), pad128(t2),       # rows 1-3
        pad128(params["conv3"]["b"]), pad128(s3), pad128(t3),       # rows 4-6
        pad128(params["conv4"]["b"]), pad128(s4), pad128(t4),       # rows 7-9
        pad128(params["fc1"]["b"]),                                 # row 10 (col 0)
    ]
    return jnp.stack(rows, axis=0)                                  # (11, 128)


def _conv1_patches(x_nchw):
    """im2col for conv1 only: (B,1,32,32) -> (B,256,9) bf16 (~4.5 KiB/image)."""
    B = x_nchw.shape[0]
    Ho = IMG_SIZE // 2
    xp = jnp.pad(x_nchw[:, 0].astype(jnp.float32), ((0, 0), (1, 1), (1, 1)))
    cols = [xp[:, di:di + 2 * Ho:2, dj:dj + 2 * Ho:2]
            for di in range(3) for dj in range(3)]                  # 9 x (B,16,16)
    patches = jnp.stack(cols, axis=-1).reshape(B, Ho * Ho, 9)
    return patches.astype(jnp.bfloat16)


@jax.jit
def discriminator_forward(params, x_nchw):
    patches = _conv1_patches(x_nchw)
    w1 = _pack_conv_w(params["conv1"]["w"])                 # (9, 16)
    w2 = _pack_conv_w(params["conv2"]["w"])                 # (144, 32)
    w3 = _pack_conv_w(params["conv3"]["w"])                 # (288, 64)
    w4 = _pack_conv_w(params["conv4"]["w"])                 # (576, 128)
    # PyTorch flattens NCHW (128,2,2): flat index = c*4 + h*2 + w.
    wfc = params["fc1"]["w"].reshape(128, 4).T.astype(jnp.float32)  # (4,128)[hw,c]
    aff = _pack_affine(params)
    # constant in-kernel gather matrices for the three downsampling convs
    g2 = jnp.asarray(_gather_mats(16, 16), jnp.bfloat16)    # (9, 64, 256)
    g3 = jnp.asarray(_gather_mats(8, 8), jnp.bfloat16)      # (9, 16, 64)
    g4 = jnp.asarray(_gather_mats(4, 4), jnp.bfloat16)      # (9, 4, 16)
    return _run_fused(patches, w1, g2, w2, g3, w3, g4, w4, wfc, aff)


# ----------------------------------------------------------------------------
# Deterministic parameter init (shapes from Discriminator.__init__)
# ----------------------------------------------------------------------------
def init_params(key):
    def conv_init(k, cout, cin):
        k1, k2 = jax.random.split(k)
        bound = 1.0 / jnp.sqrt(float(cin * 9))
        return {
            "w": jax.random.uniform(k1, (cout, cin, 3, 3), jnp.float32, -bound, bound),
            "b": jax.random.uniform(k2, (cout,), jnp.float32, -bound, bound),
        }

    def bn_init(k, c):
        k1, k2, k3, k4 = jax.random.split(k, 4)
        return {
            "gamma": 1.0 + 0.1 * jax.random.normal(k1, (c,), jnp.float32),
            "beta": 0.1 * jax.random.normal(k2, (c,), jnp.float32),
            "running_mean": 0.05 * jax.random.normal(k3, (c,), jnp.float32),
            "running_var": 1.0 + 0.1 * jax.random.uniform(k4, (c,), jnp.float32),
            "eps": jnp.float32(BN_EPS),
        }

    ks = jax.random.split(key, 9)
    ds_size = IMG_SIZE // 2 ** 4
    fc_in = 128 * ds_size ** 2
    fc_bound = 1.0 / jnp.sqrt(float(fc_in))
    return {
        "conv1": conv_init(ks[0], 16, CHANNELS),
        "conv2": conv_init(ks[1], 32, 16),
        "bn2": bn_init(ks[2], 32),
        "conv3": conv_init(ks[3], 64, 32),
        "bn3": bn_init(ks[4], 64),
        "conv4": conv_init(ks[5], 128, 64),
        "bn4": bn_init(ks[6], 128),
        "fc1": {
            "w": jax.random.uniform(ks[7], (1, fc_in), jnp.float32, -fc_bound, fc_bound),
            "b": jax.random.uniform(ks[8], (1,), jnp.float32, -fc_bound, fc_bound),
        },
    }


if __name__ == "__main__":
    key = jax.random.PRNGKey(0)
    pkey, xkey = jax.random.split(key)
    params = init_params(pkey)
    x = jax.random.normal(xkey, (2, CHANNELS, IMG_SIZE, IMG_SIZE), jnp.float32)
    out = discriminator_forward(params, x)
    out = jax.block_until_ready(out)
    assert out.shape == (2, 1), out.shape
    assert out.dtype == jnp.float32
    print("KERNEL_OK")
</pallas_src>

<mosaic_0001>
module attributes {stable_mosaic.version = 11 : i64} {
  func.func @_disc_kernel(%arg0: i32, %arg1: memref<1x256x9xbf16, #tpu.memory_space<vmem>>, %arg2: memref<9x16xbf16, #tpu.memory_space<vmem>>, %arg3: memref<9x64x256xbf16, #tpu.memory_space<vmem>>, %arg4: memref<144x32xbf16, #tpu.memory_space<vmem>>, %arg5: memref<9x16x64xbf16, #tpu.memory_space<vmem>>, %arg6: memref<288x64xbf16, #tpu.memory_space<vmem>>, %arg7: memref<9x4x16xbf16, #tpu.memory_space<vmem>>, %arg8: memref<576x128xbf16, #tpu.memory_space<vmem>>, %arg9: memref<4x128xf32, #tpu.memory_space<vmem>>, %arg10: memref<11x128xf32, #tpu.memory_space<vmem>>, %arg11: memref<1x1x1xf32, #tpu.memory_space<vmem>>) attributes {dimension_semantics = [#tpu.dimension_semantics<parallel>], iteration_bounds = array<i64: 2>, scalar_prefetch = 0 : i64, scratch_operands = 0 : i64, tpu.core_type = #tpu.core_type<tc>, window_params = [{transform_indices = @transform_0, window_bounds = array<i64: 1, 256, 9>}, {pipeline_mode = #tpu.pipeline_mode<synchronous>, transform_indices = @transform_1, window_bounds = array<i64: 9, 16>}, {pipeline_mode = #tpu.pipeline_mode<synchronous>, transform_indices = @transform_2, window_bounds = array<i64: 9, 64, 256>}, {pipeline_mode = #tpu.pipeline_mode<synchronous>, transform_indices = @transform_3, window_bounds = array<i64: 144, 32>}, {pipeline_mode = #tpu.pipeline_mode<synchronous>, transform_indices = @transform_4, window_bounds = array<i64: 9, 16, 64>}, {pipeline_mode = #tpu.pipeline_mode<synchronous>, transform_indices = @transform_5, window_bounds = array<i64: 288, 64>}, {pipeline_mode = #tpu.pipeline_mode<synchronous>, transform_indices = @transform_6, window_bounds = array<i64: 9, 4, 16>}, {pipeline_mode = #tpu.pipeline_mode<synchronous>, transform_indices = @transform_7, window_bounds = array<i64: 576, 128>}, {pipeline_mode = #tpu.pipeline_mode<synchronous>, transform_indices = @transform_8, window_bounds = array<i64: 4, 128>}, {pipeline_mode = #tpu.pipeline_mode<synchronous>, transform_indices = @transform_9, window_bounds = array<i64: 11, 128>}, {transform_indices = @transform_10, window_bounds = array<i64: 1, 1, 1>}]} {
    %c0 = arith.constant 0 : index
    %c0_0 = arith.constant 0 : index
    %0 = vector.load %arg10[%c0, %c0_0] : memref<11x128xf32, #tpu.memory_space<vmem>>, vector<11x128xf32>
    %c0_1 = arith.constant 0 : index
    %c0_2 = arith.constant 0 : index
    %c0_3 = arith.constant 0 : index
    %1 = vector.load %arg1[%c0_1, %c0_2, %c0_3] : memref<1x256x9xbf16, #tpu.memory_space<vmem>>, vector<1x256x9xbf16>
    %2 = vector.shape_cast %1 : vector<1x256x9xbf16> to vector<256x9xbf16>
    %c0_4 = arith.constant 0 : index
    %c0_5 = arith.constant 0 : index
    %3 = vector.load %arg2[%c0_4, %c0_5] : memref<9x16xbf16, #tpu.memory_space<vmem>>, vector<9x16xbf16>
    %cst = arith.constant dense<0.000000e+00> : vector<256x16xf32>
    %4 = tpu.matmul %2, %3, %cst {dimension_numbers = #tpu.dot_dimension_numbers<[1], [0], [0], [1], [0, 0, 1, 1], [], []>} : vector<256x9xbf16>, vector<9x16xbf16>, vector<256x16xf32> -> vector<256x16xf32>
    %5 = vector.extract_strided_slice %0 {offsets = [0, 0], sizes = [1, 16], strides = [1, 1]} : vector<11x128xf32> to vector<1x16xf32>
    %6 = vector.broadcast %5 : vector<1x16xf32> to vector<256x16xf32>
    %7 = arith.addf %4, %6 : vector<256x16xf32>
    %cst_6 = arith.constant 0.000000e+00 : f32
    %8 = vector.broadcast %cst_6 : f32 to vector<256x16xf32>
    %9 = arith.cmpf ogt, %7, %8 : vector<256x16xf32>
    %cst_7 = arith.constant 2.000000e-01 : f32
    %10 = vector.broadcast %cst_7 : f32 to vector<256x16xf32>
    %11 = arith.mulf %10, %7 : vector<256x16xf32>
    %12 = arith.select %9, %7, %11 : vector<256x16xi1>, vector<256x16xf32>
    %13 = arith.truncf %12 : vector<256x16xf32> to vector<256x16xbf16>
    %cst_8 = arith.constant 0.000000e+00 : f32
    %14 = vector.broadcast %cst_8 : f32 to vector<64x32xf32>
    %c0_9 = arith.constant 0 : index
    %c0_10 = arith.constant 0 : index
    %c0_11 = arith.constant 0 : index
    %15 = vector.load %arg3[%c0_9, %c0_10, %c0_11] : memref<9x64x256xbf16, #tpu.memory_space<vmem>>, vector<1x64x256xbf16>
    %16 = vector.shape_cast %15 : vector<1x64x256xbf16> to vector<64x256xbf16>
    %cst_12 = arith.constant dense<0.000000e+00> : vector<64x16xf32>
    %17 = tpu.matmul %16, %13, %cst_12 {dimension_numbers = #tpu.dot_dimension_numbers<[1], [0], [0], [1], [0, 0, 1, 1], [], []>} : vector<64x256xbf16>, vector<256x16xbf16>, vector<64x16xf32> -> vector<64x16xf32>
    %18 = arith.truncf %17 : vector<64x16xf32> to vector<64x16xbf16>
    %c0_13 = arith.constant 0 : index
    %c0_14 = arith.constant 0 : index
    %19 = vector.load %arg4[%c0_13, %c0_14] : memref<144x32xbf16, #tpu.memory_space<vmem>>, vector<16x32xbf16>
    %cst_15 = arith.constant dense<0.000000e+00> : vector<64x32xf32>
    %20 = tpu.matmul %18, %19, %cst_15 {dimension_numbers = #tpu.dot_dimension_numbers<[1], [0], [0], [1], [0, 0, 1, 1], [], []>} : vector<64x16xbf16>, vector<16x32xbf16>, vector<64x32xf32> -> vector<64x32xf32>
    %21 = arith.addf %14, %20 : vector<64x32xf32>
    %c1 = arith.constant 1 : index
    %c0_16 = arith.constant 0 : index
    %c0_17 = arith.constant 0 : index
    %22 = vector.load %arg3[%c1, %c0_16, %c0_17] : memref<9x64x256xbf16, #tpu.memory_space<vmem>>, vector<1x64x256xbf16>
    %23 = vector.shape_cast %22 : vector<1x64x256xbf16> to vector<64x256xbf16>
    %cst_18 = arith.constant dense<0.000000e+00> : vector<64x16xf32>
    %24 = tpu.matmul %23, %13, %cst_18 {dimension_numbers = #tpu.dot_dimension_numbers<[1], [0], [0], [1], [0, 0, 1, 1], [], []>} : vector<64x256xbf16>, vector<256x16xbf16>, vector<64x16xf32> -> vector<64x16xf32>
    %25 = arith.truncf %24 : vector<64x16xf32> to vector<64x16xbf16>
    %c16 = arith.constant 16 : index
    %c0_19 = arith.constant 0 : index
    %26 = vector.load %arg4[%c16, %c0_19] : memref<144x32xbf16, #tpu.memory_space<vmem>>, vector<16x32xbf16>
    %cst_20 = arith.constant dense<0.000000e+00> : vector<64x32xf32>
    %27 = tpu.matmul %25, %26, %cst_20 {dimension_numbers = #tpu.dot_dimension_numbers<[1], [0], [0], [1], [0, 0, 1, 1], [], []>} : vector<64x16xbf16>, vector<16x32xbf16>, vector<64x32xf32> -> vector<64x32xf32>
    %28 = arith.addf %21, %27 : vector<64x32xf32>
    %c2 = arith.constant 2 : index
    %c0_21 = arith.constant 0 : index
    %c0_22 = arith.constant 0 : index
    %29 = vector.load %arg3[%c2, %c0_21, %c0_22] : memref<9x64x256xbf16, #tpu.memory_space<vmem>>, vector<1x64x256xbf16>
    %30 = vector.shape_cast %29 : vector<1x64x256xbf16> to vector<64x256xbf16>
    %cst_23 = arith.constant dense<0.000000e+00> : vector<64x16xf32>
    %31 = tpu.matmul %30, %13, %cst_23 {dimension_numbers = #tpu.dot_dimension_numbers<[1], [0], [0], [1], [0, 0, 1, 1], [], []>} : vector<64x256xbf16>, vector<256x16xbf16>, vector<64x16xf32> -> vector<64x16xf32>
    %32 = arith.truncf %31 : vector<64x16xf32> to vector<64x16xbf16>
    %c32 = arith.constant 32 : index
    %c0_24 = arith.constant 0 : index
    %33 = vector.load %arg4[%c32, %c0_24] : memref<144x32xbf16, #tpu.memory_space<vmem>>, vector<16x32xbf16>
    %cst_25 = arith.constant dense<0.000000e+00> : vector<64x32xf32>
    %34 = tpu.matmul %32, %33, %cst_25 {dimension_numbers = #tpu.dot_dimension_numbers<[1], [0], [0], [1], [0, 0, 1, 1], [], []>} : vector<64x16xbf16>, vector<16x32xbf16>, vector<64x32xf32> -> vector<64x32xf32>
    %35 = arith.addf %28, %34 : vector<64x32xf32>
    %c3 = arith.constant 3 : index
    %c0_26 = arith.constant 0 : index
    %c0_27 = arith.constant 0 : index
    %36 = vector.load %arg3[%c3, %c0_26, %c0_27] : memref<9x64x256xbf16, #tpu.memory_space<vmem>>, vector<1x64x256xbf16>
    %37 = vector.shape_cast %36 : vector<1x64x256xbf16> to vector<64x256xbf16>
    %cst_28 = arith.constant dense<0.000000e+00> : vector<64x16xf32>
    %38 = tpu.matmul %37, %13, %cst_28 {dimension_numbers = #tpu.dot_dimension_numbers<[1], [0], [0], [1], [0, 0, 1, 1], [], []>} : vector<64x256xbf16>, vector<256x16xbf16>, vector<64x16xf32> -> vector<64x16xf32>
    %39 = arith.truncf %38 : vector<64x16xf32> to vector<64x16xbf16>
    %c48 = arith.constant 48 : index
    %c0_29 = arith.constant 0 : index
    %40 = vector.load %arg4[%c48, %c0_29] : memref<144x32xbf16, #tpu.memory_space<vmem>>, vector<16x32xbf16>
    %cst_30 = arith.constant dense<0.000000e+00> : vector<64x32xf32>
    %41 = tpu.matmul %39, %40, %cst_30 {dimension_numbers = #tpu.dot_dimension_numbers<[1], [0], [0], [1], [0, 0, 1, 1], [], []>} : vector<64x16xbf16>, vector<16x32xbf16>, vector<64x32xf32> -> vector<64x32xf32>
    %42 = arith.addf %35, %41 : vector<64x32xf32>
    %c4 = arith.constant 4 : index
    %c0_31 = arith.constant 0 : index
    %c0_32 = arith.constant 0 : index
    %43 = vector.load %arg3[%c4, %c0_31, %c0_32] : memref<9x64x256xbf16, #tpu.memory_space<vmem>>, vector<1x64x256xbf16>
    %44 = vector.shape_cast %43 : vector<1x64x256xbf16> to vector<64x256xbf16>
    %cst_33 = arith.constant dense<0.000000e+00> : vector<64x16xf32>
    %45 = tpu.matmul %44, %13, %cst_33 {dimension_numbers = #tpu.dot_dimension_numbers<[1], [0], [0], [1], [0, 0, 1, 1], [], []>} : vector<64x256xbf16>, vector<256x16xbf16>, vector<64x16xf32> -> vector<64x16xf32>
    %46 = arith.truncf %45 : vector<64x16xf32> to vector<64x16xbf16>
    %c64 = arith.constant 64 : index
    %c0_34 = arith.constant 0 : index
    %47 = vector.load %arg4[%c64, %c0_34] : memref<144x32xbf16, #tpu.memory_space<vmem>>, vector<16x32xbf16>
    %cst_35 = arith.constant dense<0.000000e+00> : vector<64x32xf32>
    %48 = tpu.matmul %46, %47, %cst_35 {dimension_numbers = #tpu.dot_dimension_numbers<[1], [0], [0], [1], [0, 0, 1, 1], [], []>} : vector<64x16xbf16>, vector<16x32xbf16>, vector<64x32xf32> -> vector<64x32xf32>
    %49 = arith.addf %42, %48 : vector<64x32xf32>
    %c5 = arith.constant 5 : index
    %c0_36 = arith.constant 0 : index
    %c0_37 = arith.constant 0 : index
    %50 = vector.load %arg3[%c5, %c0_36, %c0_37] : memref<9x64x256xbf16, #tpu.memory_space<vmem>>, vector<1x64x256xbf16>
    %51 = vector.shape_cast %50 : vector<1x64x256xbf16> to vector<64x256xbf16>
    %cst_38 = arith.constant dense<0.000000e+00> : vector<64x16xf32>
    %52 = tpu.matmul %51, %13, %cst_38 {dimension_numbers = #tpu.dot_dimension_numbers<[1], [0], [0], [1], [0, 0, 1, 1], [], []>} : vector<64x256xbf16>, vector<256x16xbf16>, vector<64x16xf32> -> vector<64x16xf32>
    %53 = arith.truncf %52 : vector<64x16xf32> to vector<64x16xbf16>
    %c80 = arith.constant 80 : index
    %c0_39 = arith.constant 0 : index
    %54 = vector.load %arg4[%c80, %c0_39] : memref<144x32xbf16, #tpu.memory_space<vmem>>, vector<16x32xbf16>
    %cst_40 = arith.constant dense<0.000000e+00> : vector<64x32xf32>
    %55 = tpu.matmul %53, %54, %cst_40 {dimension_numbers = #tpu.dot_dimension_numbers<[1], [0], [0], [1], [0, 0, 1, 1], [], []>} : vector<64x16xbf16>, vector<16x32xbf16>, vector<64x32xf32> -> vector<64x32xf32>
    %56 = arith.addf %49, %55 : vector<64x32xf32>
    %c6 = arith.constant 6 : index
    %c0_41 = arith.constant 0 : index
    %c0_42 = arith.constant 0 : index
    %57 = vector.load %arg3[%c6, %c0_41, %c0_42] : memref<9x64x256xbf16, #tpu.memory_space<vmem>>, vector<1x64x256xbf16>
    %58 = vector.shape_cast %57 : vector<1x64x256xbf16> to vector<64x256xbf16>
    %cst_43 = arith.constant dense<0.000000e+00> : vector<64x16xf32>
    %59 = tpu.matmul %58, %13, %cst_43 {dimension_numbers = #tpu.dot_dimension_numbers<[1], [0], [0], [1], [0, 0, 1, 1], [], []>} : vector<64x256xbf16>, vector<256x16xbf16>, vector<64x16xf32> -> vector<64x16xf32>
    %60 = arith.truncf %59 : vector<64x16xf32> to vector<64x16xbf16>
    %c96 = arith.constant 96 : index
    %c0_44 = arith.constant 0 : index
    %61 = vector.load %arg4[%c96, %c0_44] : memref<144x32xbf16, #tpu.memory_space<vmem>>, vector<16x32xbf16>
    %cst_45 = arith.constant dense<0.000000e+00> : vector<64x32xf32>
    %62 = tpu.matmul %60, %61, %cst_45 {dimension_numbers = #tpu.dot_dimension_numbers<[1], [0], [0], [1], [0, 0, 1, 1], [], []>} : vector<64x16xbf16>, vector<16x32xbf16>, vector<64x32xf32> -> vector<64x32xf32>
    %63 = arith.addf %56, %62 : vector<64x32xf32>
    %c7 = arith.constant 7 : index
    %c0_46 = arith.constant 0 : index
    %c0_47 = arith.constant 0 : index
    %64 = vector.load %arg3[%c7, %c0_46, %c0_47] : memref<9x64x256xbf16, #tpu.memory_space<vmem>>, vector<1x64x256xbf16>
    %65 = vector.shape_cast %64 : vector<1x64x256xbf16> to vector<64x256xbf16>
    %cst_48 = arith.constant dense<0.000000e+00> : vector<64x16xf32>
    %66 = tpu.matmul %65, %13, %cst_48 {dimension_numbers = #tpu.dot_dimension_numbers<[1], [0], [0], [1], [0, 0, 1, 1], [], []>} : vector<64x256xbf16>, vector<256x16xbf16>, vector<64x16xf32> -> vector<64x16xf32>
    %67 = arith.truncf %66 : vector<64x16xf32> to vector<64x16xbf16>
    %c112 = arith.constant 112 : index
    %c0_49 = arith.constant 0 : index
    %68 = vector.load %arg4[%c112, %c0_49] : memref<144x32xbf16, #tpu.memory_space<vmem>>, vector<16x32xbf16>
    %cst_50 = arith.constant dense<0.000000e+00> : vector<64x32xf32>
    %69 = tpu.matmul %67, %68, %cst_50 {dimension_numbers = #tpu.dot_dimension_numbers<[1], [0], [0], [1], [0, 0, 1, 1], [], []>} : vector<64x16xbf16>, vector<16x32xbf16>, vector<64x32xf32> -> vector<64x32xf32>
    %70 = arith.addf %63, %69 : vector<64x32xf32>
    %c8 = arith.constant 8 : index
    %c0_51 = arith.constant 0 : index
    %c0_52 = arith.constant 0 : index
    %71 = vector.load %arg3[%c8, %c0_51, %c0_52] : memref<9x64x256xbf16, #tpu.memory_space<vmem>>, vector<1x64x256xbf16>
    %72 = vector.shape_cast %71 : vector<1x64x256xbf16> to vector<64x256xbf16>
    %cst_53 = arith.constant dense<0.000000e+00> : vector<64x16xf32>
    %73 = tpu.matmul %72, %13, %cst_53 {dimension_numbers = #tpu.dot_dimension_numbers<[1], [0], [0], [1], [0, 0, 1, 1], [], []>} : vector<64x256xbf16>, vector<256x16xbf16>, vector<64x16xf32> -> vector<64x16xf32>
    %74 = arith.truncf %73 : vector<64x16xf32> to vector<64x16xbf16>
    %c128 = arith.constant 128 : index
    %c0_54 = arith.constant 0 : index
    %75 = vector.load %arg4[%c128, %c0_54] : memref<144x32xbf16, #tpu.memory_space<vmem>>, vector<16x32xbf16>
    %cst_55 = arith.constant dense<0.000000e+00> : vector<64x32xf32>
    %76 = tpu.matmul %74, %75, %cst_55 {dimension_numbers = #tpu.dot_dimension_numbers<[1], [0], [0], [1], [0, 0, 1, 1], [], []>} : vector<64x16xbf16>, vector<16x32xbf16>, vector<64x32xf32> -> vector<64x32xf32>
    %77 = arith.addf %70, %76 : vector<64x32xf32>
    %78 = vector.extract_strided_slice %0 {offsets = [1, 0], sizes = [1, 32], strides = [1, 1]} : vector<11x128xf32> to vector<1x32xf32>
    %79 = vector.broadcast %78 : vector<1x32xf32> to vector<64x32xf32>
    %80 = arith.addf %77, %79 : vector<64x32xf32>
    %cst_56 = arith.constant 0.000000e+00 : f32
    %81 = vector.broadcast %cst_56 : f32 to vector<64x32xf32>
    %82 = arith.cmpf ogt, %80, %81 : vector<64x32xf32>
    %cst_57 = arith.constant 2.000000e-01 : f32
    %83 = vector.broadcast %cst_57 : f32 to vector<64x32xf32>
    %84 = arith.mulf %83, %80 : vector<64x32xf32>
    %85 = arith.select %82, %80, %84 : vector<64x32xi1>, vector<64x32xf32>
    %86 = vector.extract_strided_slice %0 {offsets = [2, 0], sizes = [1, 32], strides = [1, 1]} : vector<11x128xf32> to vector<1x32xf32>
    %87 = vector.broadcast %86 : vector<1x32xf32> to vector<64x32xf32>
    %88 = arith.mulf %85, %87 : vector<64x32xf32>
    %89 = vector.extract_strided_slice %0 {offsets = [3, 0], sizes = [1, 32], strides = [1, 1]} : vector<11x128xf32> to vector<1x32xf32>
    %90 = vector.broadcast %89 : vector<1x32xf32> to vector<64x32xf32>
    %91 = arith.addf %88, %90 : vector<64x32xf32>
    %92 = arith.truncf %91 : vector<64x32xf32> to vector<64x32xbf16>
    %cst_58 = arith.constant 0.000000e+00 : f32
    %93 = vector.broadcast %cst_58 : f32 to vector<16x64xf32>
    %c0_59 = arith.constant 0 : index
    %c0_60 = arith.constant 0 : index
    %c0_61 = arith.constant 0 : index
    %94 = vector.load %arg5[%c0_59, %c0_60, %c0_61] : memref<9x16x64xbf16, #tpu.memory_space<vmem>>, vector<1x16x64xbf16>
    %95 = vector.shape_cast %94 : vector<1x16x64xbf16> to vector<16x64xbf16>
    %cst_62 = arith.constant dense<0.000000e+00> : vector<16x32xf32>
    %96 = tpu.matmul %95, %92, %cst_62 {dimension_numbers = #tpu.dot_dimension_numbers<[1], [0], [0], [1], [0, 0, 1, 1], [], []>} : vector<16x64xbf16>, vector<64x32xbf16>, vector<16x32xf32> -> vector<16x32xf32>
    %97 = arith.truncf %96 : vector<16x32xf32> to vector<16x32xbf16>
    %c0_63 = arith.constant 0 : index
    %c0_64 = arith.constant 0 : index
    %98 = vector.load %arg6[%c0_63, %c0_64] : memref<288x64xbf16, #tpu.memory_space<vmem>>, vector<32x64xbf16>
    %cst_65 = arith.constant dense<0.000000e+00> : vector<16x64xf32>
    %99 = tpu.matmul %97, %98, %cst_65 {dimension_numbers = #tpu.dot_dimension_numbers<[1], [0], [0], [1], [0, 0, 1, 1], [], []>} : vector<16x32xbf16>, vector<32x64xbf16>, vector<16x64xf32> -> vector<16x64xf32>
    %100 = arith.addf %93, %99 : vector<16x64xf32>
    %c1_66 = arith.constant 1 : index
    %c0_67 = arith.constant 0 : index
    %c0_68 = arith.constant 0 : index
    %101 = vector.load %arg5[%c1_66, %c0_67, %c0_68] : memref<9x16x64xbf16, #tpu.memory_space<vmem>>, vector<1x16x64xbf16>
    %102 = vector.shape_cast %101 : vector<1x16x64xbf16> to vector<16x64xbf16>
    %cst_69 = arith.constant dense<0.000000e+00> : vector<16x32xf32>
    %103 = tpu.matmul %102, %92, %cst_69 {dimension_numbers = #tpu.dot_dimension_numbers<[1], [0], [0], [1], [0, 0, 1, 1], [], []>} : vector<16x64xbf16>, vector<64x32xbf16>, vector<16x32xf32> -> vector<16x32xf32>
    %104 = arith.truncf %103 : vector<16x32xf32> to vector<16x32xbf16>
    %c32_70 = arith.constant 32 : index
    %c0_71 = arith.constant 0 : index
    %105 = vector.load %arg6[%c32_70, %c0_71] : memref<288x64xbf16, #tpu.memory_space<vmem>>, vector<32x64xbf16>
    %cst_72 = arith.constant dense<0.000000e+00> : vector<16x64xf32>
    %106 = tpu.matmul %104, %105, %cst_72 {dimension_numbers = #tpu.dot_dimension_numbers<[1], [0], [0], [1], [0, 0, 1, 1], [], []>} : vector<16x32xbf16>, vector<32x64xbf16>, vector<16x64xf32> -> vector<16x64xf32>
    %107 = arith.addf %100, %106 : vector<16x64xf32>
    %c2_73 = arith.constant 2 : index
    %c0_74 = arith.constant 0 : index
    %c0_75 = arith.constant 0 : index
    %108 = vector.load %arg5[%c2_73, %c0_74, %c0_75] : memref<9x16x64xbf16, #tpu.memory_space<vmem>>, vector<1x16x64xbf16>
    %109 = vector.shape_cast %108 : vector<1x16x64xbf16> to vector<16x64xbf16>
    %cst_76 = arith.constant dense<0.000000e+00> : vector<16x32xf32>
    %110 = tpu.matmul %109, %92, %cst_76 {dimension_numbers = #tpu.dot_dimension_numbers<[1], [0], [0], [1], [0, 0, 1, 1], [], []>} : vector<16x64xbf16>, vector<64x32xbf16>, vector<16x32xf32> -> vector<16x32xf32>
    %111 = arith.truncf %110 : vector<16x32xf32> to vector<16x32xbf16>
    %c64_77 = arith.constant 64 : index
    %c0_78 = arith.constant 0 : index
    %112 = vector.load %arg6[%c64_77, %c0_78] : memref<288x64xbf16, #tpu.memory_space<vmem>>, vector<32x64xbf16>
    %cst_79 = arith.constant dense<0.000000e+00> : vector<16x64xf32>
    %113 = tpu.matmul %111, %112, %cst_79 {dimension_numbers = #tpu.dot_dimension_numbers<[1], [0], [0], [1], [0, 0, 1, 1], [], []>} : vector<16x32xbf16>, vector<32x64xbf16>, vector<16x64xf32> -> vector<16x64xf32>
    %114 = arith.addf %107, %113 : vector<16x64xf32>
    %c3_80 = arith.constant 3 : index
    %c0_81 = arith.constant 0 : index
    %c0_82 = arith.constant 0 : index
    %115 = vector.load %arg5[%c3_80, %c0_81, %c0_82] : memref<9x16x64xbf16, #tpu.memory_space<vmem>>, vector<1x16x64xbf16>
    %116 = vector.shape_cast %115 : vector<1x16x64xbf16> to vector<16x64xbf16>
    %cst_83 = arith.constant dense<0.000000e+00> : vector<16x32xf32>
    %117 = tpu.matmul %116, %92, %cst_83 {dimension_numbers = #tpu.dot_dimension_numbers<[1], [0], [0], [1], [0, 0, 1, 1], [], []>} : vector<16x64xbf16>, vector<64x32xbf16>, vector<16x32xf32> -> vector<16x32xf32>
    %118 = arith.truncf %117 : vector<16x32xf32> to vector<16x32xbf16>
    %c96_84 = arith.constant 96 : index
    %c0_85 = arith.constant 0 : index
    %119 = vector.load %arg6[%c96_84, %c0_85] : memref<288x64xbf16, #tpu.memory_space<vmem>>, vector<32x64xbf16>
    %cst_86 = arith.constant dense<0.000000e+00> : vector<16x64xf32>
    %120 = tpu.matmul %118, %119, %cst_86 {dimension_numbers = #tpu.dot_dimension_numbers<[1], [0], [0], [1], [0, 0, 1, 1], [], []>} : vector<16x32xbf16>, vector<32x64xbf16>, vector<16x64xf32> -> vector<16x64xf32>
    %121 = arith.addf %114, %120 : vector<16x64xf32>
    %c4_87 = arith.constant 4 : index
    %c0_88 = arith.constant 0 : index
    %c0_89 = arith.constant 0 : index
    %122 = vector.load %arg5[%c4_87, %c0_88, %c0_89] : memref<9x16x64xbf16, #tpu.memory_space<vmem>>, vector<1x16x64xbf16>
    %123 = vector.shape_cast %122 : vector<1x16x64xbf16> to vector<16x64xbf16>
    %cst_90 = arith.constant dense<0.000000e+00> : vector<16x32xf32>
    %124 = tpu.matmul %123, %92, %cst_90 {dimension_numbers = #tpu.dot_dimension_numbers<[1], [0], [0], [1], [0, 0, 1, 1], [], []>} : vector<16x64xbf16>, vector<64x32xbf16>, vector<16x32xf32> -> vector<16x32xf32>
    %125 = arith.truncf %124 : vector<16x32xf32> to vector<16x32xbf16>
    %c128_91 = arith.constant 128 : index
    %c0_92 = arith.constant 0 : index
    %126 = vector.load %arg6[%c128_91, %c0_92] : memref<288x64xbf16, #tpu.memory_space<vmem>>, vector<32x64xbf16>
    %cst_93 = arith.constant dense<0.000000e+00> : vector<16x64xf32>
    %127 = tpu.matmul %125, %126, %cst_93 {dimension_numbers = #tpu.dot_dimension_numbers<[1], [0], [0], [1], [0, 0, 1, 1], [], []>} : vector<16x32xbf16>, vector<32x64xbf16>, vector<16x64xf32> -> vector<16x64xf32>
    %128 = arith.addf %121, %127 : vector<16x64xf32>
    %c5_94 = arith.constant 5 : index
    %c0_95 = arith.constant 0 : index
    %c0_96 = arith.constant 0 : index
    %129 = vector.load %arg5[%c5_94, %c0_95, %c0_96] : memref<9x16x64xbf16, #tpu.memory_space<vmem>>, vector<1x16x64xbf16>
    %130 = vector.shape_cast %129 : vector<1x16x64xbf16> to vector<16x64xbf16>
    %cst_97 = arith.constant dense<0.000000e+00> : vector<16x32xf32>
    %131 = tpu.matmul %130, %92, %cst_97 {dimension_numbers = #tpu.dot_dimension_numbers<[1], [0], [0], [1], [0, 0, 1, 1], [], []>} : vector<16x64xbf16>, vector<64x32xbf16>, vector<16x32xf32> -> vector<16x32xf32>
    %132 = arith.truncf %131 : vector<16x32xf32> to vector<16x32xbf16>
    %c160 = arith.constant 160 : index
    %c0_98 = arith.constant 0 : index
    %133 = vector.load %arg6[%c160, %c0_98] : memref<288x64xbf16, #tpu.memory_space<vmem>>, vector<32x64xbf16>
    %cst_99 = arith.constant dense<0.000000e+00> : vector<16x64xf32>
    %134 = tpu.matmul %132, %133, %cst_99 {dimension_numbers = #tpu.dot_dimension_numbers<[1], [0], [0], [1], [0, 0, 1, 1], [], []>} : vector<16x32xbf16>, vector<32x64xbf16>, vector<16x64xf32> -> vector<16x64xf32>
    %135 = arith.addf %128, %134 : vector<16x64xf32>
    %c6_100 = arith.constant 6 : index
    %c0_101 = arith.constant 0 : index
    %c0_102 = arith.constant 0 : index
    %136 = vector.load %arg5[%c6_100, %c0_101, %c0_102] : memref<9x16x64xbf16, #tpu.memory_space<vmem>>, vector<1x16x64xbf16>
    %137 = vector.shape_cast %136 : vector<1x16x64xbf16> to vector<16x64xbf16>
    %cst_103 = arith.constant dense<0.000000e+00> : vector<16x32xf32>
    %138 = tpu.matmul %137, %92, %cst_103 {dimension_numbers = #tpu.dot_dimension_numbers<[1], [0], [0], [1], [0, 0, 1, 1], [], []>} : vector<16x64xbf16>, vector<64x32xbf16>, vector<16x32xf32> -> vector<16x32xf32>
    %139 = arith.truncf %138 : vector<16x32xf32> to vector<16x32xbf16>
    %c192 = arith.constant 192 : index
    %c0_104 = arith.constant 0 : index
    %140 = vector.load %arg6[%c192, %c0_104] : memref<288x64xbf16, #tpu.memory_space<vmem>>, vector<32x64xbf16>
    %cst_105 = arith.constant dense<0.000000e+00> : vector<16x64xf32>
    %141 = tpu.matmul %139, %140, %cst_105 {dimension_numbers = #tpu.dot_dimension_numbers<[1], [0], [0], [1], [0, 0, 1, 1], [], []>} : vector<16x32xbf16>, vector<32x64xbf16>, vector<16x64xf32> -> vector<16x64xf32>
    %142 = arith.addf %135, %141 : vector<16x64xf32>
    %c7_106 = arith.constant 7 : index
    %c0_107 = arith.constant 0 : index
    %c0_108 = arith.constant 0 : index
    %143 = vector.load %arg5[%c7_106, %c0_107, %c0_108] : memref<9x16x64xbf16, #tpu.memory_space<vmem>>, vector<1x16x64xbf16>
    %144 = vector.shape_cast %143 : vector<1x16x64xbf16> to vector<16x64xbf16>
    %cst_109 = arith.constant dense<0.000000e+00> : vector<16x32xf32>
    %145 = tpu.matmul %144, %92, %cst_109 {dimension_numbers = #tpu.dot_dimension_numbers<[1], [0], [0], [1], [0, 0, 1, 1], [], []>} : vector<16x64xbf16>, vector<64x32xbf16>, vector<16x32xf32> -> vector<16x32xf32>
    %146 = arith.truncf %145 : vector<16x32xf32> to vector<16x32xbf16>
    %c224 = arith.constant 224 : index
    %c0_110 = arith.constant 0 : index
    %147 = vector.load %arg6[%c224, %c0_110] : memref<288x64xbf16, #tpu.memory_space<vmem>>, vector<32x64xbf16>
    %cst_111 = arith.constant dense<0.000000e+00> : vector<16x64xf32>
    %148 = tpu.matmul %146, %147, %cst_111 {dimension_numbers = #tpu.dot_dimension_numbers<[1], [0], [0], [1], [0, 0, 1, 1], [], []>} : vector<16x32xbf16>, vector<32x64xbf16>, vector<16x64xf32> -> vector<16x64xf32>
    %149 = arith.addf %142, %148 : vector<16x64xf32>
    %c8_112 = arith.constant 8 : index
    %c0_113 = arith.constant 0 : index
    %c0_114 = arith.constant 0 : index
    %150 = vector.load %arg5[%c8_112, %c0_113, %c0_114] : memref<9x16x64xbf16, #tpu.memory_space<vmem>>, vector<1x16x64xbf16>
    %151 = vector.shape_cast %150 : vector<1x16x64xbf16> to vector<16x64xbf16>
    %cst_115 = arith.constant dense<0.000000e+00> : vector<16x32xf32>
    %152 = tpu.matmul %151, %92, %cst_115 {dimension_numbers = #tpu.dot_dimension_numbers<[1], [0], [0], [1], [0, 0, 1, 1], [], []>} : vector<16x64xbf16>, vector<64x32xbf16>, vector<16x32xf32> -> vector<16x32xf32>
    %153 = arith.truncf %152 : vector<16x32xf32> to vector<16x32xbf16>
    %c256 = arith.constant 256 : index
    %c0_116 = arith.constant 0 : index
    %154 = vector.load %arg6[%c256, %c0_116] : memref<288x64xbf16, #tpu.memory_space<vmem>>, vector<32x64xbf16>
    %cst_117 = arith.constant dense<0.000000e+00> : vector<16x64xf32>
    %155 = tpu.matmul %153, %154, %cst_117 {dimension_numbers = #tpu.dot_dimension_numbers<[1], [0], [0], [1], [0, 0, 1, 1], [], []>} : vector<16x32xbf16>, vector<32x64xbf16>, vector<16x64xf32> -> vector<16x64xf32>
    %156 = arith.addf %149, %155 : vector<16x64xf32>
    %157 = vector.extract_strided_slice %0 {offsets = [4, 0], sizes = [1, 64], strides = [1, 1]} : vector<11x128xf32> to vector<1x64xf32>
    %158 = vector.broadcast %157 : vector<1x64xf32> to vector<16x64xf32>
    %159 = arith.addf %156, %158 : vector<16x64xf32>
    %cst_118 = arith.constant 0.000000e+00 : f32
    %160 = vector.broadcast %cst_118 : f32 to vector<16x64xf32>
    %161 = arith.cmpf ogt, %159, %160 : vector<16x64xf32>
    %cst_119 = arith.constant 2.000000e-01 : f32
    %162 = vector.broadcast %cst_119 : f32 to vector<16x64xf32>
    %163 = arith.mulf %162, %159 : vector<16x64xf32>
    %164 = arith.select %161, %159, %163 : vector<16x64xi1>, vector<16x64xf32>
    %165 = vector.extract_strided_slice %0 {offsets = [5, 0], sizes = [1, 64], strides = [1, 1]} : vector<11x128xf32> to vector<1x64xf32>
    %166 = vector.broadcast %165 : vector<1x64xf32> to vector<16x64xf32>
    %167 = arith.mulf %164, %166 : vector<16x64xf32>
    %168 = vector.extract_strided_slice %0 {offsets = [6, 0], sizes = [1, 64], strides = [1, 1]} : vector<11x128xf32> to vector<1x64xf32>
    %169 = vector.broadcast %168 : vector<1x64xf32> to vector<16x64xf32>
    %170 = arith.addf %167, %169 : vector<16x64xf32>
    %171 = arith.truncf %170 : vector<16x64xf32> to vector<16x64xbf16>
    %cst_120 = arith.constant 0.000000e+00 : f32
    %172 = vector.broadcast %cst_120 : f32 to vector<4x128xf32>
    %c0_121 = arith.constant 0 : index
    %c0_122 = arith.constant 0 : index
    %c0_123 = arith.constant 0 : index
    %173 = vector.load %arg7[%c0_121, %c0_122, %c0_123] : memref<9x4x16xbf16, #tpu.memory_space<vmem>>, vector<1x4x16xbf16>
    %174 = vector.shape_cast %173 : vector<1x4x16xbf16> to vector<4x16xbf16>
    %cst_124 = arith.constant dense<0.000000e+00> : vector<4x64xf32>
    %175 = tpu.matmul %174, %171, %cst_124 {dimension_numbers = #tpu.dot_dimension_numbers<[1], [0], [0], [1], [0, 0, 1, 1], [], []>} : vector<4x16xbf16>, vector<16x64xbf16>, vector<4x64xf32> -> vector<4x64xf32>
    %176 = arith.truncf %175 : vector<4x64xf32> to vector<4x64xbf16>
    %c0_125 = arith.constant 0 : index
    %c0_126 = arith.constant 0 : index
    %177 = vector.load %arg8[%c0_125, %c0_126] : memref<576x128xbf16, #tpu.memory_space<vmem>>, vector<64x128xbf16>
    %cst_127 = arith.constant dense<0.000000e+00> : vector<4x128xf32>
    %178 = tpu.matmul %176, %177, %cst_127 {dimension_numbers = #tpu.dot_dimension_numbers<[1], [0], [0], [1], [0, 0, 1, 1], [], []>} : vector<4x64xbf16>, vector<64x128xbf16>, vector<4x128xf32> -> vector<4x128xf32>
    %179 = arith.addf %172, %178 : vector<4x128xf32>
    %c1_128 = arith.constant 1 : index
    %c0_129 = arith.constant 0 : index
    %c0_130 = arith.constant 0 : index
    %180 = vector.load %arg7[%c1_128, %c0_129, %c0_130] : memref<9x4x16xbf16, #tpu.memory_space<vmem>>, vector<1x4x16xbf16>
    %181 = vector.shape_cast %180 : vector<1x4x16xbf16> to vector<4x16xbf16>
    %cst_131 = arith.constant dense<0.000000e+00> : vector<4x64xf32>
    %182 = tpu.matmul %181, %171, %cst_131 {dimension_numbers = #tpu.dot_dimension_numbers<[1], [0], [0], [1], [0, 0, 1, 1], [], []>} : vector<4x16xbf16>, vector<16x64xbf16>, vector<4x64xf32> -> vector<4x64xf32>
    %183 = arith.truncf %182 : vector<4x64xf32> to vector<4x64xbf16>
    %c64_132 = arith.constant 64 : index
    %c0_133 = arith.constant 0 : index
    %184 = vector.load %arg8[%c64_132, %c0_133] : memref<576x128xbf16, #tpu.memory_space<vmem>>, vector<64x128xbf16>
    %cst_134 = arith.constant dense<0.000000e+00> : vector<4x128xf32>
    %185 = tpu.matmul %183, %184, %cst_134 {dimension_numbers = #tpu.dot_dimension_numbers<[1], [0], [0], [1], [0, 0, 1, 1], [], []>} : vector<4x64xbf16>, vector<64x128xbf16>, vector<4x128xf32> -> vector<4x128xf32>
    %186 = arith.addf %179, %185 : vector<4x128xf32>
    %c2_135 = arith.constant 2 : index
    %c0_136 = arith.constant 0 : index
    %c0_137 = arith.constant 0 : index
    %187 = vector.load %arg7[%c2_135, %c0_136, %c0_137] : memref<9x4x16xbf16, #tpu.memory_space<vmem>>, vector<1x4x16xbf16>
    %188 = vector.shape_cast %187 : vector<1x4x16xbf16> to vector<4x16xbf16>
    %cst_138 = arith.constant dense<0.000000e+00> : vector<4x64xf32>
    %189 = tpu.matmul %188, %171, %cst_138 {dimension_numbers = #tpu.dot_dimension_numbers<[1], [0], [0], [1], [0, 0, 1, 1], [], []>} : vector<4x16xbf16>, vector<16x64xbf16>, vector<4x64xf32> -> vector<4x64xf32>
    %190 = arith.truncf %189 : vector<4x64xf32> to vector<4x64xbf16>
    %c128_139 = arith.constant 128 : index
    %c0_140 = arith.constant 0 : index
    %191 = vector.load %arg8[%c128_139, %c0_140] : memref<576x128xbf16, #tpu.memory_space<vmem>>, vector<64x128xbf16>
    %cst_141 = arith.constant dense<0.000000e+00> : vector<4x128xf32>
    %192 = tpu.matmul %190, %191, %cst_141 {dimension_numbers = #tpu.dot_dimension_numbers<[1], [0], [0], [1], [0, 0, 1, 1], [], []>} : vector<4x64xbf16>, vector<64x128xbf16>, vector<4x128xf32> -> vector<4x128xf32>
    %193 = arith.addf %186, %192 : vector<4x128xf32>
    %c3_142 = arith.constant 3 : index
    %c0_143 = arith.constant 0 : index
    %c0_144 = arith.constant 0 : index
    %194 = vector.load %arg7[%c3_142, %c0_143, %c0_144] : memref<9x4x16xbf16, #tpu.memory_space<vmem>>, vector<1x4x16xbf16>
    %195 = vector.shape_cast %194 : vector<1x4x16xbf16> to vector<4x16xbf16>
    %cst_145 = arith.constant dense<0.000000e+00> : vector<4x64xf32>
    %196 = tpu.matmul %195, %171, %cst_145 {dimension_numbers = #tpu.dot_dimension_numbers<[1], [0], [0], [1], [0, 0, 1, 1], [], []>} : vector<4x16xbf16>, vector<16x64xbf16>, vector<4x64xf32> -> vector<4x64xf32>
    %197 = arith.truncf %196 : vector<4x64xf32> to vector<4x64xbf16>
    %c192_146 = arith.constant 192 : index
    %c0_147 = arith.constant 0 : index
    %198 = vector.load %arg8[%c192_146, %c0_147] : memref<576x128xbf16, #tpu.memory_space<vmem>>, vector<64x128xbf16>
    %cst_148 = arith.constant dense<0.000000e+00> : vector<4x128xf32>
    %199 = tpu.matmul %197, %198, %cst_148 {dimension_numbers = #tpu.dot_dimension_numbers<[1], [0], [0], [1], [0, 0, 1, 1], [], []>} : vector<4x64xbf16>, vector<64x128xbf16>, vector<4x128xf32> -> vector<4x128xf32>
    %200 = arith.addf %193, %199 : vector<4x128xf32>
    %c4_149 = arith.constant 4 : index
    %c0_150 = arith.constant 0 : index
    %c0_151 = arith.constant 0 : index
    %201 = vector.load %arg7[%c4_149, %c0_150, %c0_151] : memref<9x4x16xbf16, #tpu.memory_space<vmem>>, vector<1x4x16xbf16>
    %202 = vector.shape_cast %201 : vector<1x4x16xbf16> to vector<4x16xbf16>
    %cst_152 = arith.constant dense<0.000000e+00> : vector<4x64xf32>
    %203 = tpu.matmul %202, %171, %cst_152 {dimension_numbers = #tpu.dot_dimension_numbers<[1], [0], [0], [1], [0, 0, 1, 1], [], []>} : vector<4x16xbf16>, vector<16x64xbf16>, vector<4x64xf32> -> vector<4x64xf32>
    %204 = arith.truncf %203 : vector<4x64xf32> to vector<4x64xbf16>
    %c256_153 = arith.constant 256 : index
    %c0_154 = arith.constant 0 : index
    %205 = vector.load %arg8[%c256_153, %c0_154] : memref<576x128xbf16, #tpu.memory_space<vmem>>, vector<64x128xbf16>
    %cst_155 = arith.constant dense<0.000000e+00> : vector<4x128xf32>
    %206 = tpu.matmul %204, %205, %cst_155 {dimension_numbers = #tpu.dot_dimension_numbers<[1], [0], [0], [1], [0, 0, 1, 1], [], []>} : vector<4x64xbf16>, vector<64x128xbf16>, vector<4x128xf32> -> vector<4x128xf32>
    %207 = arith.addf %200, %206 : vector<4x128xf32>
    %c5_156 = arith.constant 5 : index
    %c0_157 = arith.constant 0 : index
    %c0_158 = arith.constant 0 : index
    %208 = vector.load %arg7[%c5_156, %c0_157, %c0_158] : memref<9x4x16xbf16, #tpu.memory_space<vmem>>, vector<1x4x16xbf16>
    %209 = vector.shape_cast %208 : vector<1x4x16xbf16> to vector<4x16xbf16>
    %cst_159 = arith.constant dense<0.000000e+00> : vector<4x64xf32>
    %210 = tpu.matmul %209, %171, %cst_159 {dimension_numbers = #tpu.dot_dimension_numbers<[1], [0], [0], [1], [0, 0, 1, 1], [], []>} : vector<4x16xbf16>, vector<16x64xbf16>, vector<4x64xf32> -> vector<4x64xf32>
    %211 = arith.truncf %210 : vector<4x64xf32> to vector<4x64xbf16>
    %c320 = arith.constant 320 : index
    %c0_160 = arith.constant 0 : index
    %212 = vector.load %arg8[%c320, %c0_160] : memref<576x128xbf16, #tpu.memory_space<vmem>>, vector<64x128xbf16>
    %cst_161 = arith.constant dense<0.000000e+00> : vector<4x128xf32>
    %213 = tpu.matmul %211, %212, %cst_161 {dimension_numbers = #tpu.dot_dimension_numbers<[1], [0], [0], [1], [0, 0, 1, 1], [], []>} : vector<4x64xbf16>, vector<64x128xbf16>, vector<4x128xf32> -> vector<4x128xf32>
    %214 = arith.addf %207, %213 : vector<4x128xf32>
    %c6_162 = arith.constant 6 : index
    %c0_163 = arith.constant 0 : index
    %c0_164 = arith.constant 0 : index
    %215 = vector.load %arg7[%c6_162, %c0_163, %c0_164] : memref<9x4x16xbf16, #tpu.memory_space<vmem>>, vector<1x4x16xbf16>
    %216 = vector.shape_cast %215 : vector<1x4x16xbf16> to vector<4x16xbf16>
    %cst_165 = arith.constant dense<0.000000e+00> : vector<4x64xf32>
    %217 = tpu.matmul %216, %171, %cst_165 {dimension_numbers = #tpu.dot_dimension_numbers<[1], [0], [0], [1], [0, 0, 1, 1], [], []>} : vector<4x16xbf16>, vector<16x64xbf16>, vector<4x64xf32> -> vector<4x64xf32>
    %218 = arith.truncf %217 : vector<4x64xf32> to vector<4x64xbf16>
    %c384 = arith.constant 384 : index
    %c0_166 = arith.constant 0 : index
    %219 = vector.load %arg8[%c384, %c0_166] : memref<576x128xbf16, #tpu.memory_space<vmem>>, vector<64x128xbf16>
    %cst_167 = arith.constant dense<0.000000e+00> : vector<4x128xf32>
    %220 = tpu.matmul %218, %219, %cst_167 {dimension_numbers = #tpu.dot_dimension_numbers<[1], [0], [0], [1], [0, 0, 1, 1], [], []>} : vector<4x64xbf16>, vector<64x128xbf16>, vector<4x128xf32> -> vector<4x128xf32>
    %221 = arith.addf %214, %220 : vector<4x128xf32>
    %c7_168 = arith.constant 7 : index
    %c0_169 = arith.constant 0 : index
    %c0_170 = arith.constant 0 : index
    %222 = vector.load %arg7[%c7_168, %c0_169, %c0_170] : memref<9x4x16xbf16, #tpu.memory_space<vmem>>, vector<1x4x16xbf16>
    %223 = vector.shape_cast %222 : vector<1x4x16xbf16> to vector<4x16xbf16>
    %cst_171 = arith.constant dense<0.000000e+00> : vector<4x64xf32>
    %224 = tpu.matmul %223, %171, %cst_171 {dimension_numbers = #tpu.dot_dimension_numbers<[1], [0], [0], [1], [0, 0, 1, 1], [], []>} : vector<4x16xbf16>, vector<16x64xbf16>, vector<4x64xf32> -> vector<4x64xf32>
    %225 = arith.truncf %224 : vector<4x64xf32> to vector<4x64xbf16>
    %c448 = arith.constant 448 : index
    %c0_172 = arith.constant 0 : index
    %226 = vector.load %arg8[%c448, %c0_172] : memref<576x128xbf16, #tpu.memory_space<vmem>>, vector<64x128xbf16>
    %cst_173 = arith.constant dense<0.000000e+00> : vector<4x128xf32>
    %227 = tpu.matmul %225, %226, %cst_173 {dimension_numbers = #tpu.dot_dimension_numbers<[1], [0], [0], [1], [0, 0, 1, 1], [], []>} : vector<4x64xbf16>, vector<64x128xbf16>, vector<4x128xf32> -> vector<4x128xf32>
    %228 = arith.addf %221, %227 : vector<4x128xf32>
    %c8_174 = arith.constant 8 : index
    %c0_175 = arith.constant 0 : index
    %c0_176 = arith.constant 0 : index
    %229 = vector.load %arg7[%c8_174, %c0_175, %c0_176] : memref<9x4x16xbf16, #tpu.memory_space<vmem>>, vector<1x4x16xbf16>
    %230 = vector.shape_cast %229 : vector<1x4x16xbf16> to vector<4x16xbf16>
    %cst_177 = arith.constant dense<0.000000e+00> : vector<4x64xf32>
    %231 = tpu.matmul %230, %171, %cst_177 {dimension_numbers = #tpu.dot_dimension_numbers<[1], [0], [0], [1], [0, 0, 1, 1], [], []>} : vector<4x16xbf16>, vector<16x64xbf16>, vector<4x64xf32> -> vector<4x64xf32>
    %232 = arith.truncf %231 : vector<4x64xf32> to vector<4x64xbf16>
    %c512 = arith.constant 512 : index
    %c0_178 = arith.constant 0 : index
    %233 = vector.load %arg8[%c512, %c0_178] : memref<576x128xbf16, #tpu.memory_space<vmem>>, vector<64x128xbf16>
    %cst_179 = arith.constant dense<0.000000e+00> : vector<4x128xf32>
    %234 = tpu.matmul %232, %233, %cst_179 {dimension_numbers = #tpu.dot_dimension_numbers<[1], [0], [0], [1], [0, 0, 1, 1], [], []>} : vector<4x64xbf16>, vector<64x128xbf16>, vector<4x128xf32> -> vector<4x128xf32>
    %235 = arith.addf %228, %234 : vector<4x128xf32>
    %236 = vector.extract_strided_slice %0 {offsets = [7, 0], sizes = [1, 128], strides = [1, 1]} : vector<11x128xf32> to vector<1x128xf32>
    %237 = vector.broadcast %236 : vector<1x128xf32> to vector<4x128xf32>
    %238 = arith.addf %235, %237 : vector<4x128xf32>
    %cst_180 = arith.constant 0.000000e+00 : f32
    %239 = vector.broadcast %cst_180 : f32 to vector<4x128xf32>
    %240 = arith.cmpf ogt, %238, %239 : vector<4x128xf32>
    %cst_181 = arith.constant 2.000000e-01 : f32
    %241 = vector.broadcast %cst_181 : f32 to vector<4x128xf32>
    %242 = arith.mulf %241, %238 : vector<4x128xf32>
    %243 = arith.select %240, %238, %242 : vector<4x128xi1>, vector<4x128xf32>
    %244 = vector.extract_strided_slice %0 {offsets = [8, 0], sizes = [1, 128], strides = [1, 1]} : vector<11x128xf32> to vector<1x128xf32>
    %245 = vector.broadcast %244 : vector<1x128xf32> to vector<4x128xf32>
    %246 = arith.mulf %243, %245 : vector<4x128xf32>
    %247 = vector.extract_strided_slice %0 {offsets = [9, 0], sizes = [1, 128], strides = [1, 1]} : vector<11x128xf32> to vector<1x128xf32>
    %248 = vector.broadcast %247 : vector<1x128xf32> to vector<4x128xf32>
    %249 = arith.addf %246, %248 : vector<4x128xf32>
    %c0_182 = arith.constant 0 : index
    %c0_183 = arith.constant 0 : index
    %250 = vector.load %arg9[%c0_182, %c0_183] : memref<4x128xf32, #tpu.memory_space<vmem>>, vector<4x128xf32>
    %251 = arith.mulf %249, %250 : vector<4x128xf32>
    %cst_184 = arith.constant dense<0.000000e+00> : vector<4xf32>
    %252 = vector.multi_reduction <add>, %251, %cst_184 [1] : vector<4x128xf32> to vector<4xf32>
    %253 = vector.shape_cast %252 : vector<4xf32> to vector<4x1xf32>
    %cst_185 = arith.constant dense<0.000000e+00> : vector<1xf32>
    %254 = vector.multi_reduction <add>, %253, %cst_185 [0] : vector<4x1xf32> to vector<1xf32>
    %255 = vector.shape_cast %254 : vector<1xf32> to vector<1x1xf32>
    %256 = vector.extract_strided_slice %0 {offsets = [10, 0], sizes = [1, 1], strides = [1, 1]} : vector<11x128xf32> to vector<1x1xf32>
    %257 = arith.addf %255, %256 : vector<1x1xf32>
    %258 = vector.shape_cast %257 : vector<1x1xf32> to vector<1x1x1xf32>
    %c0_186 = arith.constant 0 : index
    %c0_187 = arith.constant 0 : index
    %c0_188 = arith.constant 0 : index
    %259 = vector.load %arg11[%c0_186, %c0_187, %c0_188] : memref<1x1x1xf32, #tpu.memory_space<vmem>>, vector<1x1x1xf32>
    tpu.vector_store %arg11[%c0_186, %c0_187, %c0_188], %258 {strides = array<i32>} : memref<1x1x1xf32, #tpu.memory_space<vmem>>, vector<1x1x1xf32>,
    return
  }
  func.func @transform_0(%arg0: i32) -> (i32, i32, i32) {
    %c0_i32 = arith.constant 0 : i32
    %c0_i32_0 = arith.constant 0 : i32
    %c0_i32_1 = arith.constant 0 : i32
    return %arg0, %c0_i32, %c0_i32_0 : i32, i32, i32
  }
  func.func @transform_1(%arg0: i32) -> (i32, i32) {
    %c0_i32 = arith.constant 0 : i32
    %c0_i32_0 = arith.constant 0 : i32
    %c0_i32_1 = arith.constant 0 : i32
    return %c0_i32, %c0_i32_0 : i32, i32
  }
  func.func @transform_2(%arg0: i32) -> (i32, i32, i32) {
    %c0_i32 = arith.constant 0 : i32
    %c0_i32_0 = arith.constant 0 : i32
    %c0_i32_1 = arith.constant 0 : i32
    %c0_i32_2 = arith.constant 0 : i32
    return %c0_i32, %c0_i32_0, %c0_i32_1 : i32, i32, i32
  }
  func.func @transform_3(%arg0: i32) -> (i32, i32) {
    %c0_i32 = arith.constant 0 : i32
    %c0_i32_0 = arith.constant 0 : i32
    %c0_i32_1 = arith.constant 0 : i32
    return %c0_i32, %c0_i32_0 : i32, i32
  }
  func.func @transform_4(%arg0: i32) -> (i32, i32, i32) {
    %c0_i32 = arith.constant 0 : i32
    %c0_i32_0 = arith.constant 0 : i32
    %c0_i32_1 = arith.constant 0 : i32
    %c0_i32_2 = arith.constant 0 : i32
    return %c0_i32, %c0_i32_0, %c0_i32_1 : i32, i32, i32
  }
  func.func @transform_5(%arg0: i32) -> (i32, i32) {
    %c0_i32 = arith.constant 0 : i32
    %c0_i32_0 = arith.constant 0 : i32
    %c0_i32_1 = arith.constant 0 : i32
    return %c0_i32, %c0_i32_0 : i32, i32
  }
  func.func @transform_6(%arg0: i32) -> (i32, i32, i32) {
    %c0_i32 = arith.constant 0 : i32
    %c0_i32_0 = arith.constant 0 : i32
    %c0_i32_1 = arith.constant 0 : i32
    %c0_i32_2 = arith.constant 0 : i32
    return %c0_i32, %c0_i32_0, %c0_i32_1 : i32, i32, i32
  }
  func.func @transform_7(%arg0: i32) -> (i32, i32) {
    %c0_i32 = arith.constant 0 : i32
    %c0_i32_0 = arith.constant 0 : i32
    %c0_i32_1 = arith.constant 0 : i32
    return %c0_i32, %c0_i32_0 : i32, i32
  }
  func.func @transform_8(%arg0: i32) -> (i32, i32) {
    %c0_i32 = arith.constant 0 : i32
    %c0_i32_0 = arith.constant 0 : i32
    %c0_i32_1 = arith.constant 0 : i32
    return %c0_i32, %c0_i32_0 : i32, i32
  }
  func.func @transform_9(%arg0: i32) -> (i32, i32) {
    %c0_i32 = arith.constant 0 : i32
    %c0_i32_0 = arith.constant 0 : i32
    %c0_i32_1 = arith.constant 0 : i32
    return %c0_i32, %c0_i32_0 : i32, i32
  }
  func.func @transform_10(%arg0: i32) -> (i32, i32, i32) {
    %c0_i32 = arith.constant 0 : i32
    %c0_i32_0 = arith.constant 0 : i32
    %c0_i32_1 = arith.constant 0 : i32
    return %arg0, %c0_i32, %c0_i32_0 : i32, i32, i32
  }
}

</mosaic_0001>

<bundles_post_ra>
// kernel: discriminator_forward.1
= control target key start
LH: loop header
LB: loop body
LE: loop exit
PB: predicated region body
PF: predicated region fallthrough
CT: control target
= control target key end

     0   :  { %s6636_s13 = smov 0   ;;  %s7856_s0 = inlined_call_operand.vmem [shape: bf16[2,256,9], index: 0, kind: input, shape index: {}]   ;;  %s7857_s1 = inlined_call_operand.vmem [shape: bf16[9,16], index: 1, kind: input, shape index: {}]   ;;  %s7858_s2 = inlined_call_operand.vmem [shape: bf16[9,64,256], index: 2, kind: input, shape index: {}]   ;;  %s7859_s3 = inlined_call_operand.vmem [shape: bf16[144,32], index: 3, kind: input, shape index: {}]   ;;  %s7860_s4 = inlined_call_operand.vmem [shape: bf16[9,16,64], index: 4, kind: input, shape index: {}]   ;;  %s7861_s5 = inlined_call_operand.vmem [shape: bf16[288,64], index: 5, kind: input, shape index: {}]   ;;  %s7862_s6 = inlined_call_operand.vmem [shape: bf16[9,4,16], index: 6, kind: input, shape index: {}]   ;;  %s7863_s7 = inlined_call_operand.vmem [shape: bf16[576,128], index: 7, kind: input, shape index: {}]   ;;  %s7864_s8 = inlined_call_operand.vmem [shape: f32[4,128], index: 8, kind: input, shape index: {}]   ;;  %s7865_s9 = inlined_call_operand.vmem [shape: f32[11,128], index: 9, kind: input, shape index: {}]   ;;  %s7866_s10 = inlined_call_operand.vmem [shape: f32[2,1,1], index: 10, kind: output, shape index: {}]  }
   0x1 LB: > { %s4990_s14 = sadd.s32 4294967295, %s6576_s13   ;;  %p4994_p0 = scmp.ge.s32.totalorder %s6576_s13, 1  ;;  %s6576_s13 = sphi %s6636_s13, %s20_s13  }
   0x2   : > { %p312_p1 = scmp.lt.s32.totalorder %s6576_s13, 3 }
   0x4   : > { %p313_p2 = pnand %p4994_p0, %p312_p1 }
   0x5   : > { %p348_p3 = scmp.lt.s32.totalorder (!%p313_p2), %s4990_s14, 1 }
   0x6   : > { %316 = sbr.rel (%p313_p2) target bundleno = 4739 (0x1283), region = 60 }
   0xb   : > { %v6371_v0 = vld [vmem:[%s7857_s1] sm:$0x1f]   ;;  %vm531_vm0 = vcmask 1043456   ;;  %vm532_vm1 = vcmask 1044480   ;;  %v6578_v1 = vmov 65535   ;;  %s7868_s14 = smov (!%p348_p3, %s4990_s14), 1  ;;  %v393_v22 = vlaneseq }
   0xc   : > { %v533_v2 = vsel %vm531_vm0, 4294967295, %v6578_v1  ;;  %s5336_s17 = sshll.u32 %s7868_s14, 7  ;;  %vm482_vm2 = vcmask 72704   ;;  %v6390_v21 = vld [vmem:[%s7858_s2 + $0x4] ss:$8 sps:$4 sm:$0xff]   ;;  %s355_s15 = scalar_lea.vmem %s7866_s10, %s7868_s14 }
   0xd   : > { %v534_v3 = vsel %vm532_vm1, %v533_v2, 0  ;;  %s6654_s20 = scalar_lea.vmem %s7856_s0, %s5336_s17  ;;  %891 = vmatprep.mubr.bf16.mxu1 %v6390_v21  ;;  %v6691_v23 = vshrl.u32 %v393_v22, 7  ;;  %v357_v25 = vld [vmem:[%s7865_s9] sm:$0xff] }
   0xe   : > { %v536_v4 = vand.u32 %v6371_v0, %v534_v3  ;;  %v6372_v5 = vld [vmem:[%s6654_s20] sm:$0xff]   ;;  %v6373_v6 = vld [vmem:[%s6654_s20 + $0x8] sm:$0xff]   ;;  %v6374_v7 = vld [vmem:[%s6654_s20 + $0x10] sm:$0xff]  }
   0xf   : > { %5896 = vmatprep.mubr.msk.bf16.mxu0 %vm482_vm2, %v6372_v5  ;;  %v6375_v8 = vld [vmem:[%s6654_s20 + $0x18] sm:$0xff]   ;;  %v6376_v9 = vld [vmem:[%s6654_s20 + $0x20] sm:$0xff]   ;;  %v6377_v10 = vld [vmem:[%s6654_s20 + $0x28] sm:$0xff]   ;;  %v395_v24 = vsub.s32 0, %v6691_v23 }
  0x10   : > { %5894 = vmatprep.subr.bf16.mxu0 %v536_v4  ;;  %v6378_v11 = vld [vmem:[%s6654_s20 + $0x30] sm:$0xff]   ;;  %v6379_v12 = vld [vmem:[%s6654_s20 + $0x38] sm:$0xff]   ;;  %v6380_v13 = vld [vmem:[%s6654_s20 + $0x40] sm:$0xff]  }
  0x11   : > { %5895 = vmatpush3.bf16.msra.mxu0 %v536_v4  ;;  %v6381_v14 = vld [vmem:[%s6654_s20 + $0x48] sm:$0xff]   ;;  %v6382_v15 = vld [vmem:[%s6654_s20 + $0x50] sm:$0xff]   ;;  %v6383_v16 = vld [vmem:[%s6654_s20 + $0x58] sm:$0xff]   ;;  %v6699_v26 = vrot.slane %v357_v25, %v395_v24 }
  0x12   : > { %v6384_v17 = vld [vmem:[%s6654_s20 + $0x60] sm:$0xff]   ;;  %v6385_v18 = vld [vmem:[%s6654_s20 + $0x68] sm:$0xff]   ;;  %v6386_v19 = vld [vmem:[%s6654_s20 + $0x70] sm:$0xff]  }
  0x13   : > { %v6387_v20 = vld [vmem:[%s6654_s20 + $0x78] sm:$0xff]  }
  0x14   : > { %5897 = vmatmul.mubr.msk.bf16.vlgmr.msra.gmra.mxu0 %vm482_vm2, %v6373_v6 }
  0x15   : > { %5900 = vmatprep.mubr.msk.bf16.mxu0 %vm482_vm2, %v6374_v7 }
  0x1c   : > { %5901 = vmatmul.mubr.msk.bf16.gmra.mxu0 %vm482_vm2, %v6375_v8 }
  0x1d   : > { %5904 = vmatprep.mubr.msk.bf16.mxu0 %vm482_vm2, %v6376_v9 }
  0x24   : > { %5905 = vmatmul.mubr.msk.bf16.gmra.mxu0 %vm482_vm2, %v6377_v10 }
  0x25   : > { %5908 = vmatprep.mubr.msk.bf16.mxu0 %vm482_vm2, %v6378_v11 }
  0x2c   : > { %5909 = vmatmul.mubr.msk.bf16.gmra.mxu0 %vm482_vm2, %v6379_v12 }
  0x2d   : > { %5912 = vmatprep.mubr.msk.bf16.mxu0 %vm482_vm2, %v6380_v13 }
  0x34   : > { %5913 = vmatmul.mubr.msk.bf16.gmra.mxu0 %vm482_vm2, %v6381_v14 }
  0x35   : > { %5916 = vmatprep.mubr.msk.bf16.mxu0 %vm482_vm2, %v6382_v15 }
  0x3c   : > { %5917 = vmatmul.mubr.msk.bf16.gmra.mxu0 %vm482_vm2, %v6383_v16 }
  0x3d   : > { %5920 = vmatprep.mubr.msk.bf16.mxu0 %vm482_vm2, %v6384_v17 }
  0x44   : > { %5921 = vmatmul.mubr.msk.bf16.gmra.mxu0 %vm482_vm2, %v6385_v18 }
  0x45   : > { %5924 = vmatprep.mubr.msk.bf16.mxu0 %vm482_vm2, %v6386_v19 }
  0x4c   : > { %5925 = vmatmul.mubr.msk.bf16.gmra.mxu0 %vm482_vm2, %v6387_v20 }
  0xd4   : > { %v5898_v27 = vpop.f32.mrf.mxu0 }
  0xd5   : > { %v581_v28 = vadd.f32 %v5898_v27, %v6699_v26 }
  0xd6   : > { %v6702_v29 = vpop.f32.mrf.mxu0 }
  0xd7   : > { %v733_v31 = vmul.f32 0.2, %v581_v28  ;;  %vm701_vm3 = vcmp.gt.f32.partialorder %v581_v28, 0.0 }
  0xd8   : > { %v5899_v30 = vpop.f32.mrf.mxu0 }
  0xd9   : > { %v584_v32 = vadd.f32 %v5899_v30, %v6699_v26  ;;  %v765_v36 = vsel %vm701_vm3, %v581_v28, %v733_v31 }
  0xda   : > { %v6705_v33 = vpop.f32.mrf.mxu0 }
  0xdb   : > { %vm702_vm4 = vcmp.gt.f32.partialorder %v584_v32, 0.0  ;;  %v734_v34 = vmul.f32 0.2, %v584_v32 }
  0xdc   : > { %v5902_v35 = vpop.f32.mrf.mxu0 }
  0xdd   : > { %v766_v37 = vsel %vm702_vm4, %v584_v32, %v734_v34  ;;  %v597_v38 = vadd.f32 %v5902_v35, %v6699_v26 }
  0xde   : > { %v6708_v39 = vpack.c.bf16 %v766_v37, %v765_v36  ;;  %v6710_v40 = vpop.f32.mrf.mxu0 }
  0xdf   : > { %v737_v42 = vmul.f32 0.2, %v597_v38  ;;  %vm705_vm5 = vcmp.gt.f32.partialorder %v597_v38, 0.0 }
  0xe0   : > { %v5903_v41 = vpop.f32.mrf.mxu0 }
  0xe1   : > { %v600_v43 = vadd.f32 %v5903_v41, %v6699_v26  ;;  %v769_v47 = vsel %vm705_vm5, %v597_v38, %v737_v42 }
  0xe2   : > { %v6713_v44 = vpop.f32.mrf.mxu0 }
  0xe3   : > { %vm706_vm6 = vcmp.gt.f32.partialorder %v600_v43, 0.0  ;;  %v738_v45 = vmul.f32 0.2, %v600_v43 }
  0xe4   : > { %v5906_v46 = vpop.f32.mrf.mxu0 }
  0xe5   : > { %v770_v48 = vsel %vm706_vm6, %v600_v43, %v738_v45  ;;  %v6744_v15 = vadd.f32 %v5906_v46, %v6699_v26 }
  0xe6   : > { %v6715_v49 = vpack.c.bf16 %v770_v48, %v769_v47  ;;  %v6717_v50 = vpop.f32.mrf.mxu0 }
  0xe7   : > { %vm709_vm12 = vcmp.gt.f32.partialorder %v6744_v15, 0.0 }
  0xe8   : > { %v5907_v51 = vpop.f32.mrf.mxu0 }
  0xe9   : > { %v6738_v7 = vadd.f32 %v5907_v51, %v6699_v26 }
  0xea   : > { %v6719_v52 = vpop.f32.mrf.mxu0 }
  0xeb   : > { %v742_v17 = vmul.f32 0.2, %v6738_v7  ;;  %vm710_vm3 = vcmp.gt.f32.partialorder %v6738_v7, 0.0 }
  0xec   : > { %v5910_v53 = vpop.f32.mrf.mxu0 }
  0xed   : > { %v629_v4 = vadd.f32 %v5910_v53, %v6699_v26  ;;  %v608_v53 = vadd.f32 %v6719_v52, %v6699_v26  ;;  %v605_v52 = vadd.f32 %v6717_v50, %v6699_v26 }
  0xee   : > { %v620_v54 = vpop.f32.mrf.mxu0 }
  0xef   : > { %v745_v9 = vmul.f32 0.2, %v629_v4  ;;  %v621_v10 = vadd.f32 %v620_v54, %v6699_v26  ;;  %vm713_vm7 = vcmp.gt.f32.partialorder %v629_v4, 0.0  ;;  %vm708_vm6 = vcmp.gt.f32.partialorder %v608_v53, 0.0 }
  0xf0   : > { %v5911_v55 = vpop.f32.mrf.mxu0 }
  0xf1   : > { %v632_v5 = vadd.f32 %v5911_v55, %v6699_v26  ;;  %v777_v20 = vsel %vm713_vm7, %v629_v4, %v745_v9  ;;  %vm711_vm9 = vcmp.gt.f32.partialorder %v621_v10, 0.0  ;;  %v743_v42 = vmul.f32 0.2, %v621_v10 }
  0xf2   : > { %v623_v56 = vpop.f32.mrf.mxu0  ;;  %v774_v9 = vsel %vm710_vm3, %v6738_v7, %v742_v17  ;;  %vm707_vm7 = vcmp.gt.f32.partialorder %v605_v52, 0.0 }
  0xf3   : > { %v746_v12 = vmul.f32 0.2, %v632_v5  ;;  %v624_v13 = vadd.f32 %v623_v56, %v6699_v26  ;;  %vm714_vm8 = vcmp.gt.f32.partialorder %v632_v5, 0.0  ;;  %v775_v4 = vsel %vm711_vm9, %v621_v10, %v743_v42 }
  0xf4   : > { %v6721_v57 = vpop.f32.mrf.mxu0 }
  0xf5   : > { %v778_v25 = vsel %vm714_vm8, %v632_v5, %v746_v12  ;;  %vm712_vm10 = vcmp.gt.f32.partialorder %v624_v13, 0.0  ;;  %v744_v34 = vmul.f32 0.2, %v624_v13 }
  0xf6   : > { %v6723_v58 = vpop.f32.mrf.mxu0  ;;  %v6754_v43 = vpack.c.bf16 %v778_v25, %v777_v20  ;;  %v589_v25 = vadd.f32 %v6710_v40, %v6699_v26 }
  0xf7   : > { %v776_v54 = vsel %vm712_vm10, %v624_v13, %v744_v34 }
  0xf8   : > { %v6725_v59 = vpop.f32.mrf.mxu0  ;;  %v6773_v5 = vpack.c.bf16 %v776_v54, %v775_v4  ;;  %v6388_v4 = vld [vmem:[%s7858_s2] ss:$8 sps:$4 sm:$0xff]  }
  0xfa   : > { %v6727_v60 = vpop.f32.mrf.mxu0 }
  0xfb   : > { %v640_v40 = vadd.f32 %v6727_v60, %v6699_v26 }
  0xfc   : > { %v6729_v61 = vpop.f32.mrf.mxu0 }
  0xfe   : > { %v6731_v62 = vpop.f32.mrf.mxu0 }
  0xff   : > { %v653_v17 = vadd.f32 %v6731_v62, %v6699_v26 }
 0x100   : > { %v5919_v63 = vpop.f32.mrf.mxu0 }
 0x101   : > { %v664_v56 = vadd.f32 %v5919_v63, %v6699_v26 }
 0x102   : > { %v6733_v0 = vpop.f32.mrf.mxu0 }
 0x103   : > { %v754_v50 = vmul.f32 0.2, %v664_v56  ;;  %v656_v10 = vadd.f32 %v6733_v0, %v6699_v26  ;;  %vm722_vm8 = vcmp.gt.f32.partialorder %v664_v56, 0.0  ;;  %v592_v0 = vadd.f32 %v6713_v44, %v6699_v26 }
 0x104   : > { %v5922_v1 = vpop.f32.mrf.mxu0 }
 0x105   : > { %v677_v27 = vadd.f32 %v5922_v1, %v6699_v26  ;;  %vm720_vm10 = vcmp.gt.f32.partialorder %v656_v10, 0.0 }
 0x106   : > { %v668_v2 = vpop.f32.mrf.mxu0 }
 0x107   : > { %v757_v46 = vmul.f32 0.2, %v677_v27  ;;  %v669_v47 = vadd.f32 %v668_v2, %v6699_v26  ;;  %vm725_vm2 = vcmp.gt.f32.partialorder %v677_v27, 0.0  ;;  %v741_v2 = vmul.f32 0.2, %v6744_v15 }
 0x108   : > { %v5923_v3 = vpop.f32.mrf.mxu0 }
 0x109   : > { %v680_v18 = vadd.f32 %v5923_v3, %v6699_v26  ;;  %v789_v63 = vsel %vm725_vm2, %v677_v27, %v757_v46  ;;  %vm723_vm5 = vcmp.gt.f32.partialorder %v669_v47, 0.0  ;;  %v645_v27 = vadd.f32 %v6721_v57, %v6699_v26 }
 0x10a   : > { %v671_v6 = vpop.f32.mrf.mxu0  ;;  %v748_v46 = vmul.f32 0.2, %v640_v40 }
 0x10b   : > { %v758_v35 = vmul.f32 0.2, %v680_v18  ;;  %v672_v36 = vadd.f32 %v671_v6, %v6699_v26  ;;  %vm726_vm1 = vcmp.gt.f32.partialorder %v680_v18, 0.0  ;;  %v661_v6 = vadd.f32 %v6729_v61, %v6699_v26 }
 0x10c   : > { %v5926_v8 = vpop.f32.mrf.mxu0  ;;  %v773_v61 = vsel %vm709_vm12, %v6744_v15, %v741_v2  ;;  %v648_v15 = vadd.f32 %v6725_v59, %v6699_v26  ;;  %v736_v59 = vmul.f32 0.2, %v592_v0  ;;  %vm704_vm12 = vcmp.gt.f32.partialorder %v592_v0, 0.0 }
 0x10d   : > { %v693_v11 = vadd.f32 %v5926_v8, %v6699_v26  ;;  %v790_v1 = vsel %vm726_vm1, %v680_v18, %v758_v35  ;;  %v756_v3 = vmul.f32 0.2, %v672_v36  ;;  %vm724_vm4 = vcmp.gt.f32.partialorder %v672_v36, 0.0 }
 0x10e   : > { %v684_v14 = vpop.f32.mrf.mxu0  ;;  %v755_v8 = vmul.f32 0.2, %v669_v47  ;;  %v6778_v12 = vpack.c.bf16 %v790_v1, %v789_v63  ;;  %v6787_v7 = vpack.c.bf16 %v774_v9, %v773_v61  ;;  %vm721_vm9 = vcmp.gt.f32.partialorder %v661_v6, 0.0  ;;  %v6393_v63 = vld [vmem:[%s7858_s2 + $0x10] ss:$8 sps:$4 sm:$0xff]  }
 0x10f   : > { %v685_v16 = vadd.f32 %v684_v14, %v6699_v26  ;;  %v761_v21 = vmul.f32 0.2, %v693_v11  ;;  %vm729_vm11 = vcmp.gt.f32.partialorder %v693_v11, 0.0  ;;  %v788_v13 = vsel %vm724_vm4, %v672_v36, %v756_v3  ;;  %v6396_v9 = vld [vmem:[%s7858_s2 + $0x20] ss:$8 sps:$4 sm:$0xff]  }
 0x110   : > { %v5927_v19 = vpop.f32.mrf.mxu0  ;;  %v739_v14 = vmul.f32 0.2, %v605_v52  ;;  %v787_v18 = vsel %vm723_vm5, %v669_v47, %v755_v8  ;;  %v735_v35 = vmul.f32 0.2, %v589_v25  ;;  %v749_v57 = vmul.f32 0.2, %v645_v27 }
 0x111   : > { %v696_v22 = vadd.f32 %v5927_v19, %v6699_v26  ;;  %v759_v30 = vmul.f32 0.2, %v685_v16  ;;  %vm727_vm14 = vcmp.gt.f32.partialorder %v685_v16, 0.0  ;;  %v793_v37 = vsel %vm729_vm11, %v693_v11, %v761_v21  ;;  %v6394_v8 = vld [vmem:[%s7858_s2 + $0x24] ss:$8 sps:$4 sm:$0xff]  }
 0x112   : > { %v687_v28 = vpop.f32.mrf.mxu0  ;;  %v740_v11 = vmul.f32 0.2, %v608_v53  ;;  %v6793_v20 = vpack.c.bf16 %v788_v13, %v787_v18  ;;  %v786_v21 = vsel %vm722_vm8, %v664_v56, %v754_v50  ;;  %v771_v62 = vsel %vm707_vm7, %v605_v52, %v739_v14  ;;  %v6399_v50 = vld [vmem:[%s7858_s2 + $0x30] ss:$8 sps:$4 sm:$0xff]   ;;  %v6400_v13 = vld [vmem:[%s7858_s2 + $0x40] ss:$8 sps:$4 sm:$0xff]  }
 0x113   : > { %vm730_vm13 = vcmp.gt.f32.partialorder %v696_v22, 0.0  ;;  %v762_v31 = vmul.f32 0.2, %v696_v22  ;;  %v688_v32 = vadd.f32 %v687_v28, %v6699_v26  ;;  %v791_v48 = vsel %vm727_vm14, %v685_v16, %v759_v30  ;;  %v6403_v61 = vld [vmem:[%s7858_s2 + $0x54] ss:$8 sps:$4 sm:$0xff]  }
 0x114   : > { %v753_v16 = vmul.f32 0.2, %v661_v6  ;;  %v772_v19 = vsel %vm708_vm6, %v608_v53, %v740_v11  ;;  %v751_v30 = vmul.f32 0.2, %v653_v17  ;;  %vm719_vm11 = vcmp.gt.f32.partialorder %v653_v17, 0.0 }
 0x115   : > { %v794_v38 = vsel %vm730_vm13, %v696_v22, %v762_v31  ;;  %vm728_vm15 = vcmp.gt.f32.partialorder %v688_v32, 0.0  ;;  %v760_v41 = vmul.f32 0.2, %v688_v32  ;;  %v752_v22 = vmul.f32 0.2, %v656_v10 }
 0x116   : > { %v6756_v45 = vpack.c.bf16 %v794_v38, %v793_v37  ;;  %v6802_v44 = vpack.c.bf16 %v772_v19, %v771_v62  ;;  %v785_v28 = vsel %vm721_vm9, %v661_v6, %v753_v16  ;;  %vm718_vm13 = vcmp.gt.f32.partialorder %v648_v15, 0.0  ;;  %v6391_v6 = vld [vmem:[%s7858_s2 + $0x14] ss:$8 sps:$4 sm:$0xff]   ;;  %v6405_v14 = vld [vmem:[%s7858_s2 + $0x50] ss:$8 sps:$4 sm:$0xff]  }
 0x117   : > { %v792_v51 = vsel %vm728_vm15, %v688_v32, %v760_v41  ;;  %v6806_v31 = vpack.c.bf16 %v786_v21, %v785_v28  ;;  %v750_v32 = vmul.f32 0.2, %v648_v15  ;;  %v784_v34 = vsel %vm720_vm10, %v656_v10, %v752_v22  ;;  %v6397_v11 = vld [vmem:[%s7858_s2 + $0x34] ss:$8 sps:$4 sm:$0xff]   ;;  %v6402_v10 = vld [vmem:[%s7858_s2 + $0x44] ss:$8 sps:$4 sm:$0xff]  }
 0x118   : > { %v6762_v55 = vpack.c.bf16 %v792_v51, %v791_v48  ;;  %5354 = vmatprep.subr.bf16.mxu1 %v6756_v45  ;;  %vm703_vm14 = vcmp.gt.f32.partialorder %v589_v25, 0.0  ;;  %v637_v36 = vadd.f32 %v6723_v58, %v6699_v26  ;;  %v783_v37 = vsel %vm719_vm11, %v653_v17, %v751_v30  ;;  %v6406_v16 = vld [vmem:[%s7858_s2 + $0x64] ss:$8 sps:$4 sm:$0xff]   ;;  %v6408_v17 = vld [vmem:[%s7858_s2 + $0x60] ss:$8 sps:$4 sm:$0xff]  }
 0x119   : > { %5355 = vmatpush3.bf16.msra.mxu1 %v6754_v43  ;;  %v576_v38 = vadd.f32 %v6705_v33, %v6699_v26  ;;  %v768_v41 = vsel %vm704_vm12, %v592_v0, %v736_v59  ;;  %vm717_vm15 = vcmp.gt.f32.partialorder %v645_v27, 0.0  ;;  %v6816_v42 = vpack.c.bf16 %v784_v34, %v783_v37  ;;  %v6409_v18 = vld [vmem:[%s7858_s2 + $0x74] ss:$8 sps:$4 sm:$0xff]   ;;  %v6411_v0 = vld [vmem:[%s7858_s2 + $0x70] ss:$8 sps:$4 sm:$0xff]   ;;  %v6436_v28 = vld [vmem:[%s7859_s3 + $0x8] sm:$0xff]  }
 0x11a   : > { %5356 = vmatprep.subr.bf16.mxu1 %v6762_v55  ;;  %v782_v60 = vsel %vm718_vm13, %v648_v15, %v750_v32  ;;  %v573_v47 = vadd.f32 %v6702_v29, %v6699_v26  ;;  %v767_v48 = vsel %vm703_vm14, %v589_v25, %v735_v35  ;;  %vm716_vm1 = vcmp.gt.f32.partialorder %v640_v40, 0.0  ;;  %v6414_v19 = vld [vmem:[%s7858_s2 + $0x84] ss:$8 sps:$4 sm:$0xff]   ;;  %v6412_v15 = vld [vmem:[%s7858_s2 + $0x80] ss:$8 sps:$4 sm:$0xff]   ;;  %5928 = vmatprep.subr.bf16.mxu0 %v6436_v28 }
 0x11b   : > { %v6822_v58 = vpack.c.bf16 %v768_v41, %v767_v48  ;;  %v781_v51 = vsel %vm717_vm15, %v645_v27, %v749_v57  ;;  %v747_v53 = vmul.f32 0.2, %v637_v36  ;;  %v732_v33 = vmul.f32 0.2, %v576_v38  ;;  %v6415_v21 = vld [vmem:[%s7858_s2 + $0x94] ss:$8 sps:$4 sm:$0xff]   ;;  %5929 = vmatpush3.bf16.msra.mxu0 %v6436_v28 }
 0x11c   : > { %vm715_vm2 = vcmp.gt.f32.partialorder %v637_v36, 0.0  ;;  %v6824_v54 = vpack.c.bf16 %v782_v60, %v781_v51  ;;  %vm700_vm3 = vcmp.gt.f32.partialorder %v576_v38, 0.0  ;;  %v780_v56 = vsel %vm716_vm1, %v640_v40, %v748_v46  ;;  %v6417_v22 = vld [vmem:[%s7858_s2 + $0x90] ss:$8 sps:$4 sm:$0xff]   ;;  %v6418_v25 = vld [vmem:[%s7858_s2 + $0xa4] ss:$8 sps:$4 sm:$0xff]  }
 0x11d   : > { %5357 = vmatpush3.bf16.msra.mxu1 %v6773_v5  ;;  %v731_v1 = vmul.f32 0.2, %v573_v47  ;;  %vm699_vm4 = vcmp.gt.f32.partialorder %v573_v47, 0.0  ;;  %v779_v26 = vsel %vm715_vm2, %v637_v36, %v747_v53  ;;  %v764_v29 = vsel %vm700_vm3, %v576_v38, %v732_v33  ;;  %v6420_v62 = vld [vmem:[%s7858_s2 + $0xa0] ss:$8 sps:$4 sm:$0xff]  }
 0x11e   : > { %5358 = vmatprep.subr.bf16.mxu1 %v6778_v12  ;;  %v6828_v3 = vpack.c.bf16 %v780_v56, %v779_v26  ;;  %v6421_v27 = vld [vmem:[%s7858_s2 + $0xb4] ss:$8 sps:$4 sm:$0xff]   ;;  %v6423_v30 = vld [vmem:[%s7858_s2 + $0xb0] ss:$8 sps:$4 sm:$0xff]   ;;  %v6426_v59 = vld [vmem:[%s7858_s2 + $0xc4] ss:$8 sps:$4 sm:$0xff]  }
 0x11f   : > { %v763_v2 = vsel %vm699_vm4, %v573_v47, %v731_v1  ;;  %v6424_v32 = vld [vmem:[%s7858_s2 + $0xc0] ss:$8 sps:$4 sm:$0xff]   ;;  %v6427_v40 = vld [vmem:[%s7858_s2 + $0xd4] ss:$8 sps:$4 sm:$0xff]   ;;  %v6429_v34 = vld [vmem:[%s7858_s2 + $0xd0] ss:$8 sps:$4 sm:$0xff]  }
 0x120   : > { %v6832_v52 = vpack.c.bf16 %v764_v29, %v763_v2  ;;  %v6430_v35 = vld [vmem:[%s7858_s2 + $0xe4] ss:$8 sps:$4 sm:$0xff]   ;;  %v6432_v57 = vld [vmem:[%s7858_s2 + $0xe0] ss:$8 sps:$4 sm:$0xff]   ;;  %v6433_v36 = vld [vmem:[%s7858_s2 + $0xf4] ss:$8 sps:$4 sm:$0xff]  }
 0x121   : > { %5359 = vmatpush3.bf16.msra.mxu1 %v6787_v7  ;;  %v6435_v37 = vld [vmem:[%s7858_s2 + $0xf0] ss:$8 sps:$4 sm:$0xff]   ;;  %v6437_v38 = vld [vmem:[%s7859_s3] sm:$0xff]   ;;  %vm1056_vm5 = vcmask 130048   ;;  %vm6580_vm6 = vmmov 0   ;;  %vm2765_vm15 = vcmask 523264  }
 0x122   : > { %5360 = vmatprep.subr.bf16.mxu1 %v6793_v20  ;;  %5938 = vmatprep.subr.bf16.mxu0 %v6437_v38  ;;  %vm2884_vm1 = vcmask 261120  }
 0x125   : > { %5361 = vmatpush3.bf16.msra.mxu1 %v6802_v44 }
 0x126   : > { %5362 = vmatprep.subr.bf16.mxu1 %v6806_v31 }
 0x129   : > { %5363 = vmatpush3.bf16.msra.mxu1 %v6715_v49 }
 0x12a   : > { %5364 = vmatprep.subr.bf16.mxu1 %v6816_v42 }
 0x12d   : > { %5365 = vmatpush3.bf16.msra.mxu1 %v6822_v58 }
 0x12e   : > { %5366 = vmatprep.subr.bf16.mxu1 %v6824_v54 }
 0x131   : > { %5367 = vmatpush3.bf16.msra.mxu1 %v6708_v39 }
 0x132   : > { %5368 = vmatprep.subr.bf16.mxu1 %v6828_v3 }
 0x135   : > { %5369 = vmatpush3.bf16.msra.mxu1 %v6832_v52 }
 0x136   : > { %5394 = vmatprep.subr.bf16.mxu1 %v6756_v45 }
 0x138   : > { %892 = vmatmul.mubr.bf16.vlgmr.msra.gmra.mxu1 %v6388_v4 }
 0x139   : > { %5395 = vmatpush3.bf16.msra.mxu1 %v6754_v43  ;;  %899 = vmatprep.mubr.bf16.mxu1 %v6391_v6 }
 0x13a   : > { %5396 = vmatprep.subr.bf16.mxu1 %v6762_v55 }
 0x13d   : > { %5397 = vmatpush3.bf16.msra.mxu1 %v6773_v5 }
 0x13e   : > { %5398 = vmatprep.subr.bf16.mxu1 %v6778_v12 }
 0x140   : > { %900 = vmatmul.mubr.bf16.gmra.mxu1 %v6393_v63 }
 0x141   : > { %5399 = vmatpush3.bf16.msra.mxu1 %v6787_v7  ;;  %907 = vmatprep.mubr.bf16.mxu1 %v6394_v8 }
 0x142   : > { %5400 = vmatprep.subr.bf16.mxu1 %v6793_v20 }
 0x145   : > { %5401 = vmatpush3.bf16.msra.mxu1 %v6802_v44 }
 0x146   : > { %5402 = vmatprep.subr.bf16.mxu1 %v6806_v31 }
 0x148   : > { %908 = vmatmul.mubr.bf16.gmra.mxu1 %v6396_v9 }
 0x149   : > { %5403 = vmatpush3.bf16.msra.mxu1 %v6715_v49  ;;  %915 = vmatprep.mubr.bf16.mxu1 %v6397_v11 }
 0x14a   : > { %5404 = vmatprep.subr.bf16.mxu1 %v6816_v42 }
 0x14d   : > { %5405 = vmatpush3.bf16.msra.mxu1 %v6822_v58 }
 0x14e   : > { %5406 = vmatprep.subr.bf16.mxu1 %v6824_v54 }
 0x150   : > { %916 = vmatmul.mubr.bf16.gmra.mxu1 %v6399_v50 }
 0x151   : > { %5407 = vmatpush3.bf16.msra.mxu1 %v6708_v39  ;;  %1011 = vmatprep.mubr.bf16.mxu1 %v6402_v10 }
 0x152   : > { %5408 = vmatprep.subr.bf16.mxu1 %v6828_v3 }
 0x155   : > { %5409 = vmatpush3.bf16.msra.mxu1 %v6832_v52 }
 0x156   : > { %5444 = vmatprep.subr.bf16.mxu1 %v6756_v45 }
 0x158   : > { %1012 = vmatmul.mubr.bf16.vlgmr.msra.gmra.mxu1 %v6400_v13 }
 0x159   : > { %5445 = vmatpush3.bf16.msra.mxu1 %v6754_v43  ;;  %1019 = vmatprep.mubr.bf16.mxu1 %v6403_v61 }
 0x15a   : > { %5446 = vmatprep.subr.bf16.mxu1 %v6762_v55 }
 0x15d   : > { %5447 = vmatpush3.bf16.msra.mxu1 %v6773_v5 }
 0x15e   : > { %5448 = vmatprep.subr.bf16.mxu1 %v6778_v12 }
 0x160   : > { %1020 = vmatmul.mubr.bf16.gmra.mxu1 %v6405_v14 }
 0x161   : > { %5449 = vmatpush3.bf16.msra.mxu1 %v6787_v7  ;;  %1027 = vmatprep.mubr.bf16.mxu1 %v6406_v16 }
 0x162   : > { %5450 = vmatprep.subr.bf16.mxu1 %v6793_v20 }
 0x165   : > { %5451 = vmatpush3.bf16.msra.mxu1 %v6802_v44 }
 0x166   : > { %5452 = vmatprep.subr.bf16.mxu1 %v6806_v31 }
 0x168   : > { %1028 = vmatmul.mubr.bf16.gmra.mxu1 %v6408_v17 }
 0x169   : > { %5453 = vmatpush3.bf16.msra.mxu1 %v6715_v49  ;;  %1035 = vmatprep.mubr.bf16.mxu1 %v6409_v18 }
 0x16a   : > { %5454 = vmatprep.subr.bf16.mxu1 %v6816_v42 }
 0x16d   : > { %5455 = vmatpush3.bf16.msra.mxu1 %v6822_v58 }
 0x16e   : > { %5456 = vmatprep.subr.bf16.mxu1 %v6824_v54 }
 0x170   : > { %1036 = vmatmul.mubr.bf16.gmra.mxu1 %v6411_v0 }
 0x171   : > { %5457 = vmatpush3.bf16.msra.mxu1 %v6708_v39  ;;  %1298 = vmatprep.mubr.bf16.mxu1 %v6414_v19 }
 0x172   : > { %5458 = vmatprep.subr.bf16.mxu1 %v6828_v3 }
 0x175   : > { %5459 = vmatpush3.bf16.msra.mxu1 %v6832_v52 }
 0x176   : > { %5489 = vmatprep.subr.bf16.mxu1 %v6756_v45 }
 0x178   : > { %1299 = vmatmul.mubr.bf16.vlgmr.msra.gmra.mxu1 %v6412_v15 }
 0x179   : > { %5490 = vmatpush3.bf16.msra.mxu1 %v6754_v43  ;;  %1306 = vmatprep.mubr.bf16.mxu1 %v6415_v21 }
 0x17a   : > { %5491 = vmatprep.subr.bf16.mxu1 %v6762_v55 }
 0x17d   : > { %5492 = vmatpush3.bf16.msra.mxu1 %v6773_v5 }
 0x17e   : > { %5493 = vmatprep.subr.bf16.mxu1 %v6778_v12 }
 0x180   : > { %1307 = vmatmul.mubr.bf16.gmra.mxu1 %v6417_v22  ;;  %v6438_v22 = vld [vmem:[%s7859_s3 + $0x10] sm:$0xff]  }
 0x181   : > { %5494 = vmatpush3.bf16.msra.mxu1 %v6787_v7  ;;  %1314 = vmatprep.mubr.bf16.mxu1 %v6418_v25 }
 0x182   : > { %5495 = vmatprep.subr.bf16.mxu1 %v6793_v20 }
 0x185   : > { %5496 = vmatpush3.bf16.msra.mxu1 %v6802_v44 }
 0x186   : > { %5497 = vmatprep.subr.bf16.mxu1 %v6806_v31 }
 0x188   : > { %1315 = vmatmul.mubr.bf16.gmra.mxu1 %v6420_v62 }
 0x189   : > { %5498 = vmatpush3.bf16.msra.mxu1 %v6715_v49  ;;  %1322 = vmatprep.mubr.bf16.mxu1 %v6421_v27 }
 0x18a   : > { %5499 = vmatprep.subr.bf16.mxu1 %v6816_v42 }
 0x18d   : > { %5500 = vmatpush3.bf16.msra.mxu1 %v6822_v58 }
 0x18e   : > { %5501 = vmatprep.subr.bf16.mxu1 %v6824_v54 }
 0x190   : > { %1323 = vmatmul.mubr.bf16.gmra.mxu1 %v6423_v30 }
 0x191   : > { %5502 = vmatpush3.bf16.msra.mxu1 %v6708_v39  ;;  %1509 = vmatprep.mubr.bf16.mxu1 %v6426_v59 }
 0x192   : > { %5503 = vmatprep.subr.bf16.mxu1 %v6828_v3 }
 0x195   : > { %5504 = vmatpush3.bf16.msra.mxu1 %v6832_v52 }
 0x198   : > { %1510 = vmatmul.mubr.bf16.vlgmr.msra.gmra.mxu1 %v6424_v32 }
 0x199   : > { %1517 = vmatprep.mubr.bf16.mxu1 %v6427_v40 }
 0x1a0   : > { %1518 = vmatmul.mubr.bf16.gmra.mxu1 %v6429_v34 }
 0x1a1   : > { %1525 = vmatprep.mubr.bf16.mxu1 %v6430_v35 }
 0x1a8   : > { %1526 = vmatmul.mubr.bf16.gmra.mxu1 %v6432_v57 }
 0x1a9   : > { %1533 = vmatprep.mubr.bf16.mxu1 %v6433_v36 }
 0x1b0   : > { %1534 = vmatmul.mubr.bf16.gmra.mxu1 %v6435_v37 }
 0x1f8   : > { %v5370_v41 = vpop.f32.mrf.mxu1 }
 0x1fa   : > { %v5371_v60 = vpop.f32.mrf.mxu1 }
 0x1fc   : > { %v5373_v46 = vpop.f32.mrf.mxu1 }
 0x1fe   : > { %v5374_v47 = vpop.f32.mrf.mxu1 }
 0x1ff   : > { %v5375_v35 = vadd.f32 %v5374_v47, %v5373_v46 }
 0x200   : > { %v5376_v48 = vpop.f32.mrf.mxu1 }
 0x202   : > { %v5377_v51 = vpop.f32.mrf.mxu1 }
 0x204   : > { %v5379_v53 = vpop.f32.mrf.mxu1 }
 0x206   : > { %v5380_v33 = vpop.f32.mrf.mxu1 }
 0x208   : > { %v5382_v56 = vpop.f32.mrf.mxu1 }
 0x20a   : > { %v5383_v1 = vpop.f32.mrf.mxu1 }
 0x20c   : > { %v5385_v26 = vpop.f32.mrf.mxu1 }
 0x20e   : > { %v5386_v29 = vpop.f32.mrf.mxu1 }
 0x210   : > { %v6982_v2 = vpop.f32.mrf.mxu1 }
 0x212   : > { %v6984_v4 = vpop.f32.mrf.mxu1 }
 0x214   : > { %v5391_v6 = vpop.f32.mrf.mxu1 }
 0x216   : > { %v5392_v63 = vpop.f32.mrf.mxu1 }
 0x218   : > { %v5410_v8 = vpop.f32.mrf.mxu1 }
 0x21a   : > { %v5411_v9 = vpop.f32.mrf.mxu1 }
 0x21b   : > { %v5412_v10 = vadd.f32 %v5411_v9, %v5410_v8  ;;  %v5372_v8 = vadd.f32 %v5371_v60, %v5370_v41  ;;  %v6439_v41 = vld [vmem:[%s7859_s3 + $0x18] sm:$0xff]  }
 0x21c   : > { %v5413_v11 = vpop.f32.mrf.mxu1 }
 0x21e   : > { %v5414_v50 = vpop.f32.mrf.mxu1 }
 0x21f   : > { %v5415_v13 = vadd.f32 %v5414_v50, %v5413_v11  ;;  %v924_v50 = vpack.c.bf16 %v5375_v35, %v5372_v8 }
 0x220   : > { %v5416_v61 = vpop.f32.mrf.mxu1 }
 0x221   : > { %v1044_v14 = vpack.c.bf16 %v5415_v13, %v5412_v10  ;;  %v5381_v13 = vadd.f32 %v5380_v33, %v5379_v53 }
 0x222   : > { %v5417_v16 = vpop.f32.mrf.mxu1 }
 0x223   : > { %5930 = vmatprep.mubr.msk.bf16.mxu0 %vm1056_vm5, %v1044_v14  ;;  %v5418_v0 = vadd.f32 %v5417_v16, %v5416_v61  ;;  %v5387_v61 = vadd.f32 %v5386_v29, %v5385_v26  ;;  %v5378_v16 = vadd.f32 %v5377_v51, %v5376_v48  ;;  %v5390_v48 = vadd.f32 %v6984_v4, %v6982_v2 }
 0x224   : > { %v5419_v17 = vpop.f32.mrf.mxu1 }
 0x225   : > { %v925_v46 = vpack.c.bf16 %v5381_v13, %v5378_v16 }
 0x226   : > { %v5420_v18 = vpop.f32.mrf.mxu1 }
 0x227   : > { %v5421_v19 = vadd.f32 %v5420_v18, %v5419_v17  ;;  %v5384_v17 = vadd.f32 %v5383_v1, %v5382_v56 }
 0x228   : > { %v5422_v15 = vpop.f32.mrf.mxu1 }
 0x229   : > { %v1045_v21 = vpack.c.bf16 %v5421_v19, %v5418_v0  ;;  %v926_v60 = vpack.c.bf16 %v5387_v61, %v5384_v17  ;;  %v5393_v19 = vadd.f32 %v5392_v63, %v5391_v6 }
 0x22a   : > { %v5423_v25 = vpop.f32.mrf.mxu1 }
 0x22b   : > { %5931 = vmatmul.mubr.msk.bf16.vlgmr.msra.gmra.mxu0 %vm1056_vm5, %v1045_v21  ;;  %v5424_v28 = vadd.f32 %v5423_v25, %v5422_v15  ;;  %v927_v1 = vpack.c.bf16 %v5393_v19, %v5390_v48 }
 0x22c   : > { %v5425_v62 = vpop.f32.mrf.mxu1  ;;  %5939 = vmatpush3.bf16.msra.mxu0 %v6437_v38 }
 0x22d   : > { %5948 = vmatprep.subr.bf16.mxu0 %v6438_v22 }
 0x22e   : > { %v5426_v27 = vpop.f32.mrf.mxu1 }
 0x22f   : > { %v5427_v30 = vadd.f32 %v5426_v27, %v5425_v62 }
 0x230   : > { %v5428_v59 = vpop.f32.mrf.mxu1 }
 0x231   : > { %v1046_v32 = vpack.c.bf16 %v5427_v30, %v5424_v28 }
 0x232   : > { %v5429_v40 = vpop.f32.mrf.mxu1 }
 0x233   : > { %5934 = vmatprep.mubr.msk.bf16.mxu0 %vm1056_vm5, %v1046_v32  ;;  %v5430_v36 = vadd.f32 %v5429_v40, %v5428_v59 }
 0x234   : > { %v5431_v34 = vpop.f32.mrf.mxu1 }
 0x236   : > { %v5432_v57 = vpop.f32.mrf.mxu1 }
 0x237   : > { %v5433_v37 = vadd.f32 %v5432_v57, %v5431_v34 }
 0x238   : > { %v5460_v9 = vpop.f32.mrf.mxu1 }
 0x239   : > { %v1047_v11 = vpack.c.bf16 %v5433_v37, %v5430_v36 }
 0x23a   : > { %v5461_v10 = vpop.f32.mrf.mxu1 }
 0x23b   : > { %5935 = vmatmul.mubr.msk.bf16.gmra.mxu0 %vm1056_vm5, %v1047_v11  ;;  %v5462_v51 = vadd.f32 %v5461_v10, %v5460_v9 }
 0x23c   : > { %5940 = vmatprep.mubr.msk.bf16.mxu0 %vm1056_vm5, %v924_v50  ;;  %v5463_v38 = vpop.f32.mrf.mxu1 }
 0x23e   : > { %v5464_v14 = vpop.f32.mrf.mxu1 }
 0x23f   : > { %v5465_v53 = vadd.f32 %v5464_v14, %v5463_v38 }
 0x240   : > { %v5466_v18 = vpop.f32.mrf.mxu1 }
 0x241   : > { %v1331_v26 = vpack.c.bf16 %v5465_v53, %v5462_v51 }
 0x242   : > { %v5467_v47 = vpop.f32.mrf.mxu1 }
 0x243   : > { %5941 = vmatmul.mubr.msk.bf16.vlgmr.msra.gmra.mxu0 %vm1056_vm5, %v925_v46 }
 0x244   : > { %5944 = vmatprep.mubr.msk.bf16.mxu0 %vm1056_vm5, %v926_v60  ;;  %v5469_v0 = vpop.f32.mrf.mxu1  ;;  %5949 = vmatpush3.bf16.msra.mxu0 %v6438_v22  ;;  %v5468_v22 = vadd.f32 %v5467_v47, %v5466_v18 }
 0x245   : > { %5958 = vmatprep.subr.bf16.mxu0 %v6439_v41 }
 0x246   : > { %v5470_v33 = vpop.f32.mrf.mxu1 }
 0x247   : > { %v5471_v21 = vadd.f32 %v5470_v33, %v5469_v0 }
 0x248   : > { %v5472_v56 = vpop.f32.mrf.mxu1 }
 0x249   : > { %v1332_v27 = vpack.c.bf16 %v5471_v21, %v5468_v22  ;;  %v6446_v21 = vld [vmem:[%s7858_s2 + $0x124] ss:$8 sps:$4 sm:$0xff]   ;;  %v6449_v22 = vld [vmem:[%s7858_s2 + $0x134] ss:$8 sps:$4 sm:$0xff]  }
 0x24a   : > { %v5473_v29 = vpop.f32.mrf.mxu1 }
 0x24b   : > { %5945 = vmatmul.mubr.msk.bf16.gmra.mxu0 %vm1056_vm5, %v927_v1  ;;  %v5474_v6 = vadd.f32 %v5473_v29, %v5472_v56  ;;  %v6442_v56 = vld [vmem:[%s7858_s2 + $0x104] ss:$8 sps:$4 sm:$0xff]   ;;  %v6443_v29 = vld [vmem:[%s7858_s2 + $0x114] ss:$8 sps:$4 sm:$0xff]  }
 0x24c   : > { %v5475_v15 = vpop.f32.mrf.mxu1  ;;  %5950 = vmatprep.mubr.msk.bf16.mxu0 %vm1056_vm5, %v1331_v26  ;;  %v6440_v26 = vld [vmem:[%s7858_s2 + $0x100] ss:$8 sps:$4 sm:$0xff]  }
 0x24e   : > { %v5476_v25 = vpop.f32.mrf.mxu1 }
 0x24f   : > { %v5477_v63 = vadd.f32 %v5476_v25, %v5475_v15  ;;  %v6445_v15 = vld [vmem:[%s7858_s2 + $0x110] ss:$8 sps:$4 sm:$0xff]   ;;  %v6448_v25 = vld [vmem:[%s7858_s2 + $0x120] ss:$8 sps:$4 sm:$0xff]  }
 0x250   : > { %v5478_v62 = vpop.f32.mrf.mxu1 }
 0x251   : > { %v1333_v28 = vpack.c.bf16 %v5477_v63, %v5474_v6  ;;  %v6451_v6 = vld [vmem:[%s7858_s2 + $0x130] ss:$8 sps:$4 sm:$0xff]   ;;  %v6454_v63 = vld [vmem:[%s7858_s2 + $0x144] ss:$8 sps:$4 sm:$0xff]  }
 0x252   : > { %v5479_v30 = vpop.f32.mrf.mxu1 }
 0x253   : > { %5951 = vmatmul.mubr.msk.bf16.vlgmr.msra.gmra.mxu0 %vm1056_vm5, %v1332_v27  ;;  %v5480_v59 = vadd.f32 %v5479_v30, %v5478_v62  ;;  %v6452_v62 = vld [vmem:[%s7858_s2 + $0x140] ss:$8 sps:$4 sm:$0xff]   ;;  %v6455_v27 = vld [vmem:[%s7858_s2 + $0x154] ss:$8 sps:$4 sm:$0xff]   ;;  %v6458_v30 = vld [vmem:[%s7858_s2 + $0x164] ss:$8 sps:$4 sm:$0xff]  }
 0x254   : > { %5959 = vmatpush3.bf16.msra.mxu0 %v6439_v41  ;;  %v5481_v2 = vpop.f32.mrf.mxu1  ;;  %5954 = vmatprep.mubr.msk.bf16.mxu0 %vm1056_vm5, %v1333_v28  ;;  %v6457_v28 = vld [vmem:[%s7858_s2 + $0x150] ss:$8 sps:$4 sm:$0xff]  }
 0x255   : > { %5534 = vmatprep.subr.bf16.mxu0 %v6756_v45 }
 0x256   : > { %v5482_v4 = vpop.f32.mrf.mxu1 }
 0x257   : > { %v5483_v32 = vadd.f32 %v5482_v4, %v5481_v2  ;;  %v6460_v2 = vld [vmem:[%s7858_s2 + $0x160] ss:$8 sps:$4 sm:$0xff]   ;;  %v6461_v4 = vld [vmem:[%s7858_s2 + $0x174] ss:$8 sps:$4 sm:$0xff]  }
 0x258   : > { %v5505_v40 = vpop.f32.mrf.mxu1 }
 0x259   : > { %v1334_v34 = vpack.c.bf16 %v5483_v32, %v5480_v59  ;;  %v6463_v59 = vld [vmem:[%s7858_s2 + $0x170] ss:$8 sps:$4 sm:$0xff]   ;;  %v6464_v32 = vld [vmem:[%s7859_s3 + $0x20] sm:$0xff]  }
 0x25a   : > { %v5506_v35 = vpop.f32.mrf.mxu1  ;;  %5968 = vmatprep.subr.bf16.mxu1 %v6464_v32 }
 0x25b   : > { %5955 = vmatmul.mubr.msk.bf16.gmra.mxu0 %vm1056_vm5, %v1334_v34  ;;  %v5507_v37 = vadd.f32 %v5506_v35, %v5505_v40  ;;  %5969 = vmatpush3.bf16.msra.mxu1 %v6464_v32  ;;  %v7096_v40 = vld [vmem:[%s7859_s3 + $0x28] sm:$0xff]  }
 0x25c   : > { %v5508_v57 = vpop.f32.mrf.mxu1  ;;  %5978 = vmatprep.subr.bf16.mxu1 %v7096_v40 }
 0x25e   : > { %v5509_v36 = vpop.f32.mrf.mxu1 }
 0x25f   : > { %v5510_v8 = vadd.f32 %v5509_v36, %v5508_v57 }
 0x260   : > { %v5511_v9 = vpop.f32.mrf.mxu1 }
 0x261   : > { %v1542_v11 = vpack.c.bf16 %v5510_v8, %v5507_v37 }
 0x262   : > { %v5512_v50 = vpop.f32.mrf.mxu1 }
 0x263   : > { %5960 = vmatprep.mubr.msk.bf16.mxu0 %vm1056_vm5, %v1542_v11  ;;  %v5513_v13 = vadd.f32 %v5512_v50, %v5511_v9 }
 0x264   : > { %v5514_v10 = vpop.f32.mrf.mxu1 }
 0x266   : > { %v5515_v38 = vpop.f32.mrf.mxu1 }
 0x267   : > { %v5516_v61 = vadd.f32 %v5515_v38, %v5514_v10 }
 0x268   : > { %v5517_v14 = vpop.f32.mrf.mxu1 }
 0x269   : > { %v1543_v16 = vpack.c.bf16 %v5516_v61, %v5513_v13 }
 0x26a   : > { %v5518_v17 = vpop.f32.mrf.mxu1 }
 0x26b   : > { %5961 = vmatmul.mubr.msk.bf16.vlgmr.msra.gmra.mxu0 %vm1056_vm5, %v1543_v16  ;;  %v5519_v46 = vadd.f32 %v5518_v17, %v5517_v14 }
 0x26c   : > { %5535 = vmatpush3.bf16.msra.mxu0 %v6754_v43  ;;  %v5520_v18 = vpop.f32.mrf.mxu1 }
 0x26d   : > { %5536 = vmatprep.subr.bf16.mxu0 %v6762_v55 }
 0x26e   : > { %v5521_v41 = vpop.f32.mrf.mxu1 }
 0x26f   : > { %v5522_v60 = vadd.f32 %v5521_v41, %v5520_v18 }
 0x270   : > { %5537 = vmatpush3.bf16.msra.mxu0 %v6773_v5  ;;  %v5523_v47 = vpop.f32.mrf.mxu1 }
 0x271   : > { %v1544_v0 = vpack.c.bf16 %v5522_v60, %v5519_v46  ;;  %5538 = vmatprep.subr.bf16.mxu0 %v6778_v12 }
 0x272   : > { %v5524_v19 = vpop.f32.mrf.mxu1 }
 0x273   : > { %5964 = vmatprep.mubr.msk.bf16.mxu0 %vm1056_vm5, %v1544_v0  ;;  %v5525_v33 = vadd.f32 %v5524_v19, %v5523_v47 }
 0x274   : > { %5539 = vmatpush3.bf16.msra.mxu0 %v6787_v7  ;;  %v5526_v53 = vpop.f32.mrf.mxu1 }
 0x275   : > { %5540 = vmatprep.subr.bf16.mxu0 %v6793_v20 }
 0x276   : > { %v5527_v48 = vpop.f32.mrf.mxu1 }
 0x277   : > { %v5528_v51 = vadd.f32 %v5527_v48, %v5526_v53 }
 0x278   : > { %5541 = vmatpush3.bf16.msra.mxu0 %v6802_v44 }
 0x279   : > { %v1545_v1 = vpack.c.bf16 %v5528_v51, %v5525_v33  ;;  %5542 = vmatprep.subr.bf16.mxu0 %v6806_v31 }
 0x27b   : > { %5965 = vmatmul.mubr.msk.bf16.gmra.mxu0 %vm1056_vm5, %v1545_v1 }
 0x27c   : > { %5543 = vmatpush3.bf16.msra.mxu0 %v6715_v49  ;;  %1720 = vmatprep.mubr.bf16.mxu0 %v6442_v56 }
 0x27d   : > { %5544 = vmatprep.subr.bf16.mxu0 %v6816_v42 }
 0x280   : > { %5545 = vmatpush3.bf16.msra.mxu0 %v6822_v58 }
 0x281   : > { %5546 = vmatprep.subr.bf16.mxu0 %v6824_v54 }
 0x284   : > { %5547 = vmatpush3.bf16.msra.mxu0 %v6708_v39 }
 0x285   : > { %5548 = vmatprep.subr.bf16.mxu0 %v6828_v3 }
 0x288   : > { %5549 = vmatpush3.bf16.msra.mxu0 %v6832_v52 }
 0x289   : > { %5579 = vmatprep.subr.bf16.mxu0 %v6756_v45 }
 0x28b   : > { %1721 = vmatmul.mubr.bf16.vlgmr.msra.gmra.mxu0 %v6440_v26 }
 0x28c   : > { %5580 = vmatpush3.bf16.msra.mxu0 %v6754_v43  ;;  %1728 = vmatprep.mubr.bf16.mxu0 %v6443_v29 }
 0x28d   : > { %5581 = vmatprep.subr.bf16.mxu0 %v6762_v55 }
 0x290   : > { %5582 = vmatpush3.bf16.msra.mxu0 %v6773_v5 }
 0x291   : > { %5583 = vmatprep.subr.bf16.mxu0 %v6778_v12 }
 0x293   : > { %1729 = vmatmul.mubr.bf16.gmra.mxu0 %v6445_v15 }
 0x294   : > { %5584 = vmatpush3.bf16.msra.mxu0 %v6787_v7  ;;  %1736 = vmatprep.mubr.bf16.mxu0 %v6446_v21 }
 0x295   : > { %5585 = vmatprep.subr.bf16.mxu0 %v6793_v20 }
 0x298   : > { %5586 = vmatpush3.bf16.msra.mxu0 %v6802_v44 }
 0x299   : > { %5587 = vmatprep.subr.bf16.mxu0 %v6806_v31 }
 0x29b   : > { %1737 = vmatmul.mubr.bf16.gmra.mxu0 %v6448_v25 }
 0x29c   : > { %5588 = vmatpush3.bf16.msra.mxu0 %v6715_v49  ;;  %1744 = vmatprep.mubr.bf16.mxu0 %v6449_v22 }
 0x29d   : > { %5589 = vmatprep.subr.bf16.mxu0 %v6816_v42 }
 0x2a0   : > { %5590 = vmatpush3.bf16.msra.mxu0 %v6822_v58 }
 0x2a1   : > { %5591 = vmatprep.subr.bf16.mxu0 %v6824_v54 }
 0x2a3   : > { %1745 = vmatmul.mubr.bf16.gmra.mxu0 %v6451_v6 }
 0x2a4   : > { %5592 = vmatpush3.bf16.msra.mxu0 %v6708_v39  ;;  %1931 = vmatprep.mubr.bf16.mxu0 %v6454_v63 }
 0x2a5   : > { %5593 = vmatprep.subr.bf16.mxu0 %v6828_v3 }
 0x2a8   : > { %5594 = vmatpush3.bf16.msra.mxu0 %v6832_v52 }
 0x2ab   : > { %1932 = vmatmul.mubr.bf16.vlgmr.msra.gmra.mxu0 %v6452_v62 }
 0x2ac   : > { %1939 = vmatprep.mubr.bf16.mxu0 %v6455_v27 }
 0x2b3   : > { %1940 = vmatmul.mubr.bf16.gmra.mxu0 %v6457_v28 }
 0x2b4   : > { %1947 = vmatprep.mubr.bf16.mxu0 %v6458_v30 }
 0x2bb   : > { %1948 = vmatmul.mubr.bf16.gmra.mxu0 %v6460_v2 }
 0x2bc   : > { %1955 = vmatprep.mubr.bf16.mxu0 %v6461_v4 }
 0x2c3   : > { %1956 = vmatmul.mubr.bf16.gmra.mxu0 %v6463_v59 }
 0x2eb   : > { %v5932_v34 = vpop.f32.mrf.mxu0 }
 0x2ed   : > { %v1103_v35 = vpop.f32.mrf.mxu0 }
 0x2ef   : > { %v5933_v57 = vpop.f32.mrf.mxu0 }
 0x2f1   : > { %v7099_v36 = vpop.f32.mrf.mxu0 }
 0x2fb   : > { %v5936_v37 = vpop.f32.mrf.mxu0 }
 0x2fd   : > { %v1119_v8 = vpop.f32.mrf.mxu0 }
 0x2ff   : > { %v5937_v9 = vpop.f32.mrf.mxu0 }
 0x301   : > { %v7101_v11 = vpop.f32.mrf.mxu0 }
 0x303   : > { %v5942_v50 = vpop.f32.mrf.mxu0 }
 0x304   : > { %v1195_v10 = vadd.f32 %v5942_v50, %v5932_v34 }
 0x305   : > { %v1186_v38 = vpop.f32.mrf.mxu0 }
 0x306   : > { %v1187_v13 = vadd.f32 %v1186_v38, %v1103_v35 }
 0x307   : > { %v5943_v61 = vpop.f32.mrf.mxu0 }
 0x308   : > { %v1198_v14 = vadd.f32 %v5943_v61, %v5933_v57 }
 0x309   : > { %v7103_v16 = vpop.f32.mrf.mxu0 }
 0x30b   : > { %v5946_v17 = vpop.f32.mrf.mxu0 }
 0x30c   : > { %v1211_v18 = vadd.f32 %v5946_v17, %v5936_v37 }
 0x30d   : > { %v1202_v46 = vpop.f32.mrf.mxu0 }
 0x30e   : > { %v1203_v41 = vadd.f32 %v1202_v46, %v1119_v8 }
 0x30f   : > { %v5947_v60 = vpop.f32.mrf.mxu0 }
 0x310   : > { %v1214_v47 = vadd.f32 %v5947_v60, %v5937_v9 }
 0x311   : > { %v7105_v0 = vpop.f32.mrf.mxu0 }
 0x313   : > { %v5952_v19 = vpop.f32.mrf.mxu0 }
 0x314   : > { %v1422_v53 = vadd.f32 %v5952_v19, %v1195_v10 }
 0x315   : > { %v1389_v33 = vpop.f32.mrf.mxu0 }
 0x316   : > { %v1420_v48 = vadd.f32 %v1389_v33, %v1187_v13 }
 0x317   : > { %v5953_v51 = vpop.f32.mrf.mxu0 }
 0x318   : > { %v1423_v56 = vadd.f32 %v5953_v51, %v1198_v14 }
 0x319   : > { %v7107_v1 = vpop.f32.mrf.mxu0 }
 0x31b   : > { %v5956_v26 = vpop.f32.mrf.mxu0 }
 0x31c   : > { %v1426_v29 = vadd.f32 %v5956_v26, %v1211_v18 }
 0x31d   : > { %v1405_v15 = vpop.f32.mrf.mxu0 }
 0x31e   : > { %v1424_v21 = vadd.f32 %v1405_v15, %v1203_v41 }
 0x31f   : > { %v5957_v25 = vpop.f32.mrf.mxu0 }
 0x320   : > { %v1427_v22 = vadd.f32 %v5957_v25, %v1214_v47 }
 0x321   : > { %v7109_v6 = vpop.f32.mrf.mxu0 }
 0x32b   : > { %v5962_v63 = vpop.f32.mrf.mxu0 }
 0x32c   : > { %v7111_v62 = vadd.f32 %v5962_v63, %v1422_v53 }
 0x32d   : > { %v1600_v27 = vpop.f32.mrf.mxu0 }
 0x32e   : > { %v7113_v28 = vadd.f32 %v1600_v27, %v1420_v48 }
 0x32f   : > { %v5963_v30 = vpop.f32.mrf.mxu0 }
 0x330   : > { %v7115_v2 = vadd.f32 %v5963_v30, %v1423_v56 }
 0x331   : > { %v7117_v4 = vpop.f32.mrf.mxu0 }
 0x33b   : > { %v5966_v59 = vpop.f32.mrf.mxu0 }
 0x33c   : > { %v7119_v32 = vadd.f32 %v5966_v59, %v1426_v29 }
 0x33d   : > { %v1616_v34 = vpop.f32.mrf.mxu0 }
 0x33e   : > { %v7121_v35 = vadd.f32 %v1616_v34, %v1424_v21 }
 0x33f   : > { %v5967_v57 = vpop.f32.mrf.mxu0 }
 0x340   : > { %v7123_v37 = vadd.f32 %v5967_v57, %v1427_v22 }
 0x341   : > { %v7125_v8 = vpop.f32.mrf.mxu0 }
 0x34b   : > { %v5550_v9 = vpop.f32.mrf.mxu0 }
 0x34d   : > { %v5551_v50 = vpop.f32.mrf.mxu0 }
 0x34e   : > { %v5552_v13 = vadd.f32 %v5551_v50, %v5550_v9 }
 0x34f   : > { %v5553_v10 = vpop.f32.mrf.mxu0 }
 0x351   : > { %v5554_v38 = vpop.f32.mrf.mxu0 }
 0x352   : > { %v5555_v61 = vadd.f32 %v5554_v38, %v5553_v10 }
 0x353   : > { %v5556_v14 = vpop.f32.mrf.mxu0 }
 0x354   : > { %v1753_v17 = vpack.c.bf16 %v5555_v61, %v5552_v13 }
 0x355   : > { %v5557_v18 = vpop.f32.mrf.mxu0 }
 0x356   : > { %5970 = vmatprep.mubr.msk.bf16.mxu1 %vm1056_vm5, %v1753_v17  ;;  %v5558_v60 = vadd.f32 %v5557_v18, %v5556_v14 }
 0x357   : > { %v5559_v46 = vpop.f32.mrf.mxu0 }
 0x359   : > { %v5560_v41 = vpop.f32.mrf.mxu0 }
 0x35a   : > { %v5561_v47 = vadd.f32 %v5560_v41, %v5559_v46 }
 0x35b   : > { %v5562_v19 = vpop.f32.mrf.mxu0 }
 0x35c   : > { %v1754_v53 = vpack.c.bf16 %v5561_v47, %v5558_v60 }
 0x35d   : > { %v5563_v33 = vpop.f32.mrf.mxu0 }
 0x35e   : > { %5971 = vmatmul.mubr.msk.bf16.vlgmr.msra.gmra.mxu1 %vm1056_vm5, %v1754_v53  ;;  %v5564_v56 = vadd.f32 %v5563_v33, %v5562_v19 }
 0x35f   : > { %5979 = vmatpush3.bf16.msra.mxu1 %v7096_v40  ;;  %v5565_v48 = vpop.f32.mrf.mxu0 }
 0x360   : > { %5624 = vmatprep.subr.bf16.mxu1 %v6756_v45 }
 0x361   : > { %v5566_v51 = vpop.f32.mrf.mxu0 }
 0x362   : > { %v5567_v26 = vadd.f32 %v5566_v51, %v5565_v48 }
 0x363   : > { %v5568_v29 = vpop.f32.mrf.mxu0 }
 0x364   : > { %v1755_v15 = vpack.c.bf16 %v5567_v26, %v5564_v56 }
 0x365   : > { %v5569_v21 = vpop.f32.mrf.mxu0 }
 0x366   : > { %5974 = vmatprep.mubr.msk.bf16.mxu1 %vm1056_vm5, %v1755_v15  ;;  %v5570_v63 = vadd.f32 %v5569_v21, %v5568_v29 }
 0x367   : > { %v5571_v25 = vpop.f32.mrf.mxu0 }
 0x369   : > { %v5572_v22 = vpop.f32.mrf.mxu0 }
 0x36a   : > { %v5573_v27 = vadd.f32 %v5572_v22, %v5571_v25  ;;  %v6468_v25 = vld [vmem:[%s7858_s2 + $0x184] ss:$8 sps:$4 sm:$0xff]  }
 0x36b   : > { %v5595_v30 = vpop.f32.mrf.mxu0 }
 0x36c   : > { %v1756_v59 = vpack.c.bf16 %v5573_v27, %v5570_v63  ;;  %v6466_v63 = vld [vmem:[%s7858_s2 + $0x180] ss:$8 sps:$4 sm:$0xff]   ;;  %v6469_v27 = vld [vmem:[%s7858_s2 + $0x194] ss:$8 sps:$4 sm:$0xff]  }
 0x36d   : > { %v5596_v34 = vpop.f32.mrf.mxu0 }
 0x36e   : > { %5975 = vmatmul.mubr.msk.bf16.gmra.mxu1 %vm1056_vm5, %v1756_v59  ;;  %v5597_v9 = vadd.f32 %v5596_v34, %v5595_v30  ;;  %v6471_v30 = vld [vmem:[%s7858_s2 + $0x190] ss:$8 sps:$4 sm:$0xff]   ;;  %v6472_v59 = vld [vmem:[%s7858_s2 + $0x1a4] ss:$8 sps:$4 sm:$0xff]   ;;  %v6474_v34 = vld [vmem:[%s7858_s2 + $0x1a0] ss:$8 sps:$4 sm:$0xff]  }
 0x36f   : > { %v5598_v40 = vpop.f32.mrf.mxu0 }
 0x371   : > { %v5599_v57 = vpop.f32.mrf.mxu0 }
 0x372   : > { %v5600_v50 = vadd.f32 %v5599_v57, %v5598_v40  ;;  %v6475_v40 = vld [vmem:[%s7858_s2 + $0x1b4] ss:$8 sps:$4 sm:$0xff]   ;;  %v6477_v57 = vld [vmem:[%s7858_s2 + $0x1b0] ss:$8 sps:$4 sm:$0xff]  }
 0x373   : > { %v5601_v10 = vpop.f32.mrf.mxu0 }
 0x374   : > { %v1964_v38 = vpack.c.bf16 %v5600_v50, %v5597_v9  ;;  %v6480_v9 = vld [vmem:[%s7858_s2 + $0x1c4] ss:$8 sps:$4 sm:$0xff]   ;;  %v6478_v50 = vld [vmem:[%s7858_s2 + $0x1c0] ss:$8 sps:$4 sm:$0xff]  }
 0x375   : > { %v5602_v13 = vpop.f32.mrf.mxu0 }
 0x376   : > { %5980 = vmatprep.mubr.msk.bf16.mxu1 %vm1056_vm5, %v1964_v38  ;;  %v5603_v17 = vadd.f32 %v5602_v13, %v5601_v10  ;;  %v6481_v10 = vld [vmem:[%s7858_s2 + $0x1d4] ss:$8 sps:$4 sm:$0xff]   ;;  %v6483_v38 = vld [vmem:[%s7858_s2 + $0x1d0] ss:$8 sps:$4 sm:$0xff]   ;;  %v6484_v13 = vld [vmem:[%s7858_s2 + $0x1e4] ss:$8 sps:$4 sm:$0xff]  }
 0x377   : > { %v5604_v61 = vpop.f32.mrf.mxu0 }
 0x379   : > { %v5605_v14 = vpop.f32.mrf.mxu0 }
 0x37a   : > { %v5606_v18 = vadd.f32 %v5605_v14, %v5604_v61  ;;  %v6486_v61 = vld [vmem:[%s7858_s2 + $0x1e0] ss:$8 sps:$4 sm:$0xff]   ;;  %v6487_v14 = vld [vmem:[%s7858_s2 + $0x1f4] ss:$8 sps:$4 sm:$0xff]  }
 0x37b   : > { %v5607_v46 = vpop.f32.mrf.mxu0 }
 0x37c   : > { %v1965_v41 = vpack.c.bf16 %v5606_v18, %v5603_v17  ;;  %v6489_v17 = vld [vmem:[%s7858_s2 + $0x1f0] ss:$8 sps:$4 sm:$0xff]  }
 0x37d   : > { %v5608_v60 = vpop.f32.mrf.mxu0  ;;  %v6490_v18 = vld [vmem:[%s7859_s3 + $0x30] sm:$0xff]  }
 0x37e   : > { %5981 = vmatmul.mubr.msk.bf16.vlgmr.msra.gmra.mxu1 %vm1056_vm5, %v1965_v41  ;;  %v5609_v19 = vadd.f32 %v5608_v60, %v5607_v46  ;;  %5988 = vmatprep.subr.bf16.mxu0 %v6490_v18  ;;  %v6491_v46 = vld [vmem:[%s7859_s3 + $0x38] sm:$0xff]  }
 0x37f   : > { %5625 = vmatpush3.bf16.msra.mxu1 %v6754_v43  ;;  %v5610_v47 = vpop.f32.mrf.mxu0  ;;  %5989 = vmatpush3.bf16.msra.mxu0 %v6490_v18 }
 0x380   : > { %5626 = vmatprep.subr.bf16.mxu1 %v6762_v55  ;;  %5998 = vmatprep.subr.bf16.mxu0 %v6491_v46 }
 0x381   : > { %v5611_v53 = vpop.f32.mrf.mxu0 }
 0x382   : > { %v5612_v33 = vadd.f32 %v5611_v53, %v5610_v47 }
 0x383   : > { %5627 = vmatpush3.bf16.msra.mxu1 %v6773_v5  ;;  %v5613_v48 = vpop.f32.mrf.mxu0 }
 0x384   : > { %v1966_v51 = vpack.c.bf16 %v5612_v33, %v5609_v19  ;;  %5628 = vmatprep.subr.bf16.mxu1 %v6778_v12 }
 0x385   : > { %v5614_v56 = vpop.f32.mrf.mxu0 }
 0x386   : > { %5984 = vmatprep.mubr.msk.bf16.mxu1 %vm1056_vm5, %v1966_v51  ;;  %v5615_v29 = vadd.f32 %v5614_v56, %v5613_v48 }
 0x387   : > { %5629 = vmatpush3.bf16.msra.mxu1 %v6787_v7  ;;  %v5616_v26 = vpop.f32.mrf.mxu0 }
 0x388   : > { %5630 = vmatprep.subr.bf16.mxu1 %v6793_v20 }
 0x389   : > { %v5617_v15 = vpop.f32.mrf.mxu0 }
 0x38a   : > { %v5618_v21 = vadd.f32 %v5617_v15, %v5616_v26 }
 0x38b   : > { %5631 = vmatpush3.bf16.msra.mxu1 %v6802_v44 }
 0x38c   : > { %v1967_v22 = vpack.c.bf16 %v5618_v21, %v5615_v29  ;;  %5632 = vmatprep.subr.bf16.mxu1 %v6806_v31 }
 0x38e   : > { %5985 = vmatmul.mubr.msk.bf16.gmra.mxu1 %vm1056_vm5, %v1967_v22 }
 0x38f   : > { %5633 = vmatpush3.bf16.msra.mxu1 %v6715_v49  ;;  %2142 = vmatprep.mubr.bf16.mxu1 %v6468_v25 }
 0x390   : > { %5634 = vmatprep.subr.bf16.mxu1 %v6816_v42 }
 0x393   : > { %5635 = vmatpush3.bf16.msra.mxu1 %v6822_v58 }
 0x394   : > { %5636 = vmatprep.subr.bf16.mxu1 %v6824_v54 }
 0x397   : > { %5637 = vmatpush3.bf16.msra.mxu1 %v6708_v39 }
 0x398   : > { %5638 = vmatprep.subr.bf16.mxu1 %v6828_v3 }
 0x39b   : > { %5639 = vmatpush3.bf16.msra.mxu1 %v6832_v52 }
 0x39c   : > { %5669 = vmatprep.subr.bf16.mxu1 %v6756_v45 }
 0x39e   : > { %2143 = vmatmul.mubr.bf16.vlgmr.msra.gmra.mxu1 %v6466_v63 }
 0x39f   : > { %5670 = vmatpush3.bf16.msra.mxu1 %v6754_v43  ;;  %2150 = vmatprep.mubr.bf16.mxu1 %v6469_v27 }
 0x3a0   : > { %5671 = vmatprep.subr.bf16.mxu1 %v6762_v55 }
 0x3a3   : > { %5672 = vmatpush3.bf16.msra.mxu1 %v6773_v5 }
 0x3a4   : > { %5673 = vmatprep.subr.bf16.mxu1 %v6778_v12 }
 0x3a6   : > { %2151 = vmatmul.mubr.bf16.gmra.mxu1 %v6471_v30 }
 0x3a7   : > { %5674 = vmatpush3.bf16.msra.mxu1 %v6787_v7  ;;  %2158 = vmatprep.mubr.bf16.mxu1 %v6472_v59 }
 0x3a8   : > { %5675 = vmatprep.subr.bf16.mxu1 %v6793_v20 }
 0x3ab   : > { %5676 = vmatpush3.bf16.msra.mxu1 %v6802_v44 }
 0x3ac   : > { %5677 = vmatprep.subr.bf16.mxu1 %v6806_v31 }
 0x3ae   : > { %2159 = vmatmul.mubr.bf16.gmra.mxu1 %v6474_v34 }
 0x3af   : > { %5678 = vmatpush3.bf16.msra.mxu1 %v6715_v49  ;;  %2166 = vmatprep.mubr.bf16.mxu1 %v6475_v40 }
 0x3b0   : > { %5679 = vmatprep.subr.bf16.mxu1 %v6816_v42 }
 0x3b3   : > { %5680 = vmatpush3.bf16.msra.mxu1 %v6822_v58 }
 0x3b4   : > { %5681 = vmatprep.subr.bf16.mxu1 %v6824_v54 }
 0x3b6   : > { %2167 = vmatmul.mubr.bf16.gmra.mxu1 %v6477_v57 }
 0x3b7   : > { %5682 = vmatpush3.bf16.msra.mxu1 %v6708_v39  ;;  %2353 = vmatprep.mubr.bf16.mxu1 %v6480_v9 }
 0x3b8   : > { %5683 = vmatprep.subr.bf16.mxu1 %v6828_v3 }
 0x3bb   : > { %5684 = vmatpush3.bf16.msra.mxu1 %v6832_v52 }
 0x3be   : > { %2354 = vmatmul.mubr.bf16.vlgmr.msra.gmra.mxu1 %v6478_v50 }
 0x3bf   : > { %2361 = vmatprep.mubr.bf16.mxu1 %v6481_v10 }
 0x3c6   : > { %2362 = vmatmul.mubr.bf16.gmra.mxu1 %v6483_v38 }
 0x3c7   : > { %2369 = vmatprep.mubr.bf16.mxu1 %v6484_v13 }
 0x3ce   : > { %2370 = vmatmul.mubr.bf16.gmra.mxu1 %v6486_v61 }
 0x3cf   : > { %2377 = vmatprep.mubr.bf16.mxu1 %v6487_v14 }
 0x3d6   : > { %2378 = vmatmul.mubr.bf16.gmra.mxu1 %v6489_v17 }
 0x41e   : > { %v5972_v41 = vpop.f32.mrf.mxu1 }
 0x41f   : > { %v1844_v60 = vadd.f32 %v5972_v41, %v7111_v62 }
 0x420   : > { %v1811_v47 = vpop.f32.mrf.mxu1 }
 0x421   : > { %v1842_v19 = vadd.f32 %v1811_v47, %v7113_v28 }
 0x422   : > { %v5973_v53 = vpop.f32.mrf.mxu1 }
 0x423   : > { %v1845_v33 = vadd.f32 %v5973_v53, %v7115_v2 }
 0x424   : > { %v7225_v48 = vpop.f32.mrf.mxu1 }
 0x42e   : > { %v5976_v51 = vpop.f32.mrf.mxu1 }
 0x42f   : > { %v1848_v56 = vadd.f32 %v5976_v51, %v7119_v32 }
 0x430   : > { %v1827_v26 = vpop.f32.mrf.mxu1 }
 0x431   : > { %v1846_v29 = vadd.f32 %v1827_v26, %v7121_v35 }
 0x432   : > { %v5977_v15 = vpop.f32.mrf.mxu1 }
 0x433   : > { %v1849_v21 = vadd.f32 %v5977_v15, %v7123_v37 }
 0x434   : > { %v7230_v25 = vpop.f32.mrf.mxu1 }
 0x43e   : > { %v5982_v62 = vpop.f32.mrf.mxu1 }
 0x43f   : > { %v7232_v22 = vadd.f32 %v5982_v62, %v1844_v60 }
 0x440   : > { %v2022_v28 = vpop.f32.mrf.mxu1 }
 0x441   : > { %v7234_v63 = vadd.f32 %v2022_v28, %v1842_v19 }
 0x442   : > { %v5983_v2 = vpop.f32.mrf.mxu1 }
 0x443   : > { %v7236_v27 = vadd.f32 %v5983_v2, %v1845_v33 }
 0x444   : > { %v7238_v30 = vpop.f32.mrf.mxu1 }
 0x44e   : > { %v5986_v32 = vpop.f32.mrf.mxu1 }
 0x44f   : > { %v7240_v59 = vadd.f32 %v5986_v32, %v1848_v56 }
 0x450   : > { %v2038_v35 = vpop.f32.mrf.mxu1 }
 0x451   : > { %v7242_v34 = vadd.f32 %v2038_v35, %v1846_v29 }
 0x452   : > { %v5987_v37 = vpop.f32.mrf.mxu1 }
 0x453   : > { %v7244_v40 = vadd.f32 %v5987_v37, %v1849_v21 }
 0x454   : > { %v7246_v57 = vpop.f32.mrf.mxu1 }
 0x45e   : > { %v5640_v9 = vpop.f32.mrf.mxu1 }
 0x460   : > { %v5641_v50 = vpop.f32.mrf.mxu1 }
 0x461   : > { %v5642_v13 = vadd.f32 %v5641_v50, %v5640_v9 }
 0x462   : > { %v5643_v10 = vpop.f32.mrf.mxu1 }
 0x464   : > { %v5644_v38 = vpop.f32.mrf.mxu1 }
 0x465   : > { %v5645_v61 = vadd.f32 %v5644_v38, %v5643_v10 }
 0x466   : > { %v5646_v14 = vpop.f32.mrf.mxu1 }
 0x467   : > { %v2175_v17 = vpack.c.bf16 %v5645_v61, %v5642_v13 }
 0x468   : > { %v5647_v18 = vpop.f32.mrf.mxu1 }
 0x469   : > { %5990 = vmatprep.mubr.msk.bf16.mxu0 %vm1056_vm5, %v2175_v17  ;;  %v5648_v47 = vadd.f32 %v5647_v18, %v5646_v14 }
 0x46a   : > { %v5649_v41 = vpop.f32.mrf.mxu1 }
 0x46c   : > { %v5650_v60 = vpop.f32.mrf.mxu1 }
 0x46d   : > { %v5651_v19 = vadd.f32 %v5650_v60, %v5649_v41 }
 0x46e   : > { %v5652_v53 = vpop.f32.mrf.mxu1 }
 0x46f   : > { %v2176_v33 = vpack.c.bf16 %v5651_v19, %v5648_v47 }
 0x470   : > { %v5653_v51 = vpop.f32.mrf.mxu1 }
 0x471   : > { %5991 = vmatmul.mubr.msk.bf16.vlgmr.msra.gmra.mxu0 %vm1056_vm5, %v2176_v33  ;;  %v5654_v29 = vadd.f32 %v5653_v51, %v5652_v53 }
 0x472   : > { %5999 = vmatpush3.bf16.msra.mxu0 %v6491_v46  ;;  %v5655_v56 = vpop.f32.mrf.mxu1 }
 0x473   : > { %5714 = vmatprep.subr.bf16.mxu0 %v6756_v45 }
 0x474   : > { %v5656_v26 = vpop.f32.mrf.mxu1 }
 0x475   : > { %v5657_v15 = vadd.f32 %v5656_v26, %v5655_v56 }
 0x476   : > { %v5658_v21 = vpop.f32.mrf.mxu1 }
 0x477   : > { %v2177_v62 = vpack.c.bf16 %v5657_v15, %v5654_v29 }
 0x478   : > { %v5659_v28 = vpop.f32.mrf.mxu1 }
 0x479   : > { %5994 = vmatprep.mubr.msk.bf16.mxu0 %vm1056_vm5, %v2177_v62  ;;  %v5660_v35 = vadd.f32 %v5659_v28, %v5658_v21 }
 0x47a   : > { %v5661_v2 = vpop.f32.mrf.mxu1 }
 0x47c   : > { %v5662_v32 = vpop.f32.mrf.mxu1 }
 0x47d   : > { %v5663_v37 = vadd.f32 %v5662_v32, %v5661_v2 }
 0x47e   : > { %v5685_v9 = vpop.f32.mrf.mxu1 }
 0x47f   : > { %v2178_v50 = vpack.c.bf16 %v5663_v37, %v5660_v35 }
 0x480   : > { %v5686_v10 = vpop.f32.mrf.mxu1 }
 0x481   : > { %5995 = vmatmul.mubr.msk.bf16.gmra.mxu0 %vm1056_vm5, %v2178_v50  ;;  %v5687_v45 = vadd.f32 %v5686_v10, %v5685_v9  ;;  %v1206_v9 = vadd.f32 %v7105_v0, %v7101_v11  ;;  %v1190_v0 = vadd.f32 %v7103_v16, %v7099_v36 }
 0x482   : > { %v5688_v46 = vpop.f32.mrf.mxu1 }
 0x483   : > { %v1425_v10 = vadd.f32 %v7109_v6, %v1206_v9  ;;  %v1421_v6 = vadd.f32 %v7107_v1, %v1190_v0 }
 0x484   : > { %v5689_v38 = vpop.f32.mrf.mxu1 }
 0x485   : > { %v5690_v13 = vadd.f32 %v5689_v38, %v5688_v46  ;;  %v1636_v38 = vadd.f32 %v7125_v8, %v1425_v10  ;;  %v1632_v8 = vadd.f32 %v7117_v4, %v1421_v6  ;;  %v6579_v10 = vmov 0.0  }
 0x486   : > { %v5691_v61 = vpop.f32.mrf.mxu1 }
 0x487   : > { %v2386_v14 = vpack.c.bf16 %v5690_v13, %v5687_v45 }
 0x488   : > { %v5692_v17 = vpop.f32.mrf.mxu1 }
 0x489   : > { %6000 = vmatprep.mubr.msk.bf16.mxu0 %vm1056_vm5, %v2386_v14  ;;  %v5693_v60 = vadd.f32 %v5692_v17, %v5691_v61 }
 0x48a   : > { %v5694_v18 = vpop.f32.mrf.mxu1 }
 0x48c   : > { %v5695_v41 = vpop.f32.mrf.mxu1 }
 0x48d   : > { %v5696_v47 = vadd.f32 %v5695_v41, %v5694_v18  ;;  %v1843_v18 = vadd.f32 %v7225_v48, %v1632_v8 }
 0x48e   : > { %v5697_v19 = vpop.f32.mrf.mxu1 }
 0x48f   : > { %v2387_v53 = vpack.c.bf16 %v5696_v47, %v5693_v60 }
 0x490   : > { %v5698_v33 = vpop.f32.mrf.mxu1 }
 0x491   : > { %6001 = vmatmul.mubr.msk.bf16.vlgmr.msra.gmra.mxu0 %vm1056_vm5, %v2387_v53  ;;  %v5699_v56 = vadd.f32 %v5698_v33, %v5697_v19 }
 0x492   : > { %5715 = vmatpush3.bf16.msra.mxu0 %v6754_v43  ;;  %v5700_v51 = vpop.f32.mrf.mxu1 }
 0x493   : > { %5716 = vmatprep.subr.bf16.mxu0 %v6762_v55  ;;  %v6494_v55 = vld [vmem:[%s7858_s2 + $0x204] ss:$8 sps:$4 sm:$0xff]  }
 0x494   : > { %v5701_v26 = vpop.f32.mrf.mxu1 }
 0x495   : > { %v5702_v29 = vadd.f32 %v5701_v26, %v5700_v51 }
 0x496   : > { %5717 = vmatpush3.bf16.msra.mxu0 %v6773_v5  ;;  %v5703_v15 = vpop.f32.mrf.mxu1 }
 0x497   : > { %v2388_v21 = vpack.c.bf16 %v5702_v29, %v5699_v56  ;;  %5718 = vmatprep.subr.bf16.mxu0 %v6778_v12  ;;  %v6492_v12 = vld [vmem:[%s7858_s2 + $0x200] ss:$8 sps:$4 sm:$0xff]  }
 0x498   : > { %v5704_v62 = vpop.f32.mrf.mxu1 }
 0x499   : > { %6004 = vmatprep.mubr.msk.bf16.mxu0 %vm1056_vm5, %v2388_v21  ;;  %v5705_v2 = vadd.f32 %v5704_v62, %v5703_v15 }
 0x49a   : > { %5719 = vmatpush3.bf16.msra.mxu0 %v6787_v7  ;;  %v5706_v28 = vpop.f32.mrf.mxu1  ;;  %v6495_v7 = vld [vmem:[%s7858_s2 + $0x210] ss:$8 sps:$4 sm:$0xff]  }
 0x49b   : > { %5720 = vmatprep.subr.bf16.mxu0 %v6793_v20  ;;  %v6498_v20 = vld [vmem:[%s7858_s2 + $0x220] ss:$8 sps:$4 sm:$0xff]  }
 0x49c   : > { %v5707_v43 = vpop.f32.mrf.mxu1 }
 0x49d   : > { %v5708_v32 = vadd.f32 %v5707_v43, %v5706_v28 }
 0x49e   : > { %5721 = vmatpush3.bf16.msra.mxu0 %v6802_v44  ;;  %v6503_v44 = vld [vmem:[%s7858_s2 + $0x234] ss:$8 sps:$4 sm:$0xff]  }
 0x49f   : > { %v2389_v5 = vpack.c.bf16 %v5708_v32, %v5705_v2  ;;  %5722 = vmatprep.subr.bf16.mxu0 %v6806_v31  ;;  %v6501_v31 = vld [vmem:[%s7858_s2 + $0x230] ss:$8 sps:$4 sm:$0xff]  }
 0x4a1   : > { %6005 = vmatmul.mubr.msk.bf16.gmra.mxu0 %vm1056_vm5, %v2389_v5 }
 0x4a2   : > { %5723 = vmatpush3.bf16.msra.mxu0 %v6715_v49  ;;  %2564 = vmatprep.mubr.bf16.mxu0 %v6494_v55  ;;  %v6497_v49 = vld [vmem:[%s7858_s2 + $0x214] ss:$8 sps:$4 sm:$0xff]  }
 0x4a3   : > { %5724 = vmatprep.subr.bf16.mxu0 %v6816_v42  ;;  %v6504_v42 = vld [vmem:[%s7859_s3 + $0x40] sm:$0xff]  }
 0x4a4   : > { %6008 = vmatprep.subr.bf16.mxu1 %v6504_v42 }
 0x4a5   : > { %6009 = vmatpush3.bf16.msra.mxu1 %v6504_v42 }
 0x4a6   : > { %5725 = vmatpush3.bf16.msra.mxu0 %v6822_v58  ;;  %6018 = vmatprep.subr.bf16.mxu1 %v6579_v10 }
 0x4a7   : > { %5726 = vmatprep.subr.bf16.mxu0 %v6824_v54 }
 0x4aa   : > { %5727 = vmatpush3.bf16.msra.mxu0 %v6708_v39  ;;  %v6500_v39 = vld [vmem:[%s7858_s2 + $0x224] ss:$8 sps:$4 sm:$0xff]  }
 0x4ab   : > { %5728 = vmatprep.subr.bf16.mxu0 %v6828_v3 }
 0x4ae   : > { %5729 = vmatpush3.bf16.msra.mxu0 %v6832_v52 }
 0x4af   : > { %6030 = vmatprep.subr.bf16.mxu0 %v6579_v10 }
 0x4b1   : > { %2565 = vmatmul.mubr.bf16.vlgmr.msra.gmra.mxu0 %v6492_v12 }
 0x4b2   : > { %2572 = vmatprep.mubr.bf16.mxu0 %v6497_v49 }
 0x4b9   : > { %2573 = vmatmul.mubr.bf16.gmra.mxu0 %v6495_v7 }
 0x4ba   : > { %2580 = vmatprep.mubr.bf16.mxu0 %v6500_v39 }
 0x4c1   : > { %2581 = vmatmul.mubr.bf16.gmra.mxu0 %v6498_v20 }
 0x4c2   : > { %2588 = vmatprep.mubr.bf16.mxu0 %v6503_v44 }
 0x4c9   : > { %2589 = vmatmul.mubr.bf16.gmra.mxu0 %v6501_v31 }
 0x4ca   : > { %6038 = vmatprep.mubr.msk.bf16.mxu0 %vm6580_vm6, %v6579_v10 }
 0x531   : > { %v5992_v58 = vpop.f32.mrf.mxu0 }
 0x532   : > { %v2266_v54 = vadd.f32 %v5992_v58, %v7232_v22  ;;  %v1847_v22 = vadd.f32 %v7230_v25, %v1636_v38  ;;  %v7341_v38 = vld [vmem:[%s7865_s9] sm:$0xff] }
 0x533   : > { %v2233_v3 = vpop.f32.mrf.mxu0 }
 0x534   : > { %v2264_v52 = vadd.f32 %v2233_v3, %v7234_v63  ;;  %v2058_v14 = vadd.f32 %v7246_v57, %v1847_v22 }
 0x535   : > { %v5993_v35 = vpop.f32.mrf.mxu0 }
 0x536   : > { %v2267_v37 = vadd.f32 %v5993_v35, %v7236_v27 }
 0x537   : > { %v2236_v50 = vpop.f32.mrf.mxu0 }
 0x541   : > { %v5996_v46 = vpop.f32.mrf.mxu0 }
 0x542   : > { %v2270_v45 = vadd.f32 %v5996_v46, %v7240_v59  ;;  %v2696_v46 = vsub.s32 1, %v6691_v23 }
 0x543   : > { %v2249_v13 = vpop.f32.mrf.mxu0 }
 0x544   : > { %v2268_v61 = vadd.f32 %v2249_v13, %v7242_v34  ;;  %v2054_v34 = vadd.f32 %v7238_v30, %v1843_v18 }
 0x545   : > { %v5997_v63 = vpop.f32.mrf.mxu0 }
 0x546   : > { %v2271_v27 = vadd.f32 %v5997_v63, %v7244_v40  ;;  %v2265_v47 = vadd.f32 %v2236_v50, %v2054_v34 }
 0x547   : > { %v2252_v17 = vpop.f32.mrf.mxu0 }
 0x548   : > { %v2269_v11 = vadd.f32 %v2252_v17, %v2058_v14 }
 0x551   : > { %v6002_v59 = vpop.f32.mrf.mxu0 }
 0x552   : > { %v2477_v25 = vadd.f32 %v6002_v59, %v2266_v54  ;;  %v2744_v59 = vsub.s32 3, %v6691_v23 }
 0x553   : > { %v2444_v41 = vpop.f32.mrf.mxu0 }
 0x554   : > { %v2475_v60 = vadd.f32 %v2444_v41, %v2264_v52 }
 0x555   : > { %v6003_v57 = vpop.f32.mrf.mxu0 }
 0x556   : > { %v2478_v40 = vadd.f32 %v6003_v57, %v2267_v37 }
 0x557   : > { %v2447_v19 = vpop.f32.mrf.mxu0 }
 0x558   : > { %v7317_v53 = vadd.f32 %v2447_v19, %v2265_v47 }
 0x561   : > { %v6006_v33 = vpop.f32.mrf.mxu0 }
 0x562   : > { %v7319_v36 = vadd.f32 %v6006_v33, %v2270_v45  ;;  %v2697_v45 = vrot.slane %v7341_v38, %v2696_v46 }
 0x563   : > { %v2460_v16 = vpop.f32.mrf.mxu0 }
 0x564   : > { %v7321_v1 = vadd.f32 %v2460_v16, %v2268_v61  ;;  %v2732_v61 = vsub.s32 2, %v6691_v23 }
 0x565   : > { %v6007_v4 = vpop.f32.mrf.mxu0 }
 0x566   : > { %v7323_v51 = vadd.f32 %v6007_v4, %v2271_v27  ;;  %v2733_v8 = vrot.slane %v7341_v38, %v2732_v61 }
 0x567   : > { %v2463_v48 = vpop.f32.mrf.mxu0 }
 0x568   : > { %v7325_v56 = vadd.f32 %v2463_v48, %v2269_v11 }
 0x571   : > { %v5730_v30 = vpop.f32.mrf.mxu0 }
 0x573   : > { %v5731_v26 = vpop.f32.mrf.mxu0 }
 0x574   : > { %v5732_v21 = vadd.f32 %v5731_v26, %v5730_v30 }
 0x575   : > { %v5733_v29 = vpop.f32.mrf.mxu0 }
 0x577   : > { %v5734_v15 = vpop.f32.mrf.mxu0 }
 0x578   : > { %v5735_v62 = vadd.f32 %v5734_v15, %v5733_v29 }
 0x579   : > { %v5736_v28 = vpop.f32.mrf.mxu0 }
 0x57a   : > { %v2597_v2 = vpack.c.bf16 %v5735_v62, %v5732_v21 }
 0x57b   : > { %v5737_v43 = vpop.f32.mrf.mxu0 }
 0x57c   : > { %6010 = vmatprep.mubr.msk.bf16.mxu1 %vm1056_vm5, %v2597_v2  ;;  %v5738_v5 = vadd.f32 %v5737_v43, %v5736_v28 }
 0x57d   : > { %v5739_v32 = vpop.f32.mrf.mxu0 }
 0x57f   : > { %v5740_v55 = vpop.f32.mrf.mxu0 }
 0x580   : > { %v5741_v12 = vadd.f32 %v5740_v55, %v5739_v32 }
 0x581   : > { %v5742_v49 = vpop.f32.mrf.mxu0 }
 0x582   : > { %v2598_v7 = vpack.c.bf16 %v5741_v12, %v5738_v5 }
 0x583   : > { %v5743_v39 = vpop.f32.mrf.mxu0 }
 0x584   : > { %6011 = vmatmul.mubr.msk.bf16.vlgmr.msra.gmra.mxu1 %vm1056_vm5, %v2598_v7  ;;  %v5744_v31 = vadd.f32 %v5743_v39, %v5742_v49 }
 0x585   : > { %v5745_v20 = vpop.f32.mrf.mxu0 }
 0x587   : > { %v5746_v44 = vpop.f32.mrf.mxu0 }
 0x588   : > { %v5747_v42 = vadd.f32 %v5746_v44, %v5745_v20 }
 0x589   : > { %v5748_v58 = vpop.f32.mrf.mxu0 }
 0x58a   : > { %v2599_v54 = vpack.c.bf16 %v5747_v42, %v5744_v31 }
 0x58b   : > { %v5749_v3 = vpop.f32.mrf.mxu0 }
 0x58c   : > { %6014 = vmatprep.mubr.msk.bf16.mxu1 %vm1056_vm5, %v2599_v54  ;;  %v5750_v37 = vadd.f32 %v5749_v3, %v5748_v58 }
 0x58d   : > { %v5751_v52 = vpop.f32.mrf.mxu0 }
 0x58f   : > { %v5752_v35 = vpop.f32.mrf.mxu0 }
 0x590   : > { %v5753_v9 = vadd.f32 %v5752_v35, %v5751_v52 }
 0x592   : > { %v2600_v50 = vpack.c.bf16 %v5753_v9, %v5750_v37 }
 0x594   : > { %6015 = vmatmul.mubr.msk.bf16.gmra.mxu1 %vm1056_vm5, %v2600_v50 }
 0x595   : > { %6026 = vmatprep.mubr.msk.bf16.mxu1 %vm6580_vm6, %v6579_v10 }
 0x644   : > { %v6012_v13 = vpop.f32.mrf.mxu1 }
 0x645   : > { %v2688_v22 = vadd.f32 %v6012_v13, %v2477_v25 }
 0x646   : > { %v2655_v63 = vpop.f32.mrf.mxu1 }
 0x647   : > { %v2700_v14 = vadd.f32 %v2697_v45, %v2688_v22  ;;  %v2686_v27 = vadd.f32 %v2655_v63, %v2475_v60  ;;  %v2745_v60 = vrot.slane %v7341_v38, %v2744_v59 }
 0x648   : > { %v6013_v17 = vpop.f32.mrf.mxu1 }
 0x649   : > { %vm2708_vm7 = vcmp.gt.f32.partialorder %v2700_v14, 0.0  ;;  %v2716_v11 = vmul.f32 0.2, %v2700_v14  ;;  %v2698_v0 = vadd.f32 %v2697_v45, %v2686_v27  ;;  %v2689_v6 = vadd.f32 %v6013_v17, %v2478_v40  ;;  %v6506_v17 = vld [vmem:[%s7860_s4] sm:$0xff]  }
 0x64a   : > { %v2658_v18 = vpop.f32.mrf.mxu1 }
 0x64b   : > { %v2724_v41 = vsel %vm2708_vm7, %v2700_v14, %v2716_v11  ;;  %vm2706_vm8 = vcmp.gt.f32.partialorder %v2698_v0, 0.0  ;;  %v2714_v34 = vmul.f32 0.2, %v2698_v0  ;;  %v2701_v57 = vadd.f32 %v2697_v45, %v2689_v6  ;;  %v6508_v11 = vld [vmem:[%s7861_s5 + $0x18] sm:$0xff]   ;;  %v6509_v6 = vld [vmem:[%s7861_s5 + $0x10] sm:$0xff]  }
 0x64c   : > { %v2687_v25 = vadd.f32 %v2658_v18, %v7317_v53  ;;  %v2736_v19 = vmul.f32 %v2733_v8, %v2724_v41 }
 0x64d   : > { %vm2709_vm9 = vcmp.gt.f32.partialorder %v2701_v57, 0.0  ;;  %v2717_v47 = vmul.f32 0.2, %v2701_v57  ;;  %v2722_v33 = vsel %vm2706_vm8, %v2698_v0, %v2714_v34  ;;  %v6507_v0 = vld [vmem:[%s7860_s4 + $0x10] sm:$0xff]  }
 0x64e   : > { %v2699_v16 = vadd.f32 %v2697_v45, %v2687_v25  ;;  %v2734_v30 = vmul.f32 %v2733_v8, %v2722_v33  ;;  %v2748_v26 = vadd.f32 %v2745_v60, %v2736_v19  ;;  %v6511_v33 = vld [vmem:[%s7861_s5] sm:$0xff]  }
 0x64f   : > { %v2725_v4 = vsel %vm2709_vm9, %v2701_v57, %v2717_v47  ;;  %v6510_v57 = vld [vmem:[%s7861_s5 + $0x8] sm:$0xff]  }
 0x650   : > { %v2737_v40 = vmul.f32 %v2733_v8, %v2725_v4  ;;  %vm2707_vm10 = vcmp.gt.f32.partialorder %v2699_v16, 0.0  ;;  %v2715_v48 = vmul.f32 0.2, %v2699_v16  ;;  %v2746_v53 = vadd.f32 %v2745_v60, %v2734_v30 }
 0x652   : > { %v2749_v29 = vadd.f32 %v2745_v60, %v2737_v40  ;;  %v2723_v15 = vsel %vm2707_vm10, %v2699_v16, %v2715_v48  ;;  %v6512_v16 = vld [vmem:[%s7861_s5 + $0x28] sm:$0xff]   ;;  %v6513_v48 = vld [vmem:[%s7861_s5 + $0x20] sm:$0xff]  }
 0x653   : > { %v2735_v21 = vmul.f32 %v2733_v8, %v2723_v15 }
 0x654   : > { %v7351_v62 = vpack.c.bf16 %v2749_v29, %v2748_v26  ;;  %v6016_v28 = vpop.f32.mrf.mxu1 }
 0x655   : > { %v2747_v2 = vadd.f32 %v2745_v60, %v2735_v21  ;;  %v2692_v43 = vadd.f32 %v6016_v28, %v7319_v36  ;;  %v6514_v21 = vld [vmem:[%s7860_s4 + $0x18] sm:$0xff]  }
 0x656   : > { %v2671_v32 = vpop.f32.mrf.mxu1  ;;  %v6515_v28 = vld [vmem:[%s7861_s5 + $0x38] sm:$0xff]  }
 0x657   : > { %v7354_v55 = vpack.c.bf16 %v2747_v2, %v2746_v53  ;;  %v2704_v5 = vadd.f32 %v2697_v45, %v2692_v43  ;;  %v2690_v12 = vadd.f32 %v2671_v32, %v7321_v1  ;;  %v6516_v53 = vld [vmem:[%s7861_s5 + $0x30] sm:$0xff]  }
 0x658   : > { %v6017_v49 = vpop.f32.mrf.mxu1 }
 0x659   : > { %vm2712_vm11 = vcmp.gt.f32.partialorder %v2704_v5, 0.0  ;;  %v2720_v7 = vmul.f32 0.2, %v2704_v5  ;;  %v2702_v39 = vadd.f32 %v2697_v45, %v2690_v12  ;;  %v2693_v20 = vadd.f32 %v6017_v49, %v7323_v51 }
 0x65a   : > { %v2674_v44 = vpop.f32.mrf.mxu1 }
 0x65b   : > { %v2728_v31 = vsel %vm2712_vm11, %v2704_v5, %v2720_v7  ;;  %vm2710_vm12 = vcmp.gt.f32.partialorder %v2702_v39, 0.0  ;;  %v2718_v42 = vmul.f32 0.2, %v2702_v39  ;;  %v2705_v58 = vadd.f32 %v2697_v45, %v2693_v20 }
 0x65c   : > { %v2691_v54 = vadd.f32 %v2674_v44, %v7325_v56  ;;  %v2740_v3 = vmul.f32 %v2733_v8, %v2728_v31 }
 0x65d   : > { %vm2713_vm13 = vcmp.gt.f32.partialorder %v2705_v58, 0.0  ;;  %v2721_v36 = vmul.f32 0.2, %v2705_v58  ;;  %v2726_v52 = vsel %vm2710_vm12, %v2702_v39, %v2718_v42 }
 0x65e   : > { %v2703_v35 = vadd.f32 %v2697_v45, %v2691_v54  ;;  %v2738_v50 = vmul.f32 %v2733_v8, %v2726_v52  ;;  %v2752_v13 = vadd.f32 %v2745_v60, %v2740_v3  ;;  %v6505_v45 = vld [vmem:[%s7860_s4 + $0x8] sm:$0xff]  }
 0x65f   : > { %v2729_v37 = vsel %vm2713_vm13, %v2705_v58, %v2721_v36 }
 0x660   : > { %v2741_v1 = vmul.f32 %v2733_v8, %v2729_v37  ;;  %vm2711_vm14 = vcmp.gt.f32.partialorder %v2703_v35, 0.0  ;;  %v2719_v9 = vmul.f32 0.2, %v2703_v35  ;;  %v2750_v14 = vadd.f32 %v2745_v60, %v2738_v50  ;;  %v6517_v50 = vld [vmem:[%s7860_s4 + $0x20] sm:$0xff]  }
 0x662   : > { %v2753_v22 = vadd.f32 %v2745_v60, %v2741_v1  ;;  %v2727_v51 = vsel %vm2711_vm14, %v2703_v35, %v2719_v9 }
 0x663   : > { %v2739_v61 = vmul.f32 %v2733_v8, %v2727_v51 }
 0x664   : > { %v7359_v63 = vpack.c.bf16 %v2753_v22, %v2752_v13  ;;  %v6518_v13 = vld [vmem:[%s7861_s5 + $0x48] sm:$0xff]   ;;  %v6519_v22 = vld [vmem:[%s7861_s5 + $0x40] sm:$0xff]  }
 0x665   : > { %v2751_v27 = vadd.f32 %v2745_v60, %v2739_v61 }
 0x666   : > { %6019 = vmatpush3.bf16.msra.mxu1 %v7359_v63  ;;  %6031 = vmatpush3.bf16.msra.mxu0 %v7359_v63 }
 0x667   : > { %v7363_v56 = vpack.c.bf16 %v2751_v27, %v2750_v14  ;;  %6020 = vmatprep.subr.bf16.mxu1 %v6579_v10  ;;  %6032 = vmatprep.subr.bf16.mxu0 %v6579_v10 }
 0x66a   : > { %6021 = vmatpush3.bf16.msra.mxu1 %v7363_v56  ;;  %6033 = vmatpush3.bf16.msra.mxu0 %v7363_v56 }
 0x66b   : > { %6022 = vmatprep.subr.bf16.mxu1 %v6579_v10  ;;  %6034 = vmatprep.subr.bf16.mxu0 %v6579_v10 }
 0x66e   : > { %6023 = vmatpush3.bf16.msra.mxu1 %v7351_v62  ;;  %6035 = vmatpush3.bf16.msra.mxu0 %v7351_v62 }
 0x66f   : > { %6024 = vmatprep.subr.bf16.mxu1 %v6579_v10  ;;  %6036 = vmatprep.subr.bf16.mxu0 %v6579_v10 }
 0x672   : > { %6025 = vmatpush3.bf16.msra.mxu1 %v7354_v55  ;;  %6037 = vmatpush3.bf16.msra.mxu0 %v7354_v55 }
 0x673   : > { %6058 = vmatprep.subr.bf16.mxu1 %v6579_v10  ;;  %6042 = vmatprep.subr.bf16.mxu0 %v6579_v10 }
 0x675   : > { %6039 = vmatmul.mubr.msk.bf16.vlgmr.msra.gmra.mxu0 %vm2765_vm15, %v6505_v45  ;;  %6027 = vmatmul.mubr.msk.bf16.vlgmr.msra.gmra.mxu1 %vm2765_vm15, %v6506_v17 }
 0x676   : > { %6059 = vmatpush3.bf16.msra.mxu1 %v7359_v63  ;;  %6066 = vmatprep.mubr.msk.bf16.mxu1 %vm6580_vm6, %v6579_v10 }
 0x677   : > { %6060 = vmatprep.subr.bf16.mxu1 %v6579_v10  ;;  %6043 = vmatpush3.bf16.msra.mxu0 %v6508_v11 }
 0x678   : > { %6044 = vmatprep.subr.bf16.mxu0 %v6579_v10  ;;  %6046 = vmatprep.mubr.msk.bf16.mxu0 %vm6580_vm6, %v6579_v10 }
 0x67a   : > { %6061 = vmatpush3.bf16.msra.mxu1 %v7363_v56 }
 0x67b   : > { %6062 = vmatprep.subr.bf16.mxu1 %v6579_v10  ;;  %6045 = vmatpush3.bf16.msra.mxu0 %v6509_v6 }
 0x67c   : > { %6050 = vmatprep.subr.bf16.mxu0 %v6579_v10 }
 0x67e   : > { %6063 = vmatpush3.bf16.msra.mxu1 %v7351_v62 }
 0x67f   : > { %6064 = vmatprep.subr.bf16.mxu1 %v6579_v10 }
 0x682   : > { %6065 = vmatpush3.bf16.msra.mxu1 %v7354_v55 }
 0x683   : > { %6090 = vmatprep.subr.bf16.mxu1 %v6579_v10 }
 0x685   : > { %6067 = vmatmul.mubr.msk.bf16.vlgmr.msra.gmra.mxu1 %vm2765_vm15, %v6507_v0 }
 0x686   : > { %6094 = vmatprep.mubr.msk.bf16.mxu1 %vm6580_vm6, %v6579_v10  ;;  %6091 = vmatpush3.bf16.msra.mxu1 %v6515_v28 }
 0x687   : > { %6092 = vmatprep.subr.bf16.mxu1 %v6579_v10 }
 0x68a   : > { %6093 = vmatpush3.bf16.msra.mxu1 %v6516_v53 }
 0x68b   : > { %6098 = vmatprep.subr.bf16.mxu1 %v6579_v10 }
 0x735   : > { %v2860_v8 = vpop.f32.mrf.mxu0  ;;  %v2803_v59 = vpop.f32.mrf.mxu1 }
 0x737   : > { %v6040_v18 = vpop.f32.mrf.mxu0  ;;  %v6028_v41 = vpop.f32.mrf.mxu1 }
 0x738   : > { %v6520_v18 = vld [vmem:[%s7860_s4 + $0x28] sm:$0xff]   ;;  %v6521_v41 = vld [vmem:[%s7861_s5 + $0x58] sm:$0xff]  }
 0x739   : > { %v2863_v34 = vpop.f32.mrf.mxu0  ;;  %v2806_v25 = vpop.f32.mrf.mxu1 }
 0x73a   : > { %v2867_v47 = vpack.c.bf16 %v2863_v34, %v2860_v8  ;;  %v2810_v4 = vpack.c.bf16 %v2806_v25, %v2803_v59  ;;  %v6522_v34 = vld [vmem:[%s7861_s5 + $0x50] sm:$0xff]  }
 0x73b   : > { %v6041_v19 = vpop.f32.mrf.mxu0  ;;  %v6029_v60 = vpop.f32.mrf.mxu1 }
 0x73c   : > { %6047 = vmatmul.mubr.msk.bf16.vlgmr.msra.gmra.mxu0 %vm2884_vm1, %v2867_v47 }
 0x73d   : > { %6051 = vmatpush3.bf16.msra.mxu0 %v6510_v57  ;;  %6054 = vmatprep.mubr.msk.bf16.mxu0 %vm6580_vm6, %v6579_v10 }
 0x73e   : > { %6052 = vmatprep.subr.bf16.mxu0 %v6579_v10 }
 0x741   : > { %6053 = vmatpush3.bf16.msra.mxu0 %v6511_v33 }
 0x742   : > { %6070 = vmatprep.subr.bf16.mxu0 %v6579_v10 }
 0x744   : > { %6055 = vmatmul.mubr.msk.bf16.vlgmr.msra.gmra.mxu0 %vm2884_vm1, %v2810_v4 }
 0x745   : > { %6071 = vmatpush3.bf16.msra.mxu0 %v6512_v16  ;;  %v3030_v40 = vpop.f32.mrf.mxu1  ;;  %6074 = vmatprep.mubr.msk.bf16.mxu0 %vm6580_vm6, %v6579_v10 }
 0x746   : > { %6072 = vmatprep.subr.bf16.mxu0 %v6579_v10 }
 0x747   : > { %v6068_v30 = vpop.f32.mrf.mxu1 }
 0x749   : > { %6073 = vmatpush3.bf16.msra.mxu0 %v6513_v48  ;;  %v3033_v26 = vpop.f32.mrf.mxu1 }
 0x74a   : > { %v3037_v29 = vpack.c.bf16 %v3033_v26, %v3030_v40  ;;  %6078 = vmatprep.subr.bf16.mxu0 %v6579_v10  ;;  %v6523_v26 = vld [vmem:[%s7860_s4 + $0x30] sm:$0xff]  }
 0x74b   : > { %v6069_v15 = vpop.f32.mrf.mxu1 }
 0x74c   : > { %6075 = vmatmul.mubr.msk.bf16.vlgmr.msra.gmra.mxu0 %vm2884_vm1, %v3037_v29  ;;  %v6524_v29 = vld [vmem:[%s7861_s5 + $0x68] sm:$0xff]   ;;  %v6525_v15 = vld [vmem:[%s7861_s5 + $0x60] sm:$0xff]  }
 0x74d   : > { %6079 = vmatpush3.bf16.msra.mxu0 %v7359_v63  ;;  %6086 = vmatprep.mubr.msk.bf16.mxu0 %vm6580_vm6, %v6579_v10 }
 0x74e   : > { %6080 = vmatprep.subr.bf16.mxu0 %v6579_v10 }
 0x751   : > { %6081 = vmatpush3.bf16.msra.mxu0 %v7363_v56 }
 0x752   : > { %6082 = vmatprep.subr.bf16.mxu0 %v6579_v10 }
 0x755   : > { %6083 = vmatpush3.bf16.msra.mxu0 %v7351_v62 }
 0x756   : > { %6084 = vmatprep.subr.bf16.mxu0 %v6579_v10 }
 0x759   : > { %6085 = vmatpush3.bf16.msra.mxu0 %v7354_v55 }
 0x75a   : > { %6110 = vmatprep.subr.bf16.mxu0 %v6579_v10 }
 0x75c   : > { %6087 = vmatmul.mubr.msk.bf16.vlgmr.msra.gmra.mxu0 %vm2765_vm15, %v6514_v21 }
 0x75d   : > { %6114 = vmatprep.mubr.msk.bf16.mxu0 %vm6580_vm6, %v6579_v10  ;;  %6111 = vmatpush3.bf16.msra.mxu0 %v6518_v13  ;;  %v6529_v13 = vld [vmem:[%s7860_s4 + $0x40] sm:$0xff]  }
 0x75e   : > { %6112 = vmatprep.subr.bf16.mxu0 %v6579_v10 }
 0x761   : > { %6113 = vmatpush3.bf16.msra.mxu0 %v6519_v22 }
 0x762   : > { %6118 = vmatprep.subr.bf16.mxu0 %v6579_v10 }
 0x7fc   : > { %v2922_v2 = vpop.f32.mrf.mxu0 }
 0x7fe   : > { %v6048_v43 = vpop.f32.mrf.mxu0 }
 0x800   : > { %v2925_v32 = vpop.f32.mrf.mxu0 }
 0x802   : > { %v6049_v5 = vpop.f32.mrf.mxu0 }
 0x804   : > { %v2978_v12 = vpop.f32.mrf.mxu0 }
 0x805   : > { %v2979_v49 = vadd.f32 %v2978_v12, %v2922_v2 }
 0x806   : > { %v6056_v7 = vpop.f32.mrf.mxu0 }
 0x808   : > { %v2981_v39 = vpop.f32.mrf.mxu0 }
 0x809   : > { %v2982_v20 = vadd.f32 %v2981_v39, %v2925_v32 }
 0x80a   : > { %v6057_v44 = vpop.f32.mrf.mxu0 }
 0x80b   : > { %v6527_v44 = vld [vmem:[%s7861_s5 + $0x78] sm:$0xff]  }
 0x80c   : > { %v3091_v31 = vpop.f32.mrf.mxu0 }
 0x80d   : > { %v3098_v42 = vadd.f32 %v3091_v31, %v2979_v49  ;;  %v6528_v31 = vld [vmem:[%s7861_s5 + $0x70] sm:$0xff]  }
 0x80e   : > { %v6076_v58 = vpop.f32.mrf.mxu0 }
 0x810   : > { %v3094_v54 = vpop.f32.mrf.mxu0 }
 0x811   : > { %v3099_v36 = vadd.f32 %v3094_v54, %v2982_v20  ;;  %v6526_v20 = vld [vmem:[%s7860_s4 + $0x38] sm:$0xff]  }
 0x812   : > { %v6077_v3 = vpop.f32.mrf.mxu0 }
 0x81c   : > { %v3145_v52 = vpop.f32.mrf.mxu0 }
 0x81e   : > { %v6088_v35 = vpop.f32.mrf.mxu0 }
 0x820   : > { %v3148_v37 = vpop.f32.mrf.mxu0 }
 0x821   : > { %v3152_v1 = vpack.c.bf16 %v3148_v37, %v3145_v52 }
 0x822   : > { %v6089_v9 = vpop.f32.mrf.mxu0 }
 0x823   : > { %6095 = vmatmul.mubr.msk.bf16.vlgmr.msra.gmra.mxu1 %vm2884_vm1, %v3152_v1 }
 0x824   : > { %6099 = vmatpush3.bf16.msra.mxu1 %v7359_v63  ;;  %6106 = vmatprep.mubr.msk.bf16.mxu1 %vm6580_vm6, %v6579_v10 }
 0x825   : > { %6100 = vmatprep.subr.bf16.mxu1 %v6579_v10 }
 0x828   : > { %6101 = vmatpush3.bf16.msra.mxu1 %v7363_v56 }
 0x829   : > { %6102 = vmatprep.subr.bf16.mxu1 %v6579_v10 }
 0x82c   : > { %6103 = vmatpush3.bf16.msra.mxu1 %v7351_v62 }
 0x82d   : > { %6104 = vmatprep.subr.bf16.mxu1 %v6579_v10 }
 0x830   : > { %6105 = vmatpush3.bf16.msra.mxu1 %v7354_v55 }
 0x831   : > { %6130 = vmatprep.subr.bf16.mxu1 %v6579_v10 }
 0x833   : > { %6107 = vmatmul.mubr.msk.bf16.vlgmr.msra.gmra.mxu1 %vm2765_vm15, %v6517_v50 }
 0x834   : > { %6134 = vmatprep.mubr.msk.bf16.mxu1 %vm6580_vm6, %v6579_v10  ;;  %6131 = vmatpush3.bf16.msra.mxu1 %v6521_v41  ;;  %v3804_v41 = vsub.s32 5, %v6691_v23 }
 0x835   : > { %6132 = vmatprep.subr.bf16.mxu1 %v6579_v10 }
 0x838   : > { %6133 = vmatpush3.bf16.msra.mxu1 %v6522_v34 }
 0x839   : > { %6138 = vmatprep.subr.bf16.mxu1 %v6579_v10 }
 0x8e3   : > { %v3206_v51 = vpop.f32.mrf.mxu1 }
 0x8e4   : > { %v3213_v61 = vadd.f32 %v3206_v51, %v3098_v42 }
 0x8e5   : > { %v6096_v14 = vpop.f32.mrf.mxu1 }
 0x8e7   : > { %v3209_v27 = vpop.f32.mrf.mxu1 }
 0x8e8   : > { %v3214_v45 = vadd.f32 %v3209_v27, %v3099_v36 }
 0x8e9   : > { %v6097_v17 = vpop.f32.mrf.mxu1 }
 0x8f3   : > { %v3260_v11 = vpop.f32.mrf.mxu1 }
 0x8f5   : > { %v6108_v0 = vpop.f32.mrf.mxu1 }
 0x8f7   : > { %v3263_v6 = vpop.f32.mrf.mxu1 }
 0x8f8   : > { %v3267_v8 = vpack.c.bf16 %v3263_v6, %v3260_v11  ;;  %v3792_v6 = vsub.s32 4, %v6691_v23 }
 0x8f9   : > { %v6109_v59 = vpop.f32.mrf.mxu1 }
 0x8fa   : > { %6115 = vmatmul.mubr.msk.bf16.vlgmr.msra.gmra.mxu0 %vm2884_vm1, %v3267_v8  ;;  %v3793_v8 = vrot.slane %v7341_v38, %v3792_v6 }
 0x8fb   : > { %6119 = vmatpush3.bf16.msra.mxu0 %v7359_v63  ;;  %6126 = vmatprep.mubr.msk.bf16.mxu0 %vm6580_vm6, %v6579_v10 }
 0x8fc   : > { %6120 = vmatprep.subr.bf16.mxu0 %v6579_v10 }
 0x8ff   : > { %6121 = vmatpush3.bf16.msra.mxu0 %v7363_v56 }
 0x900   : > { %6122 = vmatprep.subr.bf16.mxu0 %v6579_v10 }
 0x903   : > { %6123 = vmatpush3.bf16.msra.mxu0 %v7351_v62 }
 0x904   : > { %6124 = vmatprep.subr.bf16.mxu0 %v6579_v10 }
 0x907   : > { %6125 = vmatpush3.bf16.msra.mxu0 %v7354_v55 }
 0x908   : > { %6150 = vmatprep.subr.bf16.mxu0 %v6579_v10 }
 0x90a   : > { %6127 = vmatmul.mubr.msk.bf16.vlgmr.msra.gmra.mxu0 %vm2765_vm15, %v6520_v18 }
 0x90b   : > { %6154 = vmatprep.mubr.msk.bf16.mxu0 %vm6580_vm6, %v6579_v10  ;;  %6151 = vmatpush3.bf16.msra.mxu0 %v6524_v29 }
 0x90c   : > { %6152 = vmatprep.subr.bf16.mxu0 %v6579_v10 }
 0x90f   : > { %6153 = vmatpush3.bf16.msra.mxu0 %v6525_v15 }
 0x910   : > { %6158 = vmatprep.subr.bf16.mxu0 %v6579_v10 }
 0x9ba   : > { %v3321_v57 = vpop.f32.mrf.mxu0 }
 0x9bb   : > { %v3328_v25 = vadd.f32 %v3321_v57, %v3213_v61 }
 0x9bc   : > { %v6116_v47 = vpop.f32.mrf.mxu0 }
 0x9be   : > { %v3324_v19 = vpop.f32.mrf.mxu0 }
 0x9bf   : > { %v3329_v60 = vadd.f32 %v3324_v19, %v3214_v45 }
 0x9c0   : > { %v6117_v33 = vpop.f32.mrf.mxu0 }
 0x9c1   : > { %v3810_v33 = vsub.s32 6, %v6691_v23 }
 0x9ca   : > { %v3375_v16 = vpop.f32.mrf.mxu0 }
 0x9cc   : > { %v6128_v4 = vpop.f32.mrf.mxu0 }
 0x9ce   : > { %v3378_v40 = vpop.f32.mrf.mxu0 }
 0x9cf   : > { %v3382_v48 = vpack.c.bf16 %v3378_v40, %v3375_v16 }
 0x9d0   : > { %v6129_v30 = vpop.f32.mrf.mxu0 }
 0x9d1   : > { %6135 = vmatmul.mubr.msk.bf16.vlgmr.msra.gmra.mxu1 %vm2884_vm1, %v3382_v48 }
 0x9d2   : > { %6139 = vmatpush3.bf16.msra.mxu1 %v7359_v63  ;;  %6146 = vmatprep.mubr.msk.bf16.mxu1 %vm6580_vm6, %v6579_v10 }
 0x9d3   : > { %6140 = vmatprep.subr.bf16.mxu1 %v6579_v10 }
 0x9d6   : > { %6141 = vmatpush3.bf16.msra.mxu1 %v7363_v56 }
 0x9d7   : > { %6142 = vmatprep.subr.bf16.mxu1 %v6579_v10 }
 0x9da   : > { %6143 = vmatpush3.bf16.msra.mxu1 %v7351_v62 }
 0x9db   : > { %6144 = vmatprep.subr.bf16.mxu1 %v6579_v10 }
 0x9de   : > { %6145 = vmatpush3.bf16.msra.mxu1 %v7354_v55 }
 0x9df   : > { %6170 = vmatprep.subr.bf16.mxu1 %v6579_v10 }
 0x9e1   : > { %6147 = vmatmul.mubr.msk.bf16.vlgmr.msra.gmra.mxu1 %vm2765_vm15, %v6523_v26  ;;  %v3811_v26 = vrot.slane %v7341_v38, %v3810_v33 }
 0x9e2   : > { %6174 = vmatprep.mubr.msk.bf16.mxu1 %vm6580_vm6, %v6579_v10  ;;  %6171 = vmatpush3.bf16.msra.mxu1 %v6527_v44 }
 0x9e3   : > { %6172 = vmatprep.subr.bf16.mxu1 %v6579_v10 }
 0x9e6   : > { %6173 = vmatpush3.bf16.msra.mxu1 %v6528_v31 }
 0x9e7   : > { %6178 = vmatprep.subr.bf16.mxu1 %v6579_v10 }
 0xa91   : > { %v3436_v21 = vpop.f32.mrf.mxu1 }
 0xa92   : > { %v3443_v28 = vadd.f32 %v3436_v21, %v3328_v25 }
 0xa93   : > { %v6136_v53 = vpop.f32.mrf.mxu1 }
 0xa95   : > { %v3439_v2 = vpop.f32.mrf.mxu1 }
 0xa96   : > { %v3444_v43 = vadd.f32 %v3439_v2, %v3329_v60  ;;  %v3805_v60 = vrot.slane %v7341_v38, %v3804_v41  ;;  %v5273_v2 = vld [vmem:[%s7862_s6 + $0x2] sm:$0x3]  ;;  %v6532_v38 = vld [vmem:[%s7863_s7 + $0x38] sm:$0xff]  }
 0xa97   : > { %v6137_v32 = vpop.f32.mrf.mxu1 }
 0xa98   : > { %v6533_v32 = vld [vmem:[%s7863_s7 + $0x30] sm:$0xff]  }
 0xaa1   : > { %v3490_v5 = vpop.f32.mrf.mxu1 }
 0xaa3   : > { %v6148_v12 = vpop.f32.mrf.mxu1 }
 0xaa4   : > { %v6535_v12 = vld [vmem:[%s7863_s7 + $0x20] sm:$0xff]  }
 0xaa5   : > { %v3493_v49 = vpop.f32.mrf.mxu1 }
 0xaa6   : > { %v3497_v7 = vpack.c.bf16 %v3493_v49, %v3490_v5  ;;  %v6534_v5 = vld [vmem:[%s7863_s7 + $0x28] sm:$0xff]   ;;  %v6536_v49 = vld [vmem:[%s7863_s7 + $0x18] sm:$0xff]  }
 0xaa7   : > { %v6149_v39 = vpop.f32.mrf.mxu1 }
 0xaa8   : > { %6155 = vmatmul.mubr.msk.bf16.vlgmr.msra.gmra.mxu0 %vm2884_vm1, %v3497_v7  ;;  %v6537_v7 = vld [vmem:[%s7863_s7 + $0x10] sm:$0xff]   ;;  %v6538_v39 = vld [vmem:[%s7863_s7 + $0x8] sm:$0xff]  }
 0xaa9   : > { %6159 = vmatpush3.bf16.msra.mxu0 %v7359_v63  ;;  %6166 = vmatprep.mubr.msk.bf16.mxu0 %vm6580_vm6, %v6579_v10 }
 0xaaa   : > { %6160 = vmatprep.subr.bf16.mxu0 %v6579_v10 }
 0xaad   : > { %6161 = vmatpush3.bf16.msra.mxu0 %v7363_v56 }
 0xaae   : > { %6162 = vmatprep.subr.bf16.mxu0 %v6579_v10 }
 0xab1   : > { %6163 = vmatpush3.bf16.msra.mxu0 %v7351_v62 }
 0xab2   : > { %6164 = vmatprep.subr.bf16.mxu0 %v6579_v10 }
 0xab5   : > { %6165 = vmatpush3.bf16.msra.mxu0 %v7354_v55 }
 0xab6   : > { %6190 = vmatprep.subr.bf16.mxu0 %v6579_v10 }
 0xab8   : > { %6167 = vmatmul.mubr.msk.bf16.vlgmr.msra.gmra.mxu0 %vm2765_vm15, %v6526_v20  ;;  %v6539_v20 = vld [vmem:[%s7863_s7] sm:$0xff]  }
 0xab9   : > { %6194 = vmatprep.mubr.msk.bf16.mxu0 %vm6580_vm6, %v6579_v10 }
 0xb68   : > { %v3551_v42 = vpop.f32.mrf.mxu0 }
 0xb69   : > { %v3558_v58 = vadd.f32 %v3551_v42, %v3443_v28 }
 0xb6a   : > { %v6156_v54 = vpop.f32.mrf.mxu0 }
 0xb6b   : > { %v6540_v54 = vld [vmem:[%s7863_s7 + $0x58] sm:$0xff]  }
 0xb6c   : > { %v3554_v36 = vpop.f32.mrf.mxu0 }
 0xb6d   : > { %v3559_v3 = vadd.f32 %v3554_v36, %v3444_v43  ;;  %v3815_v43 = vld [vmem:[%s7862_s6] sm:$0x3] }
 0xb6e   : > { %v6157_v52 = vpop.f32.mrf.mxu0 }
 0xb78   : > { %v3605_v35 = vpop.f32.mrf.mxu0 }
 0xb7a   : > { %v6168_v37 = vpop.f32.mrf.mxu0 }
 0xb7b   : > { %v6541_v37 = vld [vmem:[%s7863_s7 + $0x50] sm:$0xff]  }
 0xb7c   : > { %v3608_v1 = vpop.f32.mrf.mxu0 }
 0xb7d   : > { %v3612_v9 = vpack.c.bf16 %v3608_v1, %v3605_v35 }
 0xb7e   : > { %v6169_v50 = vpop.f32.mrf.mxu0 }
 0xb7f   : > { %6175 = vmatmul.mubr.msk.bf16.vlgmr.msra.gmra.mxu1 %vm2884_vm1, %v3612_v9  ;;  %v5285_v50 = vld [vmem:[%s7862_s6 + $0x4] sm:$0x3] }
 0xb80   : > { %6179 = vmatpush3.bf16.msra.mxu1 %v7359_v63  ;;  %6186 = vmatprep.mubr.msk.bf16.mxu1 %vm6580_vm6, %v6579_v10  ;;  %v6530_v63 = vld [vmem:[%s7861_s5 + $0x88] sm:$0xff]  }
 0xb81   : > { %6180 = vmatprep.subr.bf16.mxu1 %v6579_v10  ;;  %6191 = vmatpush3.bf16.msra.mxu0 %v6530_v63  ;;  %v6542_v63 = vld [vmem:[%s7863_s7 + $0x48] sm:$0xff]  }
 0xb82   : > { %6192 = vmatprep.subr.bf16.mxu0 %v6579_v10 }
 0xb84   : > { %6181 = vmatpush3.bf16.msra.mxu1 %v7363_v56 }
 0xb85   : > { %6182 = vmatprep.subr.bf16.mxu1 %v6579_v10 }
 0xb88   : > { %6183 = vmatpush3.bf16.msra.mxu1 %v7351_v62  ;;  %v6531_v62 = vld [vmem:[%s7861_s5 + $0x80] sm:$0xff]  }
 0xb89   : > { %6184 = vmatprep.subr.bf16.mxu1 %v6579_v10  ;;  %6193 = vmatpush3.bf16.msra.mxu0 %v6531_v62  ;;  %v6543_v62 = vld [vmem:[%s7863_s7 + $0x78] sm:$0xff]  }
 0xb8a   : > { %6198 = vmatprep.subr.bf16.mxu0 %v6579_v10 }
 0xb8c   : > { %6185 = vmatpush3.bf16.msra.mxu1 %v7354_v55 }
 0xb8d   : > { %6204 = vmatprep.subr.bf16.mxu1 %v6579_v10 }
 0xb8f   : > { %6187 = vmatmul.mubr.msk.bf16.vlgmr.msra.gmra.mxu1 %vm2765_vm15, %v6529_v13  ;;  %v5292_v13 = vld [vmem:[%s7862_s6 + $0x6] sm:$0x3] }
 0xb90   : > { %6206 = vmatprep.mubr.msk.bf16.mxu1 %vm6580_vm6, %v6579_v10 }
 0xc3f   : > { %v3666_v55 = vpop.f32.mrf.mxu1 }
 0xc40   : > { %v3673_v56 = vadd.f32 %v3666_v55, %v3558_v58  ;;  %v6544_v55 = vld [vmem:[%s7863_s7 + $0x40] sm:$0xff]  }
 0xc41   : > { %v6176_v22 = vpop.f32.mrf.mxu1 }
 0xc42   : > { %v6546_v22 = vld [vmem:[%s7863_s7 + $0x68] sm:$0xff]  }
 0xc43   : > { %v3669_v51 = vpop.f32.mrf.mxu1 }
 0xc44   : > { %v3674_v61 = vadd.f32 %v3669_v51, %v3559_v3  ;;  %v6547_v51 = vld [vmem:[%s7863_s7 + $0x60] sm:$0xff]  }
 0xc45   : > { %v6177_v14 = vpop.f32.mrf.mxu1 }
 0xc4f   : > { %v3720_v27 = vpop.f32.mrf.mxu1 }
 0xc51   : > { %v6188_v45 = vpop.f32.mrf.mxu1 }
 0xc53   : > { %v3723_v17 = vpop.f32.mrf.mxu1 }
 0xc54   : > { %v3727_v11 = vpack.c.bf16 %v3723_v17, %v3720_v27 }
 0xc55   : > { %v6189_v0 = vpop.f32.mrf.mxu1 }
 0xc56   : > { %6195 = vmatmul.mubr.msk.bf16.vlgmr.msra.gmra.mxu0 %vm2884_vm1, %v3727_v11 }
 0xc57   : > { %6200 = vmatprep.mubr.msk.bf16.mxu0 %vm6580_vm6, %v6579_v10 }
 0xd16   : > { %v3781_v59 = vpop.f32.mrf.mxu0 }
 0xd17   : > { %v3788_v18 = vadd.f32 %v3781_v59, %v3673_v56  ;;  %v6545_v56 = vld [vmem:[%s7863_s7 + $0x70] sm:$0xff]  }
 0xd18   : > { %v6196_v34 = vpop.f32.mrf.mxu0 }
 0xd19   : > { %v3794_v57 = vadd.f32 %v3793_v8, %v3788_v18 }
 0xd1a   : > { %v3784_v25 = vpop.f32.mrf.mxu0 }
 0xd1b   : > { %vm3796_vm2 = vcmp.gt.f32.partialorder %v3794_v57, 0.0  ;;  %v3798_v47 = vmul.f32 0.2, %v3794_v57  ;;  %v3789_v19 = vadd.f32 %v3784_v25, %v3674_v61 }
 0xd1c   : > { %v6197_v16 = vpop.f32.mrf.mxu0 }
 0xd1d   : > { %v3800_v4 = vsel %vm3796_vm2, %v3794_v57, %v3798_v47  ;;  %v3795_v40 = vadd.f32 %v3793_v8, %v3789_v19  ;;  %v5299_v47 = vld [vmem:[%s7862_s6 + $0x8] sm:$0x3] }
 0xd1e   : > { %v3806_v30 = vmul.f32 %v3805_v60, %v3800_v4  ;;  %v6549_v4 = vld [vmem:[%s7863_s7 + $0x90] sm:$0xff]  }
 0xd1f   : > { %vm3797_vm3 = vcmp.gt.f32.partialorder %v3795_v40, 0.0  ;;  %v3799_v48 = vmul.f32 0.2, %v3795_v40 }
 0xd20   : > { %v3812_v21 = vadd.f32 %v3811_v26, %v3806_v30  ;;  %v6550_v30 = vld [vmem:[%s7863_s7 + $0x88] sm:$0xff]  }
 0xd21   : > { %v3801_v29 = vsel %vm3797_vm3, %v3795_v40, %v3799_v48  ;;  %v5306_v48 = vld [vmem:[%s7862_s6 + $0xa] sm:$0x3] }
 0xd22   : > { %v3807_v15 = vmul.f32 %v3805_v60, %v3801_v29  ;;  %v6548_v60 = vld [vmem:[%s7863_s7 + $0x98] sm:$0xff]   ;;  %v6552_v29 = vld [vmem:[%s7863_s7 + $0x80] sm:$0xff]  }
 0xd24   : > { %v3813_v28 = vadd.f32 %v3811_v26, %v3807_v15  ;;  %v6551_v26 = vld [vmem:[%s7863_s7 + $0xb8] sm:$0xff]   ;;  %v6553_v15 = vld [vmem:[%s7863_s7 + $0xb0] sm:$0xff]  }
 0xd26   : > { %v7594_v53 = vpack.c.bf16 %v3813_v28, %v3812_v21  ;;  %v6554_v21 = vld [vmem:[%s7863_s7 + $0xa8] sm:$0xff]   ;;  %v6555_v28 = vld [vmem:[%s7863_s7 + $0xa0] sm:$0xff]  }
 0xd28   : > { %6199 = vmatpush3.bf16.msra.mxu0 %v7594_v53  ;;  %6205 = vmatpush3.bf16.msra.mxu1 %v7594_v53 }
 0xd29   : > { %6210 = vmatprep.subr.bf16.mxu0 %v6579_v10  ;;  %6222 = vmatprep.subr.bf16.mxu1 %v6579_v10 }
 0xd2b   : > { %6207 = vmatmul.mubr.msk.bf16.vlgmr.msra.gmra.mxu1 %vm1056_vm5, %v5273_v2  ;;  %6201 = vmatmul.mubr.msk.bf16.vlgmr.msra.gmra.mxu0 %vm1056_vm5, %v3815_v43 }
 0xd2c   : > { %6211 = vmatpush3.bf16.msra.mxu0 %v6532_v38  ;;  %6218 = vmatprep.mubr.msk.bf16.mxu0 %vm6580_vm6, %v6579_v10 }
 0xd2d   : > { %6212 = vmatprep.subr.bf16.mxu0 %v6579_v10  ;;  %6230 = vmatprep.mubr.msk.bf16.mxu1 %vm6580_vm6, %v6579_v10 }
 0xd2e   : > { %6223 = vmatpush3.bf16.msra.mxu1 %v6536_v49 }
 0xd2f   : > { %6224 = vmatprep.subr.bf16.mxu1 %v6579_v10 }
 0xd30   : > { %6213 = vmatpush3.bf16.msra.mxu0 %v6533_v32 }
 0xd31   : > { %6214 = vmatprep.subr.bf16.mxu0 %v6579_v10 }
 0xd32   : > { %6225 = vmatpush3.bf16.msra.mxu1 %v6537_v7 }
 0xd33   : > { %6226 = vmatprep.subr.bf16.mxu1 %v6579_v10 }
 0xd34   : > { %6215 = vmatpush3.bf16.msra.mxu0 %v6534_v5 }
 0xd35   : > { %6216 = vmatprep.subr.bf16.mxu0 %v6579_v10 }
 0xd36   : > { %6227 = vmatpush3.bf16.msra.mxu1 %v6538_v39 }
 0xd37   : > { %6228 = vmatprep.subr.bf16.mxu1 %v6579_v10 }
 0xd38   : > { %6217 = vmatpush3.bf16.msra.mxu0 %v6535_v12 }
 0xd39   : > { %6234 = vmatprep.subr.bf16.mxu0 %v6579_v10 }
 0xd3a   : > { %6229 = vmatpush3.bf16.msra.mxu1 %v6539_v20 }
 0xd3b   : > { %6240 = vmatprep.subr.bf16.mxu1 %v6579_v10 }
 0xdeb   : > { %v3907_v44 = vpop.f32.mrf.mxu1  ;;  %v3853_v31 = vpop.f32.mrf.mxu0 }
 0xdec   : > { %v3913_v42 = vpack.c.bf16 %v3907_v44, %v3907_v44  ;;  %v3859_v58 = vpack.c.bf16 %v3853_v31, %v3853_v31 }
 0xded   : > { %v6208_v36 = vpop.f32.mrf.mxu1  ;;  %v6202_v3 = vpop.f32.mrf.mxu0 }
 0xdee   : > { %6219 = vmatmul.mubr.msk.bf16.vlgmr.msra.gmra.mxu0 %vm2765_vm15, %v3913_v42  ;;  %6231 = vmatmul.mubr.msk.bf16.vlgmr.msra.gmra.mxu1 %vm2765_vm15, %v3859_v58  ;;  %v5313_v3 = vld [vmem:[%s7862_s6 + $0xc] sm:$0x3] }
 0xdef   : > { %6235 = vmatpush3.bf16.msra.mxu0 %v7594_v53  ;;  %6236 = vmatprep.mubr.msk.bf16.mxu0 %vm6580_vm6, %v6579_v10  ;;  %v3910_v52 = vpop.f32.mrf.mxu1  ;;  %v3856_v35 = vpop.f32.mrf.mxu0 }
 0xdf0   : > { %6252 = vmatprep.subr.bf16.mxu0 %v6579_v10  ;;  %6241 = vmatpush3.bf16.msra.mxu1 %v6540_v54  ;;  %v6556_v35 = vld [vmem:[%s7863_s7 + $0xd8] sm:$0xff]  }
 0xdf1   : > { %v6209_v1 = vpop.f32.mrf.mxu1  ;;  %v6203_v9 = vpop.f32.mrf.mxu0  ;;  %6242 = vmatprep.subr.bf16.mxu1 %v6579_v10  ;;  %6248 = vmatprep.mubr.msk.bf16.mxu1 %vm6580_vm6, %v6579_v10 }
 0xdf2   : > { %v6557_v9 = vld [vmem:[%s7863_s7 + $0xd0] sm:$0xff]  }
 0xdf4   : > { %6243 = vmatpush3.bf16.msra.mxu1 %v6541_v37 }
 0xdf5   : > { %6244 = vmatprep.subr.bf16.mxu1 %v6579_v10 }
 0xdf6   : > { %6237 = vmatmul.mubr.msk.bf16.vlgmr.msra.gmra.mxu0 %vm1056_vm5, %v5285_v50 }
 0xdf7   : > { %6253 = vmatpush3.bf16.msra.mxu0 %v7594_v53  ;;  %6254 = vmatprep.mubr.msk.bf16.mxu0 %vm6580_vm6, %v6579_v10 }
 0xdf8   : > { %6258 = vmatprep.subr.bf16.mxu0 %v6579_v10  ;;  %6245 = vmatpush3.bf16.msra.mxu1 %v6542_v63  ;;  %v6558_v63 = vld [vmem:[%s7863_s7 + $0xc8] sm:$0xff]  }
 0xdf9   : > { %6246 = vmatprep.subr.bf16.mxu1 %v6579_v10 }
 0xdfc   : > { %6247 = vmatpush3.bf16.msra.mxu1 %v6544_v55  ;;  %v6560_v55 = vld [vmem:[%s7863_s7 + $0xc0] sm:$0xff]  }
 0xdfd   : > { %6270 = vmatprep.subr.bf16.mxu1 %v6579_v10 }
 0xdfe   : > { %6255 = vmatmul.mubr.msk.bf16.vlgmr.msra.gmra.mxu0 %vm1056_vm5, %v5292_v13  ;;  %v5320_v13 = vld [vmem:[%s7862_s6 + $0xe] sm:$0x3] }
 0xdff   : > { %6266 = vmatprep.mubr.msk.bf16.mxu0 %vm6580_vm6, %v6579_v10  ;;  %6259 = vmatpush3.bf16.msra.mxu0 %v6543_v62  ;;  %v6559_v62 = vld [vmem:[%s7863_s7 + $0xf8] sm:$0xff]  }
 0xe00   : > { %6260 = vmatprep.subr.bf16.mxu0 %v6579_v10 }
 0xe03   : > { %6261 = vmatpush3.bf16.msra.mxu0 %v6545_v56  ;;  %v6561_v56 = vld [vmem:[%s7863_s7 + $0xf0] sm:$0xff]  }
 0xe04   : > { %6262 = vmatprep.subr.bf16.mxu0 %v6579_v10 }
 0xe07   : > { %6263 = vmatpush3.bf16.msra.mxu0 %v6546_v22  ;;  %v6562_v22 = vld [vmem:[%s7863_s7 + $0xe8] sm:$0xff]  }
 0xe08   : > { %6264 = vmatprep.subr.bf16.mxu0 %v6579_v10 }
 0xe0b   : > { %6265 = vmatpush3.bf16.msra.mxu0 %v6547_v51  ;;  %v6563_v51 = vld [vmem:[%s7863_s7 + $0xe0] sm:$0xff]  }
 0xe0c   : > { %6288 = vmatprep.subr.bf16.mxu0 %v6579_v10 }
 0xeae   : > { %v3983_v61 = vpop.f32.mrf.mxu0  ;;  %v4050_v14 = vpop.f32.mrf.mxu1 }
 0xeaf   : > { %v4051_v27 = vadd.f32 %v4050_v14, %v3983_v61 }
 0xeb0   : > { %v6220_v45 = vpop.f32.mrf.mxu0  ;;  %v6232_v17 = vpop.f32.mrf.mxu1 }
 0xeb2   : > { %v3986_v11 = vpop.f32.mrf.mxu0  ;;  %v4053_v0 = vpop.f32.mrf.mxu1 }
 0xeb4   : > { %v6221_v6 = vpop.f32.mrf.mxu0  ;;  %v6233_v8 = vpop.f32.mrf.mxu1 }
 0xeb6   : > { %v4095_v59 = vpop.f32.mrf.mxu0 }
 0xeb7   : > { %v4101_v18 = vpack.c.bf16 %v4095_v59, %v4095_v59 }
 0xeb8   : > { %v6238_v41 = vpop.f32.mrf.mxu0 }
 0xeb9   : > { %6249 = vmatmul.mubr.msk.bf16.vlgmr.msra.gmra.mxu1 %vm2765_vm15, %v4101_v18 }
 0xeba   : > { %6271 = vmatpush3.bf16.msra.mxu1 %v7594_v53  ;;  %v4098_v34 = vpop.f32.mrf.mxu0  ;;  %6272 = vmatprep.mubr.msk.bf16.mxu1 %vm6580_vm6, %v6579_v10 }
 0xebb   : > { %6276 = vmatprep.subr.bf16.mxu1 %v6579_v10 }
 0xebc   : > { %v6239_v57 = vpop.f32.mrf.mxu0 }
 0xebe   : > { %v4217_v25 = vpop.f32.mrf.mxu0 }
 0xebf   : > { %v4223_v19 = vpack.c.bf16 %v4217_v25, %v4217_v25 }
 0xec0   : > { %v6256_v33 = vpop.f32.mrf.mxu0 }
 0xec1   : > { %6267 = vmatmul.mubr.msk.bf16.vlgmr.msra.gmra.mxu0 %vm2765_vm15, %v4223_v19  ;;  %6273 = vmatmul.mubr.msk.bf16.vlgmr.msra.gmra.mxu1 %vm1056_vm5, %v5299_v47  ;;  %v5327_v19 = vld [vmem:[%s7862_s6 + $0x10] sm:$0x3] }
 0xec2   : > { %6289 = vmatpush3.bf16.msra.mxu0 %v7594_v53  ;;  %6290 = vmatprep.mubr.msk.bf16.mxu0 %vm6580_vm6, %v6579_v10  ;;  %v4220_v16 = vpop.f32.mrf.mxu0 }
 0xec3   : > { %6277 = vmatpush3.bf16.msra.mxu1 %v6548_v60  ;;  %6294 = vmatprep.subr.bf16.mxu0 %v6579_v10  ;;  %v6564_v60 = vld [vmem:[%s7863_s7 + $0x118] sm:$0xff]  }
 0xec4   : > { %6278 = vmatprep.subr.bf16.mxu1 %v6579_v10  ;;  %v6257_v40 = vpop.f32.mrf.mxu0  ;;  %6284 = vmatprep.mubr.msk.bf16.mxu1 %vm6580_vm6, %v6579_v10 }
 0xec5   : > { %v6565_v40 = vld [vmem:[%s7863_s7 + $0x110] sm:$0xff]  }
 0xec7   : > { %6279 = vmatpush3.bf16.msra.mxu1 %v6549_v4 }
 0xec8   : > { %6280 = vmatprep.subr.bf16.mxu1 %v6579_v10 }
 0xec9   : > { %6291 = vmatmul.mubr.msk.bf16.vlgmr.msra.gmra.mxu0 %vm1056_vm5, %v5306_v48  ;;  %v6566_v48 = vld [vmem:[%s7863_s7 + $0x108] sm:$0xff]  }
 0xeca   : > { %6302 = vmatprep.mubr.msk.bf16.mxu0 %vm6580_vm6, %v6579_v10  ;;  %6295 = vmatpush3.bf16.msra.mxu0 %v6551_v26 }
 0xecb   : > { %6281 = vmatpush3.bf16.msra.mxu1 %v6550_v30  ;;  %6296 = vmatprep.subr.bf16.mxu0 %v6579_v10  ;;  %v6567_v30 = vld [vmem:[%s7863_s7 + $0x100] sm:$0xff]  }
 0xecc   : > { %6282 = vmatprep.subr.bf16.mxu1 %v6579_v10 }
 0xece   : > { %6297 = vmatpush3.bf16.msra.mxu0 %v6553_v15 }
 0xecf   : > { %6283 = vmatpush3.bf16.msra.mxu1 %v6552_v29  ;;  %6298 = vmatprep.subr.bf16.mxu0 %v6579_v10 }
 0xed0   : > { %6306 = vmatprep.subr.bf16.mxu1 %v6579_v10 }
 0xed2   : > { %6299 = vmatpush3.bf16.msra.mxu0 %v6554_v21 }
 0xed3   : > { %6300 = vmatprep.subr.bf16.mxu0 %v6579_v10 }
 0xed6   : > { %6301 = vmatpush3.bf16.msra.mxu0 %v6555_v28 }
 0xed7   : > { %6324 = vmatprep.subr.bf16.mxu0 %v6579_v10 }
 0xf79   : > { %v4171_v2 = vpop.f32.mrf.mxu1 }
 0xf7a   : > { %v4177_v43 = vadd.f32 %v4171_v2, %v4051_v27 }
 0xf7b   : > { %v6250_v38 = vpop.f32.mrf.mxu1 }
 0xf7d   : > { %v4174_v32 = vpop.f32.mrf.mxu1 }
 0xf7f   : > { %v6251_v5 = vpop.f32.mrf.mxu1 }
 0xf81   : > { %v4293_v12 = vpop.f32.mrf.mxu0  ;;  %v4339_v49 = vpop.f32.mrf.mxu1 }
 0xf82   : > { %v4299_v7 = vadd.f32 %v4293_v12, %v4177_v43  ;;  %v4345_v39 = vpack.c.bf16 %v4339_v49, %v4339_v49 }
 0xf83   : > { %v6268_v20 = vpop.f32.mrf.mxu0  ;;  %v6274_v44 = vpop.f32.mrf.mxu1 }
 0xf84   : > { %6285 = vmatmul.mubr.msk.bf16.vlgmr.msra.gmra.mxu1 %vm2765_vm15, %v4345_v39  ;;  %v4912_v20 = vsub.s32 7, %v6691_v23  ;;  %v6569_v44 = vld [vmem:[%s7865_s9] sm:$0xff] }
 0xf85   : > { %6307 = vmatpush3.bf16.msra.mxu1 %v7594_v53  ;;  %v4296_v31 = vpop.f32.mrf.mxu0  ;;  %6308 = vmatprep.mubr.msk.bf16.mxu1 %vm6580_vm6, %v6579_v10  ;;  %v4342_v42 = vpop.f32.mrf.mxu1 }
 0xf86   : > { %6312 = vmatprep.subr.bf16.mxu1 %v6579_v10  ;;  %v4913_v31 = vrot.slane %v6569_v44, %v4912_v20 }
 0xf87   : > { %v6269_v58 = vpop.f32.mrf.mxu0  ;;  %v6275_v54 = vpop.f32.mrf.mxu1 }
 0xf88   : > { %v358_v54 = vld [vmem:[%s7865_s9 + $0x8] sm:$0x7] }
 0xf89   : > { %v4461_v36 = vpop.f32.mrf.mxu0 }
 0xf8a   : > { %v4467_v52 = vpack.c.bf16 %v4461_v36, %v4461_v36 }
 0xf8b   : > { %v6292_v37 = vpop.f32.mrf.mxu0 }
 0xf8c   : > { %6303 = vmatmul.mubr.msk.bf16.vlgmr.msra.gmra.mxu0 %vm2765_vm15, %v4467_v52  ;;  %6309 = vmatmul.mubr.msk.bf16.vlgmr.msra.gmra.mxu1 %vm1056_vm5, %v5313_v3 }
 0xf8d   : > { %6325 = vmatpush3.bf16.msra.mxu0 %v7594_v53  ;;  %6326 = vmatprep.mubr.msk.bf16.mxu0 %vm6580_vm6, %v6579_v10  ;;  %v4464_v1 = vpop.f32.mrf.mxu0 }
 0xf8e   : > { %6313 = vmatpush3.bf16.msra.mxu1 %v6556_v35  ;;  %6330 = vmatprep.subr.bf16.mxu0 %v6579_v10  ;;  %v4921_v35 = vrot.slane %v358_v54, %v395_v24  ;;  %v4926_v1 = vrot.slane %v358_v54, %v2696_v46 }
 0xf8f   : > { %6314 = vmatprep.subr.bf16.mxu1 %v6579_v10  ;;  %v6293_v50 = vpop.f32.mrf.mxu0  ;;  %6320 = vmatprep.mubr.msk.bf16.mxu1 %vm6580_vm6, %v6579_v10 }
 0xf92   : > { %6315 = vmatpush3.bf16.msra.mxu1 %v6557_v9 }
 0xf93   : > { %6316 = vmatprep.subr.bf16.mxu1 %v6579_v10 }
 0xf94   : > { %6327 = vmatmul.mubr.msk.bf16.vlgmr.msra.gmra.mxu0 %vm1056_vm5, %v5320_v13 }
 0xf95   : > { %6338 = vmatprep.mubr.msk.bf16.mxu0 %vm6580_vm6, %v6579_v10  ;;  %6331 = vmatpush3.bf16.msra.mxu0 %v6559_v62 }
 0xf96   : > { %6317 = vmatpush3.bf16.msra.mxu1 %v6558_v63  ;;  %6332 = vmatprep.subr.bf16.mxu0 %v6579_v10  ;;  %v4928_v63 = vld [vmem:[%s7864_s8] sm:$0xf] }
 0xf97   : > { %6318 = vmatprep.subr.bf16.mxu1 %v6579_v10 }
 0xf99   : > { %6333 = vmatpush3.bf16.msra.mxu0 %v6561_v56 }
 0xf9a   : > { %6319 = vmatpush3.bf16.msra.mxu1 %v6560_v55  ;;  %6334 = vmatprep.subr.bf16.mxu0 %v6579_v10 }
 0xf9b   : > { %6342 = vmatprep.subr.bf16.mxu1 %v6579_v10 }
 0xf9d   : > { %6335 = vmatpush3.bf16.msra.mxu0 %v6562_v22 }
 0xf9e   : > { %6336 = vmatprep.subr.bf16.mxu0 %v6579_v10 }
 0xfa1   : > { %6337 = vmatpush3.bf16.msra.mxu0 %v6563_v51 }
0x1044   : > { %v4415_v61 = vpop.f32.mrf.mxu1 }
0x1045   : > { %v4421_v14 = vadd.f32 %v4415_v61, %v4299_v7 }
0x1046   : > { %v6286_v27 = vpop.f32.mrf.mxu1 }
0x1048   : > { %v4418_v45 = vpop.f32.mrf.mxu1 }
0x104a   : > { %v6287_v17 = vpop.f32.mrf.mxu1 }
0x104c   : > { %v4537_v11 = vpop.f32.mrf.mxu0  ;;  %v4583_v0 = vpop.f32.mrf.mxu1 }
0x104d   : > { %v4543_v6 = vadd.f32 %v4537_v11, %v4421_v14  ;;  %v4589_v8 = vpack.c.bf16 %v4583_v0, %v4583_v0 }
0x104e   : > { %v6304_v59 = vpop.f32.mrf.mxu0  ;;  %v6310_v18 = vpop.f32.mrf.mxu1 }
0x104f   : > { %6321 = vmatmul.mubr.msk.bf16.vlgmr.msra.gmra.mxu1 %vm2765_vm15, %v4589_v8 }
0x1050   : > { %6343 = vmatpush3.bf16.msra.mxu1 %v7594_v53  ;;  %v4540_v41 = vpop.f32.mrf.mxu0  ;;  %6344 = vmatprep.mubr.msk.bf16.mxu1 %vm6580_vm6, %v6579_v10  ;;  %v4586_v34 = vpop.f32.mrf.mxu1 }
0x1051   : > { %6348 = vmatprep.subr.bf16.mxu1 %v6579_v10 }
0x1052   : > { %v6305_v57 = vpop.f32.mrf.mxu0  ;;  %v6311_v25 = vpop.f32.mrf.mxu1 }
0x1054   : > { %v4705_v47 = vpop.f32.mrf.mxu0 }
0x1055   : > { %v4711_v33 = vpack.c.bf16 %v4705_v47, %v4705_v47 }
0x1056   : > { %v6328_v53 = vpop.f32.mrf.mxu0 }
0x1057   : > { %6339 = vmatmul.mubr.msk.bf16.vlgmr.msra.gmra.mxu0 %vm2765_vm15, %v4711_v33  ;;  %6345 = vmatmul.mubr.msk.bf16.vlgmr.msra.gmra.mxu1 %vm1056_vm5, %v5327_v19  ;;  %vm4941_vm5 = vcmask 2050  }
0x1058   : > { %6349 = vmatpush3.bf16.msra.mxu1 %v6564_v60  ;;  %v4708_v16 = vpop.f32.mrf.mxu0  ;;  %6356 = vmatprep.mubr.msk.bf16.mxu1 %vm6580_vm6, %v6579_v10 }
0x1059   : > { %6350 = vmatprep.subr.bf16.mxu1 %v6579_v10 }
0x105a   : > { %v6329_v4 = vpop.f32.mrf.mxu0 }
0x105c   : > { %6351 = vmatpush3.bf16.msra.mxu1 %v6565_v40 }
0x105d   : > { %6352 = vmatprep.subr.bf16.mxu1 %v6579_v10 }
0x1060   : > { %6353 = vmatpush3.bf16.msra.mxu1 %v6566_v48 }
0x1061   : > { %6354 = vmatprep.subr.bf16.mxu1 %v6579_v10 }
0x1064   : > { %6355 = vmatpush3.bf16.msra.mxu1 %v6567_v30 }
0x110f   : > { %v4659_v26 = vpop.f32.mrf.mxu1 }
0x1110   : > { %v4665_v29 = vadd.f32 %v4659_v26, %v4543_v6 }
0x1111   : > { %v6322_v15 = vpop.f32.mrf.mxu1 }
0x1113   : > { %v4662_v21 = vpop.f32.mrf.mxu1 }
0x1115   : > { %v6323_v28 = vpop.f32.mrf.mxu1 }
0x1117   : > { %v4781_v2 = vpop.f32.mrf.mxu0  ;;  %v4827_v43 = vpop.f32.mrf.mxu1 }
0x1118   : > { %v4787_v38 = vadd.f32 %v4781_v2, %v4665_v29  ;;  %v4833_v32 = vpack.c.bf16 %v4827_v43, %v4827_v43 }
0x1119   : > { %v6346_v5 = vpop.f32.mrf.mxu1  ;;  %v6340_v12 = vpop.f32.mrf.mxu0 }
0x111a   : > { %6357 = vmatmul.mubr.msk.bf16.vlgmr.msra.gmra.mxu1 %vm2765_vm15, %v4833_v32 }
0x111b   : > { %v4830_v49 = vpop.f32.mrf.mxu1  ;;  %v4784_v10 = vpop.f32.mrf.mxu0 }
0x111d   : > { %v6347_v7 = vpop.f32.mrf.mxu1  ;;  %v6341_v39 = vpop.f32.mrf.mxu0 }
0x11da   : > { %v4903_v42 = vpop.f32.mrf.mxu1 }
0x11db   : > { %v4909_v58 = vadd.f32 %v4903_v42, %v4787_v38 }
0x11dc   : > { %v6358_v36 = vpop.f32.mrf.mxu1 }
0x11dd   : > { %v4914_v3 = vadd.f32 %v4913_v31, %v4909_v58 }
0x11de   : > { %v4906_v52 = vpop.f32.mrf.mxu1 }
0x11df   : > { %vm4915_vm4 = vcmp.gt.f32.partialorder %v4914_v3, 0.0  ;;  %v4916_v37 = vmul.f32 0.2, %v4914_v3 }
0x11e0   : > { %v6359_v9 = vpop.f32.mrf.mxu1 }
0x11e1   : > { %v4917_v50 = vsel %vm4915_vm4, %v4914_v3, %v4916_v37 }
0x11e2   : > { %v4922_v13 = vmul.f32 %v4921_v35, %v4917_v50 }
0x11e4   : > { %v4927_v62 = vadd.f32 %v4926_v1, %v4922_v13 }
0x11e6   : > { %v4929_v55 = vmul.f32 %v4928_v63, %v4927_v62 }
0x11e8   : > { %v4930_v56 = vsel %vm531_vm0, %v4929_v55, 0.0 }
0x11e9   : > { %4931 = vadd.xlane.f32.xlu0 %v4930_v56 }
0x1272   : > { %v4932_v22 = vpop.xlane.xlu0 %4931 }
0x1273   : > { %v4933_v24 = vsel %vm531_vm0, %v4932_v22, 0.0 }
0x1274   : > { %v4934_v51 = vrot.slane %v4933_v24, 4 }
0x1276   : > { %v4935_v61 = vadd.f32 %v4934_v51, %v4933_v24 }
0x1278   : > { %v4936_v23 = vrot.slane %v4935_v61, 2 }
0x127a   : > { %v4937_v46 = vadd.f32 %v4936_v23, %v4935_v61 }
0x127c   : > { %v4938_v14 = vrot.slane %v4937_v46, 1 }
0x127e   : > { %v4939_v27 = vadd.f32 %v4938_v14, %v4937_v46 }
0x1280   : > { %v4940_v45 = vadd.f32 %v4939_v27, %v358_v54 }
0x1282   : > { %4942 = vst.msk [vmem:[%s355_s15 - $0x2] sm:$0x4] %vm4941_vm5, %v4940_v45 }
0x1283 PF: > { %s20_s13 = sadd.s32 1, %s6576_s13  }
0x1284   : > { %p17_p4 = scmp.ge.s32.totalorder %s20_s13, 4  }
0x1286   :  { %19 = sbr.rel (!%p17_p4) target bundleno = 1 (0x1), region = 114 }

</bundles_post_ra>
